<compile_context>
chip_gen: v6e
topology: v6e:2x2x1
jax: 0.10.0
libtpu: 0.0.40
codegen_flags: <defaults>
</compile_context>

<pallas_src>
import functools

import jax
import jax.numpy as jnp
from jax.experimental import pallas as pl
from jax.experimental.pallas import tpu as pltpu


# ----------------------------------------------------------------------------
# Pallas kernel: one GRU layer, one direction per grid step.
# grid = (num_directions,)  ("parallel"); the time loop runs inside the kernel
# with the hidden state carried in vregs.
# ----------------------------------------------------------------------------
def _gru_layer_kernel(lens_ref, x_ref, wih_ref, bx_ref, whh_ref, bh_ref,
                      h0_ref, hseq_ref, hfin_ref, gx_ref):
    T, Bp, Din = x_ref.shape
    H = h0_ref.shape[-1]
    H3 = 3 * H
    rev = pl.program_id(0)            # direction: 0 = forward, 1 = backward

    # ---- hoisted input projection: one wide bf16 MXU matmul over all T ----
    x2 = x_ref[...].reshape(T * Bp, Din)                       # bf16
    gx = jnp.dot(x2, wih_ref[...],
                 preferred_element_type=jnp.float32) + bx_ref[...]
    gx_ref[...] = gx.reshape(T, Bp, H3)                        # f32 VMEM scratch

    # ---- loop-invariant loads / broadcasts (hoisted off the serial chain) ----
    w3 = whh_ref[...]                                          # [H, 3H] bf16
    b_h3 = jnp.broadcast_to(bh_ref[...], (Bp, H3))             # [Bp, 3H] f32
    lens = lens_ref[...]                                       # [Bp, 1] int32

    def step(s, h):
        # original time index (backward direction walks T-1 .. 0)
        t = jnp.where(rev == 1, T - 1 - s, s)
        hb = h.astype(jnp.bfloat16)
        # single fused hidden projection [Bp,H] x [H,3H] (MXU, f32 accumulate)
        gh = jnp.dot(hb, w3, preferred_element_type=jnp.float32) + b_h3
        g = gx_ref[t]                                          # [Bp, 3H] f32
        gsum = g + gh
        # PyTorch gate order: r, z, n
        r = jax.nn.sigmoid(gsum[:, 0:H])
        z = jax.nn.sigmoid(gsum[:, H:2 * H])
        n = jnp.tanh(g[:, 2 * H:H3] + r * gh[:, 2 * H:H3])
        h_new = n + z * (h - n)
        # packed-sequence semantics: freeze hidden past each sequence's length
        h_next = jnp.where(lens > t, h_new, h)
        hseq_ref[t] = h_next.astype(jnp.bfloat16)
        return h_next

    h_last = jax.lax.fori_loop(0, T, step, h0_ref[...],
                               unroll=(T if T <= 16 else 8))
    hfin_ref[...] = h_last            # single f32 write after the loop


def _layer_pallas(x, wih3, bx3, whh3, bh3, h0, lens_col):
    """One GRU layer, all directions in one pallas_call.

    x       : [T, Bp, Din] bf16   layer input (time-major)
    wih3    : [D, Din, 3H] bf16   W_ih^T (gate order r|z|n)
    bx3     : [D, 1, 3H]   f32    b_ih + b_hh for r/z, b_in for n
    whh3    : [D, H, 3H]   bf16   W_hh^T
    bh3     : [D, 1, 3H]   f32    zeros for r/z, b_hn for n
    h0      : [D, Bp, H]   f32
    lens_col: [Bp, 1]      int32
    returns (hseq [D, T, Bp, H] bf16, hfin [D, Bp, H] f32)
    """
    T, Bp, Din = x.shape
    D = wih3.shape[0]
    H = h0.shape[-1]
    H3 = 3 * H

    # Explicit VMEM budget: double-buffered blocks + GX scratch + headroom.
    blk = (Bp * 4 + T * Bp * Din * 2 + Din * H3 * 2 + H3 * 4 + H * H3 * 2
           + H3 * 4 + Bp * H * 4 + T * Bp * H * 2 + Bp * H * 4)
    vmem_limit = int(min(max(2 * blk + T * Bp * H3 * 4 + (4 << 20), 32 << 20),
                         100 << 20))

    hseq, hfin = pl.pallas_call(
        _gru_layer_kernel,
        out_shape=(jax.ShapeDtypeStruct((D, T, Bp, H), jnp.bfloat16),
                   jax.ShapeDtypeStruct((D, Bp, H), jnp.float32)),
        grid_spec=pltpu.PrefetchScalarGridSpec(
            num_scalar_prefetch=0,
            grid=(D,),
            in_specs=[
                pl.BlockSpec((Bp, 1), lambda d: (0, 0)),             # lens (shared)
                pl.BlockSpec((T, Bp, Din), lambda d: (0, 0, 0)),     # x (shared)
                pl.BlockSpec((None, Din, H3), lambda d: (d, 0, 0)),  # W_ih^T
                pl.BlockSpec((None, 1, H3), lambda d: (d, 0, 0)),    # bx3
                pl.BlockSpec((None, H, H3), lambda d: (d, 0, 0)),    # W_hh^T
                pl.BlockSpec((None, 1, H3), lambda d: (d, 0, 0)),    # bh3
                pl.BlockSpec((None, Bp, H), lambda d: (d, 0, 0)),    # h0
            ],
            out_specs=[
                pl.BlockSpec((None, T, Bp, H), lambda d: (d, 0, 0, 0)),
                pl.BlockSpec((None, Bp, H), lambda d: (d, 0, 0)),
            ],
            scratch_shapes=[pltpu.VMEM((T, Bp, H3), jnp.float32)],   # GX slab
        ),
        compiler_params=pltpu.CompilerParams(
            dimension_semantics=("parallel",),     # directions -> 2 TCs on v7x
            vmem_limit_bytes=vmem_limit),
    )(lens_col, x, wih3, bx3, whh3, bh3, h0)
    return hseq, hfin


# ----------------------------------------------------------------------------
# Pure-JAX layer with identical math (bf16 MXU operands, f32 gate math, bf16
# hseq, same masking) for the correctness check.
# ----------------------------------------------------------------------------
def _layer_ref(x, wih3, bx3, whh3, bh3, h0, lens_col):
    T, Bp, Din = x.shape
    D = wih3.shape[0]
    H = h0.shape[-1]
    H3 = 3 * H
    hseq_all, hfin_all = [], []
    for d in range(D):
        gx = (jnp.dot(x.reshape(T * Bp, Din), wih3[d],
                      preferred_element_type=jnp.float32)
              + bx3[d]).reshape(T, Bp, H3)
        h = h0[d]
        outs = [None] * T
        order = range(T) if d == 0 else range(T - 1, -1, -1)
        for t in order:
            hb = h.astype(jnp.bfloat16)
            gh = jnp.dot(hb, whh3[d], preferred_element_type=jnp.float32) + bh3[d]
            g = gx[t]
            gsum = g + gh
            r = jax.nn.sigmoid(gsum[:, 0:H])
            z = jax.nn.sigmoid(gsum[:, H:2 * H])
            n = jnp.tanh(g[:, 2 * H:H3] + r * gh[:, 2 * H:H3])
            h_new = n + z * (h - n)
            h = jnp.where(lens_col > t, h_new, h)
            outs[t] = h.astype(jnp.bfloat16)
        hseq_all.append(jnp.stack(outs, 0))
        hfin_all.append(h)
    return jnp.stack(hseq_all, 0), jnp.stack(hfin_all, 0)


# ----------------------------------------------------------------------------
# One-time parameter prep: pre-transpose, pre-cast (bf16), fold biases.
# ----------------------------------------------------------------------------
def prepare_gru_params(params, num_layers, num_directions, hidden_size):
    H, D = hidden_size, num_directions
    prepped = []
    for l in range(num_layers):
        wih3, whh3, bx3, bh3 = [], [], [], []
        for d in range(D):
            w_ih, w_hh, b_ih, b_hh = params[l * D + d]
            wih3.append(w_ih.T.astype(jnp.bfloat16))     # [Din, 3H]  (r|z|n)
            whh3.append(w_hh.T.astype(jnp.bfloat16))     # [H, 3H]
            bx = jnp.concatenate([
                b_ih[0 * H:1 * H] + b_hh[0 * H:1 * H],   # r: fold both biases
                b_ih[1 * H:2 * H] + b_hh[1 * H:2 * H],   # z: fold both biases
                b_ih[2 * H:3 * H],                       # n: input bias only
            ]).astype(jnp.float32).reshape(1, 3 * H)
            bh = jnp.concatenate([
                jnp.zeros((2 * H,), jnp.float32),        # r/z hidden biases folded above
                b_hh[2 * H:3 * H].astype(jnp.float32),   # b_hn (multiplied by r)
            ]).reshape(1, 3 * H)
            bx3.append(bx)
            bh3.append(bh)
        prepped.append({
            "wih3": jnp.stack(wih3, 0),   # [D, Din, 3H] bf16
            "whh3": jnp.stack(whh3, 0),   # [D, H, 3H]   bf16
            "bx3": jnp.stack(bx3, 0),     # [D, 1, 3H]   f32
            "bh3": jnp.stack(bh3, 0),     # [D, 1, 3H]   f32
        })
    return prepped


# ----------------------------------------------------------------------------
# Model glue shared by the Pallas path and the reference path.
# ----------------------------------------------------------------------------
def _gru_stack(X, X_len, lookup_table, prepped, h0_all,
               num_layers, num_directions, hidden_size, layer_fn):
    B, T = X.shape
    H, D = hidden_size, num_directions
    Bp = ((B + 7) // 8) * 8                  # pad batch to a full sublane group
    pad = Bp - B

    X_p = jnp.pad(X, ((0, pad), (0, 0)))
    len_p = jnp.pad(X_len.astype(jnp.int32), (0, pad))          # padded rows: len 0
    lens_col = len_p[:, None]                                   # [Bp, 1] int32
    h0_p = jnp.pad(h0_all.astype(jnp.float32), ((0, 0), (0, pad), (0, 0)))

    # embedding lookup (plain XLA gather), time-major bf16 MXU operand
    layer_in = jnp.transpose(lookup_table[X_p], (1, 0, 2)).astype(jnp.bfloat16)

    finals = []
    for l in range(num_layers):
        pp = prepped[l]
        h0_l = h0_p[l * D:(l + 1) * D]                          # [D, Bp, H]
        hseq, hfin = layer_fn(layer_in, pp["wih3"], pp["bx3"],
                              pp["whh3"], pp["bh3"], h0_l, lens_col)
        for d in range(D):
            finals.append(hfin[d])
        layer_in = hseq[0] if D == 1 else jnp.concatenate([hseq[0], hseq[1]], axis=-1)

    # matches torch.cat([hidden_state[ix] for ix ...], dim=1) ordering
    return jnp.concatenate(finals, axis=-1)[:B]                 # [B, L*D*H]


def gru_forward(X, X_len, lookup_table, prepped, h0_all,
                num_layers, num_directions, hidden_size):
    return _gru_stack(X, X_len, lookup_table, prepped, h0_all,
                      num_layers, num_directions, hidden_size, _layer_pallas)


def gru_forward_ref(X, X_len, lookup_table, prepped, h0_all,
                    num_layers, num_directions, hidden_size):
    return _gru_stack(X, X_len, lookup_table, prepped, h0_all,
                      num_layers, num_directions, hidden_size, _layer_ref)


def init_gru_params(key, embed_size, hidden_size, num_layers, num_directions):
    params, k = [], key
    bound = 1.0 / (hidden_size ** 0.5)
    for layer in range(num_layers):
        in_size = embed_size if layer == 0 else hidden_size * num_directions
        for _ in range(num_directions):
            k, k1, k2, k3, k4 = jax.random.split(k, 5)
            params.append((
                jax.random.uniform(k1, (3 * hidden_size, in_size), jnp.float32, -bound, bound),
                jax.random.uniform(k2, (3 * hidden_size, hidden_size), jnp.float32, -bound, bound),
                jax.random.uniform(k3, (3 * hidden_size,), jnp.float32, -bound, bound),
                jax.random.uniform(k4, (3 * hidden_size,), jnp.float32, -bound, bound),
            ))
    return params


if __name__ == "__main__":
    vocab, embed_size, hidden_size = 20, 16, 32
    num_layers, bidirectional = 2, True
    num_directions = 2 if bidirectional else 1
    B, T = 4, 8

    key = jax.random.PRNGKey(0)
    k_tab, k_x, k_par, k_h0 = jax.random.split(key, 4)

    lookup_table = jax.random.normal(k_tab, (vocab, embed_size), jnp.float32)
    X = jax.random.randint(k_x, (B, T), 0, vocab, jnp.int32)
    X_len = jnp.array([8, 5, 3, 6], dtype=jnp.int32)
    params = init_gru_params(k_par, embed_size, hidden_size, num_layers, num_directions)
    # init_state: random h_0 (deterministic here via PRNGKey; torch.randn in ref)
    h0_all = jax.random.normal(
        k_h0, (num_layers * num_directions, B, hidden_size), jnp.float32)

    prepped = prepare_gru_params(params, num_layers, num_directions, hidden_size)

    fwd = jax.jit(functools.partial(gru_forward,
                                    num_layers=num_layers,
                                    num_directions=num_directions,
                                    hidden_size=hidden_size))
    out = fwd(X, X_len, lookup_table, prepped, h0_all)
    out = jax.block_until_ready(out)

    ref = gru_forward_ref(X, X_len, lookup_table, prepped, h0_all,
                          num_layers, num_directions, hidden_size)

    assert out.shape == (B, num_layers * num_directions * hidden_size)
    assert jnp.allclose(out, ref, rtol=1e-3, atol=1e-3), "mismatch vs pure-JAX reference"
    print("KERNEL_OK")
</pallas_src>

<mosaic_0001>
module attributes {stable_mosaic.version = 11 : i64} {
  func.func @_gru_layer_kernel(%arg0: i32, %arg1: memref<8x1xi32, #tpu.memory_space<vmem>>, %arg2: memref<8x8x16xbf16, #tpu.memory_space<vmem>>, %arg3: memref<1x16x96xbf16, #tpu.memory_space<vmem>>, %arg4: memref<1x1x96xf32, #tpu.memory_space<vmem>>, %arg5: memref<1x32x96xbf16, #tpu.memory_space<vmem>>, %arg6: memref<1x1x96xf32, #tpu.memory_space<vmem>>, %arg7: memref<1x8x32xf32, #tpu.memory_space<vmem>>, %arg8: memref<1x8x8x32xbf16, #tpu.memory_space<vmem>>, %arg9: memref<1x8x32xf32, #tpu.memory_space<vmem>>, %arg10: memref<8x8x96xf32, #tpu.memory_space<vmem>>) attributes {dimension_semantics = [#tpu.dimension_semantics<parallel>], iteration_bounds = array<i64: 2>, scalar_prefetch = 0 : i64, scratch_operands = 1 : i64, tpu.core_type = #tpu.core_type<tc>, window_params = [{pipeline_mode = #tpu.pipeline_mode<synchronous>, transform_indices = @transform_0, window_bounds = array<i64: 8, 1>}, {pipeline_mode = #tpu.pipeline_mode<synchronous>, transform_indices = @transform_1, window_bounds = array<i64: 8, 8, 16>}, {transform_indices = @transform_2, window_bounds = array<i64: 1, 16, 96>}, {transform_indices = @transform_3, window_bounds = array<i64: 1, 1, 96>}, {transform_indices = @transform_4, window_bounds = array<i64: 1, 32, 96>}, {transform_indices = @transform_5, window_bounds = array<i64: 1, 1, 96>}, {transform_indices = @transform_6, window_bounds = array<i64: 1, 8, 32>}, {transform_indices = @transform_7, window_bounds = array<i64: 1, 8, 8, 32>}, {transform_indices = @transform_8, window_bounds = array<i64: 1, 8, 32>}]} {
    %c0 = arith.constant 0 : index
    %c0_0 = arith.constant 0 : index
    %c0_1 = arith.constant 0 : index
    %0 = vector.load %arg2[%c0, %c0_0, %c0_1] : memref<8x8x16xbf16, #tpu.memory_space<vmem>>, vector<8x8x16xbf16>
    %1 = vector.shape_cast %0 : vector<8x8x16xbf16> to vector<64x16xbf16>
    %c0_2 = arith.constant 0 : index
    %c0_3 = arith.constant 0 : index
    %c0_4 = arith.constant 0 : index
    %2 = vector.load %arg3[%c0_2, %c0_3, %c0_4] : memref<1x16x96xbf16, #tpu.memory_space<vmem>>, vector<1x16x96xbf16>
    %3 = vector.shape_cast %2 : vector<1x16x96xbf16> to vector<16x96xbf16>
    %cst = arith.constant dense<0.000000e+00> : vector<64x96xf32>
    %4 = tpu.matmul %1, %3, %cst {dimension_numbers = #tpu.dot_dimension_numbers<[1], [0], [0], [1], [0, 0, 1, 1], [], []>} : vector<64x16xbf16>, vector<16x96xbf16>, vector<64x96xf32> -> vector<64x96xf32>
    %c0_5 = arith.constant 0 : index
    %c0_6 = arith.constant 0 : index
    %c0_7 = arith.constant 0 : index
    %5 = vector.load %arg4[%c0_5, %c0_6, %c0_7] : memref<1x1x96xf32, #tpu.memory_space<vmem>>, vector<1x1x96xf32>
    %6 = vector.shape_cast %5 : vector<1x1x96xf32> to vector<1x96xf32>
    %7 = vector.broadcast %6 : vector<1x96xf32> to vector<64x96xf32>
    %8 = arith.addf %4, %7 : vector<64x96xf32>
    %9 = vector.shape_cast %8 : vector<64x96xf32> to vector<8x8x96xf32>
    %c0_8 = arith.constant 0 : index
    %c0_9 = arith.constant 0 : index
    %c0_10 = arith.constant 0 : index
    %10 = vector.load %arg10[%c0_8, %c0_9, %c0_10] : memref<8x8x96xf32, #tpu.memory_space<vmem>>, vector<8x8x96xf32>
    tpu.vector_store %arg10[%c0_8, %c0_9, %c0_10], %9 {strides = array<i32>} : memref<8x8x96xf32, #tpu.memory_space<vmem>>, vector<8x8x96xf32>,
    %c0_11 = arith.constant 0 : index
    %c0_12 = arith.constant 0 : index
    %c0_13 = arith.constant 0 : index
    %11 = vector.load %arg5[%c0_11, %c0_12, %c0_13] : memref<1x32x96xbf16, #tpu.memory_space<vmem>>, vector<1x32x96xbf16>
    %12 = vector.shape_cast %11 : vector<1x32x96xbf16> to vector<32x96xbf16>
    %c0_14 = arith.constant 0 : index
    %c0_15 = arith.constant 0 : index
    %c0_16 = arith.constant 0 : index
    %13 = vector.load %arg6[%c0_14, %c0_15, %c0_16] : memref<1x1x96xf32, #tpu.memory_space<vmem>>, vector<1x1x96xf32>
    %14 = vector.shape_cast %13 : vector<1x1x96xf32> to vector<1x96xf32>
    %15 = vector.shape_cast %14 : vector<1x96xf32> to vector<1x96xf32>
    %16 = vector.broadcast %15 : vector<1x96xf32> to vector<8x96xf32>
    %c0_17 = arith.constant 0 : index
    %c0_18 = arith.constant 0 : index
    %17 = vector.load %arg1[%c0_17, %c0_18] : memref<8x1xi32, #tpu.memory_space<vmem>>, vector<8x1xi32>
    %c0_19 = arith.constant 0 : index
    %c0_20 = arith.constant 0 : index
    %c0_21 = arith.constant 0 : index
    %18 = vector.load %arg7[%c0_19, %c0_20, %c0_21] : memref<1x8x32xf32, #tpu.memory_space<vmem>>, vector<1x8x32xf32>
    %19 = vector.shape_cast %18 : vector<1x8x32xf32> to vector<8x32xf32>
    %c0_i32 = arith.constant 0 : i32
    %c1_i32 = arith.constant 1 : i32
    %20 = arith.cmpi eq, %arg0, %c1_i32 : i32
    %c7_i32 = arith.constant 7 : i32
    %21 = arith.subi %c7_i32, %c0_i32 : i32
    %22 = arith.select %20, %21, %c0_i32 : i32
    %23 = arith.truncf %19 : vector<8x32xf32> to vector<8x32xbf16>
    %cst_22 = arith.constant dense<0.000000e+00> : vector<8x96xf32>
    %24 = tpu.matmul %23, %12, %cst_22 {dimension_numbers = #tpu.dot_dimension_numbers<[1], [0], [0], [1], [0, 0, 1, 1], [], []>} : vector<8x32xbf16>, vector<32x96xbf16>, vector<8x96xf32> -> vector<8x96xf32>
    %25 = arith.addf %24, %16 : vector<8x96xf32>
    %26 = arith.index_cast %22 : i32 to index
    %c0_23 = arith.constant 0 : index
    %c0_24 = arith.constant 0 : index
    %27 = vector.load %arg10[%26, %c0_23, %c0_24] : memref<8x8x96xf32, #tpu.memory_space<vmem>>, vector<1x8x96xf32>
    %28 = vector.shape_cast %27 : vector<1x8x96xf32> to vector<8x96xf32>
    %29 = arith.addf %28, %25 : vector<8x96xf32>
    %30 = vector.extract_strided_slice %29 {offsets = [0, 0], sizes = [8, 32], strides = [1, 1]} : vector<8x96xf32> to vector<8x32xf32>
    %31 = arith.negf %30 : vector<8x32xf32>
    %32 = math.exp %31 : vector<8x32xf32>
    %cst_25 = arith.constant 1.000000e+00 : f32
    %33 = vector.broadcast %cst_25 : f32 to vector<8x32xf32>
    %34 = arith.addf %33, %32 : vector<8x32xf32>
    %35 = arith.divf %33, %34 : vector<8x32xf32>
    %36 = vector.extract_strided_slice %29 {offsets = [0, 32], sizes = [8, 32], strides = [1, 1]} : vector<8x96xf32> to vector<8x32xf32>
    %37 = arith.negf %36 : vector<8x32xf32>
    %38 = math.exp %37 : vector<8x32xf32>
    %cst_26 = arith.constant 1.000000e+00 : f32
    %39 = vector.broadcast %cst_26 : f32 to vector<8x32xf32>
    %40 = arith.addf %39, %38 : vector<8x32xf32>
    %41 = arith.divf %39, %40 : vector<8x32xf32>
    %42 = vector.extract_strided_slice %28 {offsets = [0, 64], sizes = [8, 32], strides = [1, 1]} : vector<8x96xf32> to vector<8x32xf32>
    %43 = vector.extract_strided_slice %25 {offsets = [0, 64], sizes = [8, 32], strides = [1, 1]} : vector<8x96xf32> to vector<8x32xf32>
    %44 = arith.mulf %35, %43 : vector<8x32xf32>
    %45 = arith.addf %42, %44 : vector<8x32xf32>
    %46 = math.tanh %45 : vector<8x32xf32>
    %47 = arith.subf %19, %46 : vector<8x32xf32>
    %48 = arith.mulf %41, %47 : vector<8x32xf32>
    %49 = arith.addf %46, %48 : vector<8x32xf32>
    %50 = vector.broadcast %22 : i32 to vector<8x1xi32>
    %51 = arith.cmpi sgt, %17, %50 : vector<8x1xi32>
    %52 = vector.shape_cast %51 : vector<8x1xi1> to vector<8x1xi1>
    %53 = vector.broadcast %52 : vector<8x1xi1> to vector<8x32xi1>
    %54 = arith.select %53, %49, %19 : vector<8x32xi1>, vector<8x32xf32>
    %55 = arith.truncf %54 : vector<8x32xf32> to vector<8x32xbf16>
    %c0_27 = arith.constant 0 : index
    %56 = arith.index_cast %22 : i32 to index
    %c0_28 = arith.constant 0 : index
    %c0_29 = arith.constant 0 : index
    %57 = vector.load %arg8[%c0_27, %56, %c0_28, %c0_29] : memref<1x8x8x32xbf16, #tpu.memory_space<vmem>>, vector<1x1x8x32xbf16>
    %58 = vector.shape_cast %57 : vector<1x1x8x32xbf16> to vector<8x32xbf16>
    %59 = vector.shape_cast %55 : vector<8x32xbf16> to vector<1x1x8x32xbf16>
    tpu.vector_store %arg8[%c0_27, %56, %c0_28, %c0_29], %59 {strides = array<i32>} : memref<1x8x8x32xbf16, #tpu.memory_space<vmem>>, vector<1x1x8x32xbf16>,
    %c1_i32_30 = arith.constant 1 : i32
    %c1_i32_31 = arith.constant 1 : i32
    %60 = arith.cmpi eq, %arg0, %c1_i32_31 : i32
    %c7_i32_32 = arith.constant 7 : i32
    %61 = arith.subi %c7_i32_32, %c1_i32_30 : i32
    %62 = arith.select %60, %61, %c1_i32_30 : i32
    %63 = arith.truncf %54 : vector<8x32xf32> to vector<8x32xbf16>
    %cst_33 = arith.constant dense<0.000000e+00> : vector<8x96xf32>
    %64 = tpu.matmul %63, %12, %cst_33 {dimension_numbers = #tpu.dot_dimension_numbers<[1], [0], [0], [1], [0, 0, 1, 1], [], []>} : vector<8x32xbf16>, vector<32x96xbf16>, vector<8x96xf32> -> vector<8x96xf32>
    %65 = arith.addf %64, %16 : vector<8x96xf32>
    %66 = arith.index_cast %62 : i32 to index
    %c0_34 = arith.constant 0 : index
    %c0_35 = arith.constant 0 : index
    %67 = vector.load %arg10[%66, %c0_34, %c0_35] : memref<8x8x96xf32, #tpu.memory_space<vmem>>, vector<1x8x96xf32>
    %68 = vector.shape_cast %67 : vector<1x8x96xf32> to vector<8x96xf32>
    %69 = arith.addf %68, %65 : vector<8x96xf32>
    %70 = vector.extract_strided_slice %69 {offsets = [0, 0], sizes = [8, 32], strides = [1, 1]} : vector<8x96xf32> to vector<8x32xf32>
    %71 = arith.negf %70 : vector<8x32xf32>
    %72 = math.exp %71 : vector<8x32xf32>
    %cst_36 = arith.constant 1.000000e+00 : f32
    %73 = vector.broadcast %cst_36 : f32 to vector<8x32xf32>
    %74 = arith.addf %73, %72 : vector<8x32xf32>
    %75 = arith.divf %73, %74 : vector<8x32xf32>
    %76 = vector.extract_strided_slice %69 {offsets = [0, 32], sizes = [8, 32], strides = [1, 1]} : vector<8x96xf32> to vector<8x32xf32>
    %77 = arith.negf %76 : vector<8x32xf32>
    %78 = math.exp %77 : vector<8x32xf32>
    %cst_37 = arith.constant 1.000000e+00 : f32
    %79 = vector.broadcast %cst_37 : f32 to vector<8x32xf32>
    %80 = arith.addf %79, %78 : vector<8x32xf32>
    %81 = arith.divf %79, %80 : vector<8x32xf32>
    %82 = vector.extract_strided_slice %68 {offsets = [0, 64], sizes = [8, 32], strides = [1, 1]} : vector<8x96xf32> to vector<8x32xf32>
    %83 = vector.extract_strided_slice %65 {offsets = [0, 64], sizes = [8, 32], strides = [1, 1]} : vector<8x96xf32> to vector<8x32xf32>
    %84 = arith.mulf %75, %83 : vector<8x32xf32>
    %85 = arith.addf %82, %84 : vector<8x32xf32>
    %86 = math.tanh %85 : vector<8x32xf32>
    %87 = arith.subf %54, %86 : vector<8x32xf32>
    %88 = arith.mulf %81, %87 : vector<8x32xf32>
    %89 = arith.addf %86, %88 : vector<8x32xf32>
    %90 = vector.broadcast %62 : i32 to vector<8x1xi32>
    %91 = arith.cmpi sgt, %17, %90 : vector<8x1xi32>
    %92 = vector.shape_cast %91 : vector<8x1xi1> to vector<8x1xi1>
    %93 = vector.broadcast %92 : vector<8x1xi1> to vector<8x32xi1>
    %94 = arith.select %93, %89, %54 : vector<8x32xi1>, vector<8x32xf32>
    %95 = arith.truncf %94 : vector<8x32xf32> to vector<8x32xbf16>
    %c0_38 = arith.constant 0 : index
    %96 = arith.index_cast %62 : i32 to index
    %c0_39 = arith.constant 0 : index
    %c0_40 = arith.constant 0 : index
    %97 = vector.load %arg8[%c0_38, %96, %c0_39, %c0_40] : memref<1x8x8x32xbf16, #tpu.memory_space<vmem>>, vector<1x1x8x32xbf16>
    %98 = vector.shape_cast %97 : vector<1x1x8x32xbf16> to vector<8x32xbf16>
    %99 = vector.shape_cast %95 : vector<8x32xbf16> to vector<1x1x8x32xbf16>
    tpu.vector_store %arg8[%c0_38, %96, %c0_39, %c0_40], %99 {strides = array<i32>} : memref<1x8x8x32xbf16, #tpu.memory_space<vmem>>, vector<1x1x8x32xbf16>,
    %c2_i32 = arith.constant 2 : i32
    %c1_i32_41 = arith.constant 1 : i32
    %100 = arith.cmpi eq, %arg0, %c1_i32_41 : i32
    %c7_i32_42 = arith.constant 7 : i32
    %101 = arith.subi %c7_i32_42, %c2_i32 : i32
    %102 = arith.select %100, %101, %c2_i32 : i32
    %103 = arith.truncf %94 : vector<8x32xf32> to vector<8x32xbf16>
    %cst_43 = arith.constant dense<0.000000e+00> : vector<8x96xf32>
    %104 = tpu.matmul %103, %12, %cst_43 {dimension_numbers = #tpu.dot_dimension_numbers<[1], [0], [0], [1], [0, 0, 1, 1], [], []>} : vector<8x32xbf16>, vector<32x96xbf16>, vector<8x96xf32> -> vector<8x96xf32>
    %105 = arith.addf %104, %16 : vector<8x96xf32>
    %106 = arith.index_cast %102 : i32 to index
    %c0_44 = arith.constant 0 : index
    %c0_45 = arith.constant 0 : index
    %107 = vector.load %arg10[%106, %c0_44, %c0_45] : memref<8x8x96xf32, #tpu.memory_space<vmem>>, vector<1x8x96xf32>
    %108 = vector.shape_cast %107 : vector<1x8x96xf32> to vector<8x96xf32>
    %109 = arith.addf %108, %105 : vector<8x96xf32>
    %110 = vector.extract_strided_slice %109 {offsets = [0, 0], sizes = [8, 32], strides = [1, 1]} : vector<8x96xf32> to vector<8x32xf32>
    %111 = arith.negf %110 : vector<8x32xf32>
    %112 = math.exp %111 : vector<8x32xf32>
    %cst_46 = arith.constant 1.000000e+00 : f32
    %113 = vector.broadcast %cst_46 : f32 to vector<8x32xf32>
    %114 = arith.addf %113, %112 : vector<8x32xf32>
    %115 = arith.divf %113, %114 : vector<8x32xf32>
    %116 = vector.extract_strided_slice %109 {offsets = [0, 32], sizes = [8, 32], strides = [1, 1]} : vector<8x96xf32> to vector<8x32xf32>
    %117 = arith.negf %116 : vector<8x32xf32>
    %118 = math.exp %117 : vector<8x32xf32>
    %cst_47 = arith.constant 1.000000e+00 : f32
    %119 = vector.broadcast %cst_47 : f32 to vector<8x32xf32>
    %120 = arith.addf %119, %118 : vector<8x32xf32>
    %121 = arith.divf %119, %120 : vector<8x32xf32>
    %122 = vector.extract_strided_slice %108 {offsets = [0, 64], sizes = [8, 32], strides = [1, 1]} : vector<8x96xf32> to vector<8x32xf32>
    %123 = vector.extract_strided_slice %105 {offsets = [0, 64], sizes = [8, 32], strides = [1, 1]} : vector<8x96xf32> to vector<8x32xf32>
    %124 = arith.mulf %115, %123 : vector<8x32xf32>
    %125 = arith.addf %122, %124 : vector<8x32xf32>
    %126 = math.tanh %125 : vector<8x32xf32>
    %127 = arith.subf %94, %126 : vector<8x32xf32>
    %128 = arith.mulf %121, %127 : vector<8x32xf32>
    %129 = arith.addf %126, %128 : vector<8x32xf32>
    %130 = vector.broadcast %102 : i32 to vector<8x1xi32>
    %131 = arith.cmpi sgt, %17, %130 : vector<8x1xi32>
    %132 = vector.shape_cast %131 : vector<8x1xi1> to vector<8x1xi1>
    %133 = vector.broadcast %132 : vector<8x1xi1> to vector<8x32xi1>
    %134 = arith.select %133, %129, %94 : vector<8x32xi1>, vector<8x32xf32>
    %135 = arith.truncf %134 : vector<8x32xf32> to vector<8x32xbf16>
    %c0_48 = arith.constant 0 : index
    %136 = arith.index_cast %102 : i32 to index
    %c0_49 = arith.constant 0 : index
    %c0_50 = arith.constant 0 : index
    %137 = vector.load %arg8[%c0_48, %136, %c0_49, %c0_50] : memref<1x8x8x32xbf16, #tpu.memory_space<vmem>>, vector<1x1x8x32xbf16>
    %138 = vector.shape_cast %137 : vector<1x1x8x32xbf16> to vector<8x32xbf16>
    %139 = vector.shape_cast %135 : vector<8x32xbf16> to vector<1x1x8x32xbf16>
    tpu.vector_store %arg8[%c0_48, %136, %c0_49, %c0_50], %139 {strides = array<i32>} : memref<1x8x8x32xbf16, #tpu.memory_space<vmem>>, vector<1x1x8x32xbf16>,
    %c3_i32 = arith.constant 3 : i32
    %c1_i32_51 = arith.constant 1 : i32
    %140 = arith.cmpi eq, %arg0, %c1_i32_51 : i32
    %c7_i32_52 = arith.constant 7 : i32
    %141 = arith.subi %c7_i32_52, %c3_i32 : i32
    %142 = arith.select %140, %141, %c3_i32 : i32
    %143 = arith.truncf %134 : vector<8x32xf32> to vector<8x32xbf16>
    %cst_53 = arith.constant dense<0.000000e+00> : vector<8x96xf32>
    %144 = tpu.matmul %143, %12, %cst_53 {dimension_numbers = #tpu.dot_dimension_numbers<[1], [0], [0], [1], [0, 0, 1, 1], [], []>} : vector<8x32xbf16>, vector<32x96xbf16>, vector<8x96xf32> -> vector<8x96xf32>
    %145 = arith.addf %144, %16 : vector<8x96xf32>
    %146 = arith.index_cast %142 : i32 to index
    %c0_54 = arith.constant 0 : index
    %c0_55 = arith.constant 0 : index
    %147 = vector.load %arg10[%146, %c0_54, %c0_55] : memref<8x8x96xf32, #tpu.memory_space<vmem>>, vector<1x8x96xf32>
    %148 = vector.shape_cast %147 : vector<1x8x96xf32> to vector<8x96xf32>
    %149 = arith.addf %148, %145 : vector<8x96xf32>
    %150 = vector.extract_strided_slice %149 {offsets = [0, 0], sizes = [8, 32], strides = [1, 1]} : vector<8x96xf32> to vector<8x32xf32>
    %151 = arith.negf %150 : vector<8x32xf32>
    %152 = math.exp %151 : vector<8x32xf32>
    %cst_56 = arith.constant 1.000000e+00 : f32
    %153 = vector.broadcast %cst_56 : f32 to vector<8x32xf32>
    %154 = arith.addf %153, %152 : vector<8x32xf32>
    %155 = arith.divf %153, %154 : vector<8x32xf32>
    %156 = vector.extract_strided_slice %149 {offsets = [0, 32], sizes = [8, 32], strides = [1, 1]} : vector<8x96xf32> to vector<8x32xf32>
    %157 = arith.negf %156 : vector<8x32xf32>
    %158 = math.exp %157 : vector<8x32xf32>
    %cst_57 = arith.constant 1.000000e+00 : f32
    %159 = vector.broadcast %cst_57 : f32 to vector<8x32xf32>
    %160 = arith.addf %159, %158 : vector<8x32xf32>
    %161 = arith.divf %159, %160 : vector<8x32xf32>
    %162 = vector.extract_strided_slice %148 {offsets = [0, 64], sizes = [8, 32], strides = [1, 1]} : vector<8x96xf32> to vector<8x32xf32>
    %163 = vector.extract_strided_slice %145 {offsets = [0, 64], sizes = [8, 32], strides = [1, 1]} : vector<8x96xf32> to vector<8x32xf32>
    %164 = arith.mulf %155, %163 : vector<8x32xf32>
    %165 = arith.addf %162, %164 : vector<8x32xf32>
    %166 = math.tanh %165 : vector<8x32xf32>
    %167 = arith.subf %134, %166 : vector<8x32xf32>
    %168 = arith.mulf %161, %167 : vector<8x32xf32>
    %169 = arith.addf %166, %168 : vector<8x32xf32>
    %170 = vector.broadcast %142 : i32 to vector<8x1xi32>
    %171 = arith.cmpi sgt, %17, %170 : vector<8x1xi32>
    %172 = vector.shape_cast %171 : vector<8x1xi1> to vector<8x1xi1>
    %173 = vector.broadcast %172 : vector<8x1xi1> to vector<8x32xi1>
    %174 = arith.select %173, %169, %134 : vector<8x32xi1>, vector<8x32xf32>
    %175 = arith.truncf %174 : vector<8x32xf32> to vector<8x32xbf16>
    %c0_58 = arith.constant 0 : index
    %176 = arith.index_cast %142 : i32 to index
    %c0_59 = arith.constant 0 : index
    %c0_60 = arith.constant 0 : index
    %177 = vector.load %arg8[%c0_58, %176, %c0_59, %c0_60] : memref<1x8x8x32xbf16, #tpu.memory_space<vmem>>, vector<1x1x8x32xbf16>
    %178 = vector.shape_cast %177 : vector<1x1x8x32xbf16> to vector<8x32xbf16>
    %179 = vector.shape_cast %175 : vector<8x32xbf16> to vector<1x1x8x32xbf16>
    tpu.vector_store %arg8[%c0_58, %176, %c0_59, %c0_60], %179 {strides = array<i32>} : memref<1x8x8x32xbf16, #tpu.memory_space<vmem>>, vector<1x1x8x32xbf16>,
    %c4_i32 = arith.constant 4 : i32
    %c1_i32_61 = arith.constant 1 : i32
    %180 = arith.cmpi eq, %arg0, %c1_i32_61 : i32
    %c7_i32_62 = arith.constant 7 : i32
    %181 = arith.subi %c7_i32_62, %c4_i32 : i32
    %182 = arith.select %180, %181, %c4_i32 : i32
    %183 = arith.truncf %174 : vector<8x32xf32> to vector<8x32xbf16>
    %cst_63 = arith.constant dense<0.000000e+00> : vector<8x96xf32>
    %184 = tpu.matmul %183, %12, %cst_63 {dimension_numbers = #tpu.dot_dimension_numbers<[1], [0], [0], [1], [0, 0, 1, 1], [], []>} : vector<8x32xbf16>, vector<32x96xbf16>, vector<8x96xf32> -> vector<8x96xf32>
    %185 = arith.addf %184, %16 : vector<8x96xf32>
    %186 = arith.index_cast %182 : i32 to index
    %c0_64 = arith.constant 0 : index
    %c0_65 = arith.constant 0 : index
    %187 = vector.load %arg10[%186, %c0_64, %c0_65] : memref<8x8x96xf32, #tpu.memory_space<vmem>>, vector<1x8x96xf32>
    %188 = vector.shape_cast %187 : vector<1x8x96xf32> to vector<8x96xf32>
    %189 = arith.addf %188, %185 : vector<8x96xf32>
    %190 = vector.extract_strided_slice %189 {offsets = [0, 0], sizes = [8, 32], strides = [1, 1]} : vector<8x96xf32> to vector<8x32xf32>
    %191 = arith.negf %190 : vector<8x32xf32>
    %192 = math.exp %191 : vector<8x32xf32>
    %cst_66 = arith.constant 1.000000e+00 : f32
    %193 = vector.broadcast %cst_66 : f32 to vector<8x32xf32>
    %194 = arith.addf %193, %192 : vector<8x32xf32>
    %195 = arith.divf %193, %194 : vector<8x32xf32>
    %196 = vector.extract_strided_slice %189 {offsets = [0, 32], sizes = [8, 32], strides = [1, 1]} : vector<8x96xf32> to vector<8x32xf32>
    %197 = arith.negf %196 : vector<8x32xf32>
    %198 = math.exp %197 : vector<8x32xf32>
    %cst_67 = arith.constant 1.000000e+00 : f32
    %199 = vector.broadcast %cst_67 : f32 to vector<8x32xf32>
    %200 = arith.addf %199, %198 : vector<8x32xf32>
    %201 = arith.divf %199, %200 : vector<8x32xf32>
    %202 = vector.extract_strided_slice %188 {offsets = [0, 64], sizes = [8, 32], strides = [1, 1]} : vector<8x96xf32> to vector<8x32xf32>
    %203 = vector.extract_strided_slice %185 {offsets = [0, 64], sizes = [8, 32], strides = [1, 1]} : vector<8x96xf32> to vector<8x32xf32>
    %204 = arith.mulf %195, %203 : vector<8x32xf32>
    %205 = arith.addf %202, %204 : vector<8x32xf32>
    %206 = math.tanh %205 : vector<8x32xf32>
    %207 = arith.subf %174, %206 : vector<8x32xf32>
    %208 = arith.mulf %201, %207 : vector<8x32xf32>
    %209 = arith.addf %206, %208 : vector<8x32xf32>
    %210 = vector.broadcast %182 : i32 to vector<8x1xi32>
    %211 = arith.cmpi sgt, %17, %210 : vector<8x1xi32>
    %212 = vector.shape_cast %211 : vector<8x1xi1> to vector<8x1xi1>
    %213 = vector.broadcast %212 : vector<8x1xi1> to vector<8x32xi1>
    %214 = arith.select %213, %209, %174 : vector<8x32xi1>, vector<8x32xf32>
    %215 = arith.truncf %214 : vector<8x32xf32> to vector<8x32xbf16>
    %c0_68 = arith.constant 0 : index
    %216 = arith.index_cast %182 : i32 to index
    %c0_69 = arith.constant 0 : index
    %c0_70 = arith.constant 0 : index
    %217 = vector.load %arg8[%c0_68, %216, %c0_69, %c0_70] : memref<1x8x8x32xbf16, #tpu.memory_space<vmem>>, vector<1x1x8x32xbf16>
    %218 = vector.shape_cast %217 : vector<1x1x8x32xbf16> to vector<8x32xbf16>
    %219 = vector.shape_cast %215 : vector<8x32xbf16> to vector<1x1x8x32xbf16>
    tpu.vector_store %arg8[%c0_68, %216, %c0_69, %c0_70], %219 {strides = array<i32>} : memref<1x8x8x32xbf16, #tpu.memory_space<vmem>>, vector<1x1x8x32xbf16>,
    %c5_i32 = arith.constant 5 : i32
    %c1_i32_71 = arith.constant 1 : i32
    %220 = arith.cmpi eq, %arg0, %c1_i32_71 : i32
    %c7_i32_72 = arith.constant 7 : i32
    %221 = arith.subi %c7_i32_72, %c5_i32 : i32
    %222 = arith.select %220, %221, %c5_i32 : i32
    %223 = arith.truncf %214 : vector<8x32xf32> to vector<8x32xbf16>
    %cst_73 = arith.constant dense<0.000000e+00> : vector<8x96xf32>
    %224 = tpu.matmul %223, %12, %cst_73 {dimension_numbers = #tpu.dot_dimension_numbers<[1], [0], [0], [1], [0, 0, 1, 1], [], []>} : vector<8x32xbf16>, vector<32x96xbf16>, vector<8x96xf32> -> vector<8x96xf32>
    %225 = arith.addf %224, %16 : vector<8x96xf32>
    %226 = arith.index_cast %222 : i32 to index
    %c0_74 = arith.constant 0 : index
    %c0_75 = arith.constant 0 : index
    %227 = vector.load %arg10[%226, %c0_74, %c0_75] : memref<8x8x96xf32, #tpu.memory_space<vmem>>, vector<1x8x96xf32>
    %228 = vector.shape_cast %227 : vector<1x8x96xf32> to vector<8x96xf32>
    %229 = arith.addf %228, %225 : vector<8x96xf32>
    %230 = vector.extract_strided_slice %229 {offsets = [0, 0], sizes = [8, 32], strides = [1, 1]} : vector<8x96xf32> to vector<8x32xf32>
    %231 = arith.negf %230 : vector<8x32xf32>
    %232 = math.exp %231 : vector<8x32xf32>
    %cst_76 = arith.constant 1.000000e+00 : f32
    %233 = vector.broadcast %cst_76 : f32 to vector<8x32xf32>
    %234 = arith.addf %233, %232 : vector<8x32xf32>
    %235 = arith.divf %233, %234 : vector<8x32xf32>
    %236 = vector.extract_strided_slice %229 {offsets = [0, 32], sizes = [8, 32], strides = [1, 1]} : vector<8x96xf32> to vector<8x32xf32>
    %237 = arith.negf %236 : vector<8x32xf32>
    %238 = math.exp %237 : vector<8x32xf32>
    %cst_77 = arith.constant 1.000000e+00 : f32
    %239 = vector.broadcast %cst_77 : f32 to vector<8x32xf32>
    %240 = arith.addf %239, %238 : vector<8x32xf32>
    %241 = arith.divf %239, %240 : vector<8x32xf32>
    %242 = vector.extract_strided_slice %228 {offsets = [0, 64], sizes = [8, 32], strides = [1, 1]} : vector<8x96xf32> to vector<8x32xf32>
    %243 = vector.extract_strided_slice %225 {offsets = [0, 64], sizes = [8, 32], strides = [1, 1]} : vector<8x96xf32> to vector<8x32xf32>
    %244 = arith.mulf %235, %243 : vector<8x32xf32>
    %245 = arith.addf %242, %244 : vector<8x32xf32>
    %246 = math.tanh %245 : vector<8x32xf32>
    %247 = arith.subf %214, %246 : vector<8x32xf32>
    %248 = arith.mulf %241, %247 : vector<8x32xf32>
    %249 = arith.addf %246, %248 : vector<8x32xf32>
    %250 = vector.broadcast %222 : i32 to vector<8x1xi32>
    %251 = arith.cmpi sgt, %17, %250 : vector<8x1xi32>
    %252 = vector.shape_cast %251 : vector<8x1xi1> to vector<8x1xi1>
    %253 = vector.broadcast %252 : vector<8x1xi1> to vector<8x32xi1>
    %254 = arith.select %253, %249, %214 : vector<8x32xi1>, vector<8x32xf32>
    %255 = arith.truncf %254 : vector<8x32xf32> to vector<8x32xbf16>
    %c0_78 = arith.constant 0 : index
    %256 = arith.index_cast %222 : i32 to index
    %c0_79 = arith.constant 0 : index
    %c0_80 = arith.constant 0 : index
    %257 = vector.load %arg8[%c0_78, %256, %c0_79, %c0_80] : memref<1x8x8x32xbf16, #tpu.memory_space<vmem>>, vector<1x1x8x32xbf16>
    %258 = vector.shape_cast %257 : vector<1x1x8x32xbf16> to vector<8x32xbf16>
    %259 = vector.shape_cast %255 : vector<8x32xbf16> to vector<1x1x8x32xbf16>
    tpu.vector_store %arg8[%c0_78, %256, %c0_79, %c0_80], %259 {strides = array<i32>} : memref<1x8x8x32xbf16, #tpu.memory_space<vmem>>, vector<1x1x8x32xbf16>,
    %c6_i32 = arith.constant 6 : i32
    %c1_i32_81 = arith.constant 1 : i32
    %260 = arith.cmpi eq, %arg0, %c1_i32_81 : i32
    %c7_i32_82 = arith.constant 7 : i32
    %261 = arith.subi %c7_i32_82, %c6_i32 : i32
    %262 = arith.select %260, %261, %c6_i32 : i32
    %263 = arith.truncf %254 : vector<8x32xf32> to vector<8x32xbf16>
    %cst_83 = arith.constant dense<0.000000e+00> : vector<8x96xf32>
    %264 = tpu.matmul %263, %12, %cst_83 {dimension_numbers = #tpu.dot_dimension_numbers<[1], [0], [0], [1], [0, 0, 1, 1], [], []>} : vector<8x32xbf16>, vector<32x96xbf16>, vector<8x96xf32> -> vector<8x96xf32>
    %265 = arith.addf %264, %16 : vector<8x96xf32>
    %266 = arith.index_cast %262 : i32 to index
    %c0_84 = arith.constant 0 : index
    %c0_85 = arith.constant 0 : index
    %267 = vector.load %arg10[%266, %c0_84, %c0_85] : memref<8x8x96xf32, #tpu.memory_space<vmem>>, vector<1x8x96xf32>
    %268 = vector.shape_cast %267 : vector<1x8x96xf32> to vector<8x96xf32>
    %269 = arith.addf %268, %265 : vector<8x96xf32>
    %270 = vector.extract_strided_slice %269 {offsets = [0, 0], sizes = [8, 32], strides = [1, 1]} : vector<8x96xf32> to vector<8x32xf32>
    %271 = arith.negf %270 : vector<8x32xf32>
    %272 = math.exp %271 : vector<8x32xf32>
    %cst_86 = arith.constant 1.000000e+00 : f32
    %273 = vector.broadcast %cst_86 : f32 to vector<8x32xf32>
    %274 = arith.addf %273, %272 : vector<8x32xf32>
    %275 = arith.divf %273, %274 : vector<8x32xf32>
    %276 = vector.extract_strided_slice %269 {offsets = [0, 32], sizes = [8, 32], strides = [1, 1]} : vector<8x96xf32> to vector<8x32xf32>
    %277 = arith.negf %276 : vector<8x32xf32>
    %278 = math.exp %277 : vector<8x32xf32>
    %cst_87 = arith.constant 1.000000e+00 : f32
    %279 = vector.broadcast %cst_87 : f32 to vector<8x32xf32>
    %280 = arith.addf %279, %278 : vector<8x32xf32>
    %281 = arith.divf %279, %280 : vector<8x32xf32>
    %282 = vector.extract_strided_slice %268 {offsets = [0, 64], sizes = [8, 32], strides = [1, 1]} : vector<8x96xf32> to vector<8x32xf32>
    %283 = vector.extract_strided_slice %265 {offsets = [0, 64], sizes = [8, 32], strides = [1, 1]} : vector<8x96xf32> to vector<8x32xf32>
    %284 = arith.mulf %275, %283 : vector<8x32xf32>
    %285 = arith.addf %282, %284 : vector<8x32xf32>
    %286 = math.tanh %285 : vector<8x32xf32>
    %287 = arith.subf %254, %286 : vector<8x32xf32>
    %288 = arith.mulf %281, %287 : vector<8x32xf32>
    %289 = arith.addf %286, %288 : vector<8x32xf32>
    %290 = vector.broadcast %262 : i32 to vector<8x1xi32>
    %291 = arith.cmpi sgt, %17, %290 : vector<8x1xi32>
    %292 = vector.shape_cast %291 : vector<8x1xi1> to vector<8x1xi1>
    %293 = vector.broadcast %292 : vector<8x1xi1> to vector<8x32xi1>
    %294 = arith.select %293, %289, %254 : vector<8x32xi1>, vector<8x32xf32>
    %295 = arith.truncf %294 : vector<8x32xf32> to vector<8x32xbf16>
    %c0_88 = arith.constant 0 : index
    %296 = arith.index_cast %262 : i32 to index
    %c0_89 = arith.constant 0 : index
    %c0_90 = arith.constant 0 : index
    %297 = vector.load %arg8[%c0_88, %296, %c0_89, %c0_90] : memref<1x8x8x32xbf16, #tpu.memory_space<vmem>>, vector<1x1x8x32xbf16>
    %298 = vector.shape_cast %297 : vector<1x1x8x32xbf16> to vector<8x32xbf16>
    %299 = vector.shape_cast %295 : vector<8x32xbf16> to vector<1x1x8x32xbf16>
    tpu.vector_store %arg8[%c0_88, %296, %c0_89, %c0_90], %299 {strides = array<i32>} : memref<1x8x8x32xbf16, #tpu.memory_space<vmem>>, vector<1x1x8x32xbf16>,
    %c7_i32_91 = arith.constant 7 : i32
    %c1_i32_92 = arith.constant 1 : i32
    %300 = arith.cmpi eq, %arg0, %c1_i32_92 : i32
    %c7_i32_93 = arith.constant 7 : i32
    %301 = arith.subi %c7_i32_93, %c7_i32_91 : i32
    %302 = arith.select %300, %301, %c7_i32_91 : i32
    %303 = arith.truncf %294 : vector<8x32xf32> to vector<8x32xbf16>
    %cst_94 = arith.constant dense<0.000000e+00> : vector<8x96xf32>
    %304 = tpu.matmul %303, %12, %cst_94 {dimension_numbers = #tpu.dot_dimension_numbers<[1], [0], [0], [1], [0, 0, 1, 1], [], []>} : vector<8x32xbf16>, vector<32x96xbf16>, vector<8x96xf32> -> vector<8x96xf32>
    %305 = arith.addf %304, %16 : vector<8x96xf32>
    %306 = arith.index_cast %302 : i32 to index
    %c0_95 = arith.constant 0 : index
    %c0_96 = arith.constant 0 : index
    %307 = vector.load %arg10[%306, %c0_95, %c0_96] : memref<8x8x96xf32, #tpu.memory_space<vmem>>, vector<1x8x96xf32>
    %308 = vector.shape_cast %307 : vector<1x8x96xf32> to vector<8x96xf32>
    %309 = arith.addf %308, %305 : vector<8x96xf32>
    %310 = vector.extract_strided_slice %309 {offsets = [0, 0], sizes = [8, 32], strides = [1, 1]} : vector<8x96xf32> to vector<8x32xf32>
    %311 = arith.negf %310 : vector<8x32xf32>
    %312 = math.exp %311 : vector<8x32xf32>
    %cst_97 = arith.constant 1.000000e+00 : f32
    %313 = vector.broadcast %cst_97 : f32 to vector<8x32xf32>
    %314 = arith.addf %313, %312 : vector<8x32xf32>
    %315 = arith.divf %313, %314 : vector<8x32xf32>
    %316 = vector.extract_strided_slice %309 {offsets = [0, 32], sizes = [8, 32], strides = [1, 1]} : vector<8x96xf32> to vector<8x32xf32>
    %317 = arith.negf %316 : vector<8x32xf32>
    %318 = math.exp %317 : vector<8x32xf32>
    %cst_98 = arith.constant 1.000000e+00 : f32
    %319 = vector.broadcast %cst_98 : f32 to vector<8x32xf32>
    %320 = arith.addf %319, %318 : vector<8x32xf32>
    %321 = arith.divf %319, %320 : vector<8x32xf32>
    %322 = vector.extract_strided_slice %308 {offsets = [0, 64], sizes = [8, 32], strides = [1, 1]} : vector<8x96xf32> to vector<8x32xf32>
    %323 = vector.extract_strided_slice %305 {offsets = [0, 64], sizes = [8, 32], strides = [1, 1]} : vector<8x96xf32> to vector<8x32xf32>
    %324 = arith.mulf %315, %323 : vector<8x32xf32>
    %325 = arith.addf %322, %324 : vector<8x32xf32>
    %326 = math.tanh %325 : vector<8x32xf32>
    %327 = arith.subf %294, %326 : vector<8x32xf32>
    %328 = arith.mulf %321, %327 : vector<8x32xf32>
    %329 = arith.addf %326, %328 : vector<8x32xf32>
    %330 = vector.broadcast %302 : i32 to vector<8x1xi32>
    %331 = arith.cmpi sgt, %17, %330 : vector<8x1xi32>
    %332 = vector.shape_cast %331 : vector<8x1xi1> to vector<8x1xi1>
    %333 = vector.broadcast %332 : vector<8x1xi1> to vector<8x32xi1>
    %334 = arith.select %333, %329, %294 : vector<8x32xi1>, vector<8x32xf32>
    %335 = arith.truncf %334 : vector<8x32xf32> to vector<8x32xbf16>
    %c0_99 = arith.constant 0 : index
    %336 = arith.index_cast %302 : i32 to index
    %c0_100 = arith.constant 0 : index
    %c0_101 = arith.constant 0 : index
    %337 = vector.load %arg8[%c0_99, %336, %c0_100, %c0_101] : memref<1x8x8x32xbf16, #tpu.memory_space<vmem>>, vector<1x1x8x32xbf16>
    %338 = vector.shape_cast %337 : vector<1x1x8x32xbf16> to vector<8x32xbf16>
    %339 = vector.shape_cast %335 : vector<8x32xbf16> to vector<1x1x8x32xbf16>
    tpu.vector_store %arg8[%c0_99, %336, %c0_100, %c0_101], %339 {strides = array<i32>} : memref<1x8x8x32xbf16, #tpu.memory_space<vmem>>, vector<1x1x8x32xbf16>,
    %c8_i32 = arith.constant 8 : i32
    %c0_102 = arith.constant 0 : index
    %c0_103 = arith.constant 0 : index
    %c0_104 = arith.constant 0 : index
    %340 = vector.load %arg9[%c0_102, %c0_103, %c0_104] : memref<1x8x32xf32, #tpu.memory_space<vmem>>, vector<1x8x32xf32>
    %341 = vector.shape_cast %340 : vector<1x8x32xf32> to vector<8x32xf32>
    %342 = vector.shape_cast %334 : vector<8x32xf32> to vector<1x8x32xf32>
    tpu.vector_store %arg9[%c0_102, %c0_103, %c0_104], %342 {strides = array<i32>} : memref<1x8x32xf32, #tpu.memory_space<vmem>>, vector<1x8x32xf32>,
    return
  }
  func.func @transform_0(%arg0: i32) -> (i32, i32) {
    %c0_i32 = arith.constant 0 : i32
    %c0_i32_0 = arith.constant 0 : i32
    %c0_i32_1 = arith.constant 0 : i32
    return %c0_i32, %c0_i32_0 : i32, i32
  }
  func.func @transform_1(%arg0: i32) -> (i32, i32, i32) {
    %c0_i32 = arith.constant 0 : i32
    %c0_i32_0 = arith.constant 0 : i32
    %c0_i32_1 = arith.constant 0 : i32
    %c0_i32_2 = arith.constant 0 : i32
    return %c0_i32, %c0_i32_0, %c0_i32_1 : i32, i32, i32
  }
  func.func @transform_2(%arg0: i32) -> (i32, i32, i32) {
    %c0_i32 = arith.constant 0 : i32
    %c0_i32_0 = arith.constant 0 : i32
    %c0_i32_1 = arith.constant 0 : i32
    return %arg0, %c0_i32, %c0_i32_0 : i32, i32, i32
  }
  func.func @transform_3(%arg0: i32) -> (i32, i32, i32) {
    %c0_i32 = arith.constant 0 : i32
    %c0_i32_0 = arith.constant 0 : i32
    %c0_i32_1 = arith.constant 0 : i32
    return %arg0, %c0_i32, %c0_i32_0 : i32, i32, i32
  }
  func.func @transform_4(%arg0: i32) -> (i32, i32, i32) {
    %c0_i32 = arith.constant 0 : i32
    %c0_i32_0 = arith.constant 0 : i32
    %c0_i32_1 = arith.constant 0 : i32
    return %arg0, %c0_i32, %c0_i32_0 : i32, i32, i32
  }
  func.func @transform_5(%arg0: i32) -> (i32, i32, i32) {
    %c0_i32 = arith.constant 0 : i32
    %c0_i32_0 = arith.constant 0 : i32
    %c0_i32_1 = arith.constant 0 : i32
    return %arg0, %c0_i32, %c0_i32_0 : i32, i32, i32
  }
  func.func @transform_6(%arg0: i32) -> (i32, i32, i32) {
    %c0_i32 = arith.constant 0 : i32
    %c0_i32_0 = arith.constant 0 : i32
    %c0_i32_1 = arith.constant 0 : i32
    return %arg0, %c0_i32, %c0_i32_0 : i32, i32, i32
  }
  func.func @transform_7(%arg0: i32) -> (i32, i32, i32, i32) {
    %c0_i32 = arith.constant 0 : i32
    %c0_i32_0 = arith.constant 0 : i32
    %c0_i32_1 = arith.constant 0 : i32
    %c0_i32_2 = arith.constant 0 : i32
    return %arg0, %c0_i32, %c0_i32_0, %c0_i32_1 : i32, i32, i32, i32
  }
  func.func @transform_8(%arg0: i32) -> (i32, i32, i32) {
    %c0_i32 = arith.constant 0 : i32
    %c0_i32_0 = arith.constant 0 : i32
    %c0_i32_1 = arith.constant 0 : i32
    return %arg0, %c0_i32, %c0_i32_0 : i32, i32, i32
  }
}

module attributes {stable_mosaic.version = 11 : i64} {
  func.func @_gru_layer_kernel(%arg0: i32, %arg1: memref<8x1xi32, #tpu.memory_space<vmem>>, %arg2: memref<8x8x64xbf16, #tpu.memory_space<vmem>>, %arg3: memref<1x64x96xbf16, #tpu.memory_space<vmem>>, %arg4: memref<1x1x96xf32, #tpu.memory_space<vmem>>, %arg5: memref<1x32x96xbf16, #tpu.memory_space<vmem>>, %arg6: memref<1x1x96xf32, #tpu.memory_space<vmem>>, %arg7: memref<1x8x32xf32, #tpu.memory_space<vmem>>, %arg8: memref<1x8x8x32xbf16, #tpu.memory_space<vmem>>, %arg9: memref<1x8x32xf32, #tpu.memory_space<vmem>>, %arg10: memref<8x8x96xf32, #tpu.memory_space<vmem>>) attributes {dimension_semantics = [#tpu.dimension_semantics<parallel>], iteration_bounds = array<i64: 2>, scalar_prefetch = 0 : i64, scratch_operands = 1 : i64, tpu.core_type = #tpu.core_type<tc>, window_params = [{pipeline_mode = #tpu.pipeline_mode<synchronous>, transform_indices = @transform_0, window_bounds = array<i64: 8, 1>}, {pipeline_mode = #tpu.pipeline_mode<synchronous>, transform_indices = @transform_1, window_bounds = array<i64: 8, 8, 64>}, {transform_indices = @transform_2, window_bounds = array<i64: 1, 64, 96>}, {transform_indices = @transform_3, window_bounds = array<i64: 1, 1, 96>}, {transform_indices = @transform_4, window_bounds = array<i64: 1, 32, 96>}, {transform_indices = @transform_5, window_bounds = array<i64: 1, 1, 96>}, {transform_indices = @transform_6, window_bounds = array<i64: 1, 8, 32>}, {transform_indices = @transform_7, window_bounds = array<i64: 1, 8, 8, 32>}, {transform_indices = @transform_8, window_bounds = array<i64: 1, 8, 32>}]} {
    %c0 = arith.constant 0 : index
    %c0_0 = arith.constant 0 : index
    %c0_1 = arith.constant 0 : index
    %0 = vector.load %arg2[%c0, %c0_0, %c0_1] : memref<8x8x64xbf16, #tpu.memory_space<vmem>>, vector<8x8x64xbf16>
    %1 = vector.shape_cast %0 : vector<8x8x64xbf16> to vector<64x64xbf16>
    %c0_2 = arith.constant 0 : index
    %c0_3 = arith.constant 0 : index
    %c0_4 = arith.constant 0 : index
    %2 = vector.load %arg3[%c0_2, %c0_3, %c0_4] : memref<1x64x96xbf16, #tpu.memory_space<vmem>>, vector<1x64x96xbf16>
    %3 = vector.shape_cast %2 : vector<1x64x96xbf16> to vector<64x96xbf16>
    %cst = arith.constant dense<0.000000e+00> : vector<64x96xf32>
    %4 = tpu.matmul %1, %3, %cst {dimension_numbers = #tpu.dot_dimension_numbers<[1], [0], [0], [1], [0, 0, 1, 1], [], []>} : vector<64x64xbf16>, vector<64x96xbf16>, vector<64x96xf32> -> vector<64x96xf32>
    %c0_5 = arith.constant 0 : index
    %c0_6 = arith.constant 0 : index
    %c0_7 = arith.constant 0 : index
    %5 = vector.load %arg4[%c0_5, %c0_6, %c0_7] : memref<1x1x96xf32, #tpu.memory_space<vmem>>, vector<1x1x96xf32>
    %6 = vector.shape_cast %5 : vector<1x1x96xf32> to vector<1x96xf32>
    %7 = vector.broadcast %6 : vector<1x96xf32> to vector<64x96xf32>
    %8 = arith.addf %4, %7 : vector<64x96xf32>
    %9 = vector.shape_cast %8 : vector<64x96xf32> to vector<8x8x96xf32>
    %c0_8 = arith.constant 0 : index
    %c0_9 = arith.constant 0 : index
    %c0_10 = arith.constant 0 : index
    %10 = vector.load %arg10[%c0_8, %c0_9, %c0_10] : memref<8x8x96xf32, #tpu.memory_space<vmem>>, vector<8x8x96xf32>
    tpu.vector_store %arg10[%c0_8, %c0_9, %c0_10], %9 {strides = array<i32>} : memref<8x8x96xf32, #tpu.memory_space<vmem>>, vector<8x8x96xf32>,
    %c0_11 = arith.constant 0 : index
    %c0_12 = arith.constant 0 : index
    %c0_13 = arith.constant 0 : index
    %11 = vector.load %arg5[%c0_11, %c0_12, %c0_13] : memref<1x32x96xbf16, #tpu.memory_space<vmem>>, vector<1x32x96xbf16>
    %12 = vector.shape_cast %11 : vector<1x32x96xbf16> to vector<32x96xbf16>
    %c0_14 = arith.constant 0 : index
    %c0_15 = arith.constant 0 : index
    %c0_16 = arith.constant 0 : index
    %13 = vector.load %arg6[%c0_14, %c0_15, %c0_16] : memref<1x1x96xf32, #tpu.memory_space<vmem>>, vector<1x1x96xf32>
    %14 = vector.shape_cast %13 : vector<1x1x96xf32> to vector<1x96xf32>
    %15 = vector.shape_cast %14 : vector<1x96xf32> to vector<1x96xf32>
    %16 = vector.broadcast %15 : vector<1x96xf32> to vector<8x96xf32>
    %c0_17 = arith.constant 0 : index
    %c0_18 = arith.constant 0 : index
    %17 = vector.load %arg1[%c0_17, %c0_18] : memref<8x1xi32, #tpu.memory_space<vmem>>, vector<8x1xi32>
    %c0_19 = arith.constant 0 : index
    %c0_20 = arith.constant 0 : index
    %c0_21 = arith.constant 0 : index
    %18 = vector.load %arg7[%c0_19, %c0_20, %c0_21] : memref<1x8x32xf32, #tpu.memory_space<vmem>>, vector<1x8x32xf32>
    %19 = vector.shape_cast %18 : vector<1x8x32xf32> to vector<8x32xf32>
    %c0_i32 = arith.constant 0 : i32
    %c1_i32 = arith.constant 1 : i32
    %20 = arith.cmpi eq, %arg0, %c1_i32 : i32
    %c7_i32 = arith.constant 7 : i32
    %21 = arith.subi %c7_i32, %c0_i32 : i32
    %22 = arith.select %20, %21, %c0_i32 : i32
    %23 = arith.truncf %19 : vector<8x32xf32> to vector<8x32xbf16>
    %cst_22 = arith.constant dense<0.000000e+00> : vector<8x96xf32>
    %24 = tpu.matmul %23, %12, %cst_22 {dimension_numbers = #tpu.dot_dimension_numbers<[1], [0], [0], [1], [0, 0, 1, 1], [], []>} : vector<8x32xbf16>, vector<32x96xbf16>, vector<8x96xf32> -> vector<8x96xf32>
    %25 = arith.addf %24, %16 : vector<8x96xf32>
    %26 = arith.index_cast %22 : i32 to index
    %c0_23 = arith.constant 0 : index
    %c0_24 = arith.constant 0 : index
    %27 = vector.load %arg10[%26, %c0_23, %c0_24] : memref<8x8x96xf32, #tpu.memory_space<vmem>>, vector<1x8x96xf32>
    %28 = vector.shape_cast %27 : vector<1x8x96xf32> to vector<8x96xf32>
    %29 = arith.addf %28, %25 : vector<8x96xf32>
    %30 = vector.extract_strided_slice %29 {offsets = [0, 0], sizes = [8, 32], strides = [1, 1]} : vector<8x96xf32> to vector<8x32xf32>
    %31 = arith.negf %30 : vector<8x32xf32>
    %32 = math.exp %31 : vector<8x32xf32>
    %cst_25 = arith.constant 1.000000e+00 : f32
    %33 = vector.broadcast %cst_25 : f32 to vector<8x32xf32>
    %34 = arith.addf %33, %32 : vector<8x32xf32>
    %35 = arith.divf %33, %34 : vector<8x32xf32>
    %36 = vector.extract_strided_slice %29 {offsets = [0, 32], sizes = [8, 32], strides = [1, 1]} : vector<8x96xf32> to vector<8x32xf32>
    %37 = arith.negf %36 : vector<8x32xf32>
    %38 = math.exp %37 : vector<8x32xf32>
    %cst_26 = arith.constant 1.000000e+00 : f32
    %39 = vector.broadcast %cst_26 : f32 to vector<8x32xf32>
    %40 = arith.addf %39, %38 : vector<8x32xf32>
    %41 = arith.divf %39, %40 : vector<8x32xf32>
    %42 = vector.extract_strided_slice %28 {offsets = [0, 64], sizes = [8, 32], strides = [1, 1]} : vector<8x96xf32> to vector<8x32xf32>
    %43 = vector.extract_strided_slice %25 {offsets = [0, 64], sizes = [8, 32], strides = [1, 1]} : vector<8x96xf32> to vector<8x32xf32>
    %44 = arith.mulf %35, %43 : vector<8x32xf32>
    %45 = arith.addf %42, %44 : vector<8x32xf32>
    %46 = math.tanh %45 : vector<8x32xf32>
    %47 = arith.subf %19, %46 : vector<8x32xf32>
    %48 = arith.mulf %41, %47 : vector<8x32xf32>
    %49 = arith.addf %46, %48 : vector<8x32xf32>
    %50 = vector.broadcast %22 : i32 to vector<8x1xi32>
    %51 = arith.cmpi sgt, %17, %50 : vector<8x1xi32>
    %52 = vector.shape_cast %51 : vector<8x1xi1> to vector<8x1xi1>
    %53 = vector.broadcast %52 : vector<8x1xi1> to vector<8x32xi1>
    %54 = arith.select %53, %49, %19 : vector<8x32xi1>, vector<8x32xf32>
    %55 = arith.truncf %54 : vector<8x32xf32> to vector<8x32xbf16>
    %c0_27 = arith.constant 0 : index
    %56 = arith.index_cast %22 : i32 to index
    %c0_28 = arith.constant 0 : index
    %c0_29 = arith.constant 0 : index
    %57 = vector.load %arg8[%c0_27, %56, %c0_28, %c0_29] : memref<1x8x8x32xbf16, #tpu.memory_space<vmem>>, vector<1x1x8x32xbf16>
    %58 = vector.shape_cast %57 : vector<1x1x8x32xbf16> to vector<8x32xbf16>
    %59 = vector.shape_cast %55 : vector<8x32xbf16> to vector<1x1x8x32xbf16>
    tpu.vector_store %arg8[%c0_27, %56, %c0_28, %c0_29], %59 {strides = array<i32>} : memref<1x8x8x32xbf16, #tpu.memory_space<vmem>>, vector<1x1x8x32xbf16>,
    %c1_i32_30 = arith.constant 1 : i32
    %c1_i32_31 = arith.constant 1 : i32
    %60 = arith.cmpi eq, %arg0, %c1_i32_31 : i32
    %c7_i32_32 = arith.constant 7 : i32
    %61 = arith.subi %c7_i32_32, %c1_i32_30 : i32
    %62 = arith.select %60, %61, %c1_i32_30 : i32
    %63 = arith.truncf %54 : vector<8x32xf32> to vector<8x32xbf16>
    %cst_33 = arith.constant dense<0.000000e+00> : vector<8x96xf32>
    %64 = tpu.matmul %63, %12, %cst_33 {dimension_numbers = #tpu.dot_dimension_numbers<[1], [0], [0], [1], [0, 0, 1, 1], [], []>} : vector<8x32xbf16>, vector<32x96xbf16>, vector<8x96xf32> -> vector<8x96xf32>
    %65 = arith.addf %64, %16 : vector<8x96xf32>
    %66 = arith.index_cast %62 : i32 to index
    %c0_34 = arith.constant 0 : index
    %c0_35 = arith.constant 0 : index
    %67 = vector.load %arg10[%66, %c0_34, %c0_35] : memref<8x8x96xf32, #tpu.memory_space<vmem>>, vector<1x8x96xf32>
    %68 = vector.shape_cast %67 : vector<1x8x96xf32> to vector<8x96xf32>
    %69 = arith.addf %68, %65 : vector<8x96xf32>
    %70 = vector.extract_strided_slice %69 {offsets = [0, 0], sizes = [8, 32], strides = [1, 1]} : vector<8x96xf32> to vector<8x32xf32>
    %71 = arith.negf %70 : vector<8x32xf32>
    %72 = math.exp %71 : vector<8x32xf32>
    %cst_36 = arith.constant 1.000000e+00 : f32
    %73 = vector.broadcast %cst_36 : f32 to vector<8x32xf32>
    %74 = arith.addf %73, %72 : vector<8x32xf32>
    %75 = arith.divf %73, %74 : vector<8x32xf32>
    %76 = vector.extract_strided_slice %69 {offsets = [0, 32], sizes = [8, 32], strides = [1, 1]} : vector<8x96xf32> to vector<8x32xf32>
    %77 = arith.negf %76 : vector<8x32xf32>
    %78 = math.exp %77 : vector<8x32xf32>
    %cst_37 = arith.constant 1.000000e+00 : f32
    %79 = vector.broadcast %cst_37 : f32 to vector<8x32xf32>
    %80 = arith.addf %79, %78 : vector<8x32xf32>
    %81 = arith.divf %79, %80 : vector<8x32xf32>
    %82 = vector.extract_strided_slice %68 {offsets = [0, 64], sizes = [8, 32], strides = [1, 1]} : vector<8x96xf32> to vector<8x32xf32>
    %83 = vector.extract_strided_slice %65 {offsets = [0, 64], sizes = [8, 32], strides = [1, 1]} : vector<8x96xf32> to vector<8x32xf32>
    %84 = arith.mulf %75, %83 : vector<8x32xf32>
    %85 = arith.addf %82, %84 : vector<8x32xf32>
    %86 = math.tanh %85 : vector<8x32xf32>
    %87 = arith.subf %54, %86 : vector<8x32xf32>
    %88 = arith.mulf %81, %87 : vector<8x32xf32>
    %89 = arith.addf %86, %88 : vector<8x32xf32>
    %90 = vector.broadcast %62 : i32 to vector<8x1xi32>
    %91 = arith.cmpi sgt, %17, %90 : vector<8x1xi32>
    %92 = vector.shape_cast %91 : vector<8x1xi1> to vector<8x1xi1>
    %93 = vector.broadcast %92 : vector<8x1xi1> to vector<8x32xi1>
    %94 = arith.select %93, %89, %54 : vector<8x32xi1>, vector<8x32xf32>
    %95 = arith.truncf %94 : vector<8x32xf32> to vector<8x32xbf16>
    %c0_38 = arith.constant 0 : index
    %96 = arith.index_cast %62 : i32 to index
    %c0_39 = arith.constant 0 : index
    %c0_40 = arith.constant 0 : index
    %97 = vector.load %arg8[%c0_38, %96, %c0_39, %c0_40] : memref<1x8x8x32xbf16, #tpu.memory_space<vmem>>, vector<1x1x8x32xbf16>
    %98 = vector.shape_cast %97 : vector<1x1x8x32xbf16> to vector<8x32xbf16>
    %99 = vector.shape_cast %95 : vector<8x32xbf16> to vector<1x1x8x32xbf16>
    tpu.vector_store %arg8[%c0_38, %96, %c0_39, %c0_40], %99 {strides = array<i32>} : memref<1x8x8x32xbf16, #tpu.memory_space<vmem>>, vector<1x1x8x32xbf16>,
    %c2_i32 = arith.constant 2 : i32
    %c1_i32_41 = arith.constant 1 : i32
    %100 = arith.cmpi eq, %arg0, %c1_i32_41 : i32
    %c7_i32_42 = arith.constant 7 : i32
    %101 = arith.subi %c7_i32_42, %c2_i32 : i32
    %102 = arith.select %100, %101, %c2_i32 : i32
    %103 = arith.truncf %94 : vector<8x32xf32> to vector<8x32xbf16>
    %cst_43 = arith.constant dense<0.000000e+00> : vector<8x96xf32>
    %104 = tpu.matmul %103, %12, %cst_43 {dimension_numbers = #tpu.dot_dimension_numbers<[1], [0], [0], [1], [0, 0, 1, 1], [], []>} : vector<8x32xbf16>, vector<32x96xbf16>, vector<8x96xf32> -> vector<8x96xf32>
    %105 = arith.addf %104, %16 : vector<8x96xf32>
    %106 = arith.index_cast %102 : i32 to index
    %c0_44 = arith.constant 0 : index
    %c0_45 = arith.constant 0 : index
    %107 = vector.load %arg10[%106, %c0_44, %c0_45] : memref<8x8x96xf32, #tpu.memory_space<vmem>>, vector<1x8x96xf32>
    %108 = vector.shape_cast %107 : vector<1x8x96xf32> to vector<8x96xf32>
    %109 = arith.addf %108, %105 : vector<8x96xf32>
    %110 = vector.extract_strided_slice %109 {offsets = [0, 0], sizes = [8, 32], strides = [1, 1]} : vector<8x96xf32> to vector<8x32xf32>
    %111 = arith.negf %110 : vector<8x32xf32>
    %112 = math.exp %111 : vector<8x32xf32>
    %cst_46 = arith.constant 1.000000e+00 : f32
    %113 = vector.broadcast %cst_46 : f32 to vector<8x32xf32>
    %114 = arith.addf %113, %112 : vector<8x32xf32>
    %115 = arith.divf %113, %114 : vector<8x32xf32>
    %116 = vector.extract_strided_slice %109 {offsets = [0, 32], sizes = [8, 32], strides = [1, 1]} : vector<8x96xf32> to vector<8x32xf32>
    %117 = arith.negf %116 : vector<8x32xf32>
    %118 = math.exp %117 : vector<8x32xf32>
    %cst_47 = arith.constant 1.000000e+00 : f32
    %119 = vector.broadcast %cst_47 : f32 to vector<8x32xf32>
    %120 = arith.addf %119, %118 : vector<8x32xf32>
    %121 = arith.divf %119, %120 : vector<8x32xf32>
    %122 = vector.extract_strided_slice %108 {offsets = [0, 64], sizes = [8, 32], strides = [1, 1]} : vector<8x96xf32> to vector<8x32xf32>
    %123 = vector.extract_strided_slice %105 {offsets = [0, 64], sizes = [8, 32], strides = [1, 1]} : vector<8x96xf32> to vector<8x32xf32>
    %124 = arith.mulf %115, %123 : vector<8x32xf32>
    %125 = arith.addf %122, %124 : vector<8x32xf32>
    %126 = math.tanh %125 : vector<8x32xf32>
    %127 = arith.subf %94, %126 : vector<8x32xf32>
    %128 = arith.mulf %121, %127 : vector<8x32xf32>
    %129 = arith.addf %126, %128 : vector<8x32xf32>
    %130 = vector.broadcast %102 : i32 to vector<8x1xi32>
    %131 = arith.cmpi sgt, %17, %130 : vector<8x1xi32>
    %132 = vector.shape_cast %131 : vector<8x1xi1> to vector<8x1xi1>
    %133 = vector.broadcast %132 : vector<8x1xi1> to vector<8x32xi1>
    %134 = arith.select %133, %129, %94 : vector<8x32xi1>, vector<8x32xf32>
    %135 = arith.truncf %134 : vector<8x32xf32> to vector<8x32xbf16>
    %c0_48 = arith.constant 0 : index
    %136 = arith.index_cast %102 : i32 to index
    %c0_49 = arith.constant 0 : index
    %c0_50 = arith.constant 0 : index
    %137 = vector.load %arg8[%c0_48, %136, %c0_49, %c0_50] : memref<1x8x8x32xbf16, #tpu.memory_space<vmem>>, vector<1x1x8x32xbf16>
    %138 = vector.shape_cast %137 : vector<1x1x8x32xbf16> to vector<8x32xbf16>
    %139 = vector.shape_cast %135 : vector<8x32xbf16> to vector<1x1x8x32xbf16>
    tpu.vector_store %arg8[%c0_48, %136, %c0_49, %c0_50], %139 {strides = array<i32>} : memref<1x8x8x32xbf16, #tpu.memory_space<vmem>>, vector<1x1x8x32xbf16>,
    %c3_i32 = arith.constant 3 : i32
    %c1_i32_51 = arith.constant 1 : i32
    %140 = arith.cmpi eq, %arg0, %c1_i32_51 : i32
    %c7_i32_52 = arith.constant 7 : i32
    %141 = arith.subi %c7_i32_52, %c3_i32 : i32
    %142 = arith.select %140, %141, %c3_i32 : i32
    %143 = arith.truncf %134 : vector<8x32xf32> to vector<8x32xbf16>
    %cst_53 = arith.constant dense<0.000000e+00> : vector<8x96xf32>
    %144 = tpu.matmul %143, %12, %cst_53 {dimension_numbers = #tpu.dot_dimension_numbers<[1], [0], [0], [1], [0, 0, 1, 1], [], []>} : vector<8x32xbf16>, vector<32x96xbf16>, vector<8x96xf32> -> vector<8x96xf32>
    %145 = arith.addf %144, %16 : vector<8x96xf32>
    %146 = arith.index_cast %142 : i32 to index
    %c0_54 = arith.constant 0 : index
    %c0_55 = arith.constant 0 : index
    %147 = vector.load %arg10[%146, %c0_54, %c0_55] : memref<8x8x96xf32, #tpu.memory_space<vmem>>, vector<1x8x96xf32>
    %148 = vector.shape_cast %147 : vector<1x8x96xf32> to vector<8x96xf32>
    %149 = arith.addf %148, %145 : vector<8x96xf32>
    %150 = vector.extract_strided_slice %149 {offsets = [0, 0], sizes = [8, 32], strides = [1, 1]} : vector<8x96xf32> to vector<8x32xf32>
    %151 = arith.negf %150 : vector<8x32xf32>
    %152 = math.exp %151 : vector<8x32xf32>
    %cst_56 = arith.constant 1.000000e+00 : f32
    %153 = vector.broadcast %cst_56 : f32 to vector<8x32xf32>
    %154 = arith.addf %153, %152 : vector<8x32xf32>
    %155 = arith.divf %153, %154 : vector<8x32xf32>
    %156 = vector.extract_strided_slice %149 {offsets = [0, 32], sizes = [8, 32], strides = [1, 1]} : vector<8x96xf32> to vector<8x32xf32>
    %157 = arith.negf %156 : vector<8x32xf32>
    %158 = math.exp %157 : vector<8x32xf32>
    %cst_57 = arith.constant 1.000000e+00 : f32
    %159 = vector.broadcast %cst_57 : f32 to vector<8x32xf32>
    %160 = arith.addf %159, %158 : vector<8x32xf32>
    %161 = arith.divf %159, %160 : vector<8x32xf32>
    %162 = vector.extract_strided_slice %148 {offsets = [0, 64], sizes = [8, 32], strides = [1, 1]} : vector<8x96xf32> to vector<8x32xf32>
    %163 = vector.extract_strided_slice %145 {offsets = [0, 64], sizes = [8, 32], strides = [1, 1]} : vector<8x96xf32> to vector<8x32xf32>
    %164 = arith.mulf %155, %163 : vector<8x32xf32>
    %165 = arith.addf %162, %164 : vector<8x32xf32>
    %166 = math.tanh %165 : vector<8x32xf32>
    %167 = arith.subf %134, %166 : vector<8x32xf32>
    %168 = arith.mulf %161, %167 : vector<8x32xf32>
    %169 = arith.addf %166, %168 : vector<8x32xf32>
    %170 = vector.broadcast %142 : i32 to vector<8x1xi32>
    %171 = arith.cmpi sgt, %17, %170 : vector<8x1xi32>
    %172 = vector.shape_cast %171 : vector<8x1xi1> to vector<8x1xi1>
    %173 = vector.broadcast %172 : vector<8x1xi1> to vector<8x32xi1>
    %174 = arith.select %173, %169, %134 : vector<8x32xi1>, vector<8x32xf32>
    %175 = arith.truncf %174 : vector<8x32xf32> to vector<8x32xbf16>
    %c0_58 = arith.constant 0 : index
    %176 = arith.index_cast %142 : i32 to index
    %c0_59 = arith.constant 0 : index
    %c0_60 = arith.constant 0 : index
    %177 = vector.load %arg8[%c0_58, %176, %c0_59, %c0_60] : memref<1x8x8x32xbf16, #tpu.memory_space<vmem>>, vector<1x1x8x32xbf16>
    %178 = vector.shape_cast %177 : vector<1x1x8x32xbf16> to vector<8x32xbf16>
    %179 = vector.shape_cast %175 : vector<8x32xbf16> to vector<1x1x8x32xbf16>
    tpu.vector_store %arg8[%c0_58, %176, %c0_59, %c0_60], %179 {strides = array<i32>} : memref<1x8x8x32xbf16, #tpu.memory_space<vmem>>, vector<1x1x8x32xbf16>,
    %c4_i32 = arith.constant 4 : i32
    %c1_i32_61 = arith.constant 1 : i32
    %180 = arith.cmpi eq, %arg0, %c1_i32_61 : i32
    %c7_i32_62 = arith.constant 7 : i32
    %181 = arith.subi %c7_i32_62, %c4_i32 : i32
    %182 = arith.select %180, %181, %c4_i32 : i32
    %183 = arith.truncf %174 : vector<8x32xf32> to vector<8x32xbf16>
    %cst_63 = arith.constant dense<0.000000e+00> : vector<8x96xf32>
    %184 = tpu.matmul %183, %12, %cst_63 {dimension_numbers = #tpu.dot_dimension_numbers<[1], [0], [0], [1], [0, 0, 1, 1], [], []>} : vector<8x32xbf16>, vector<32x96xbf16>, vector<8x96xf32> -> vector<8x96xf32>
    %185 = arith.addf %184, %16 : vector<8x96xf32>
    %186 = arith.index_cast %182 : i32 to index
    %c0_64 = arith.constant 0 : index
    %c0_65 = arith.constant 0 : index
    %187 = vector.load %arg10[%186, %c0_64, %c0_65] : memref<8x8x96xf32, #tpu.memory_space<vmem>>, vector<1x8x96xf32>
    %188 = vector.shape_cast %187 : vector<1x8x96xf32> to vector<8x96xf32>
    %189 = arith.addf %188, %185 : vector<8x96xf32>
    %190 = vector.extract_strided_slice %189 {offsets = [0, 0], sizes = [8, 32], strides = [1, 1]} : vector<8x96xf32> to vector<8x32xf32>
    %191 = arith.negf %190 : vector<8x32xf32>
    %192 = math.exp %191 : vector<8x32xf32>
    %cst_66 = arith.constant 1.000000e+00 : f32
    %193 = vector.broadcast %cst_66 : f32 to vector<8x32xf32>
    %194 = arith.addf %193, %192 : vector<8x32xf32>
    %195 = arith.divf %193, %194 : vector<8x32xf32>
    %196 = vector.extract_strided_slice %189 {offsets = [0, 32], sizes = [8, 32], strides = [1, 1]} : vector<8x96xf32> to vector<8x32xf32>
    %197 = arith.negf %196 : vector<8x32xf32>
    %198 = math.exp %197 : vector<8x32xf32>
    %cst_67 = arith.constant 1.000000e+00 : f32
    %199 = vector.broadcast %cst_67 : f32 to vector<8x32xf32>
    %200 = arith.addf %199, %198 : vector<8x32xf32>
    %201 = arith.divf %199, %200 : vector<8x32xf32>
    %202 = vector.extract_strided_slice %188 {offsets = [0, 64], sizes = [8, 32], strides = [1, 1]} : vector<8x96xf32> to vector<8x32xf32>
    %203 = vector.extract_strided_slice %185 {offsets = [0, 64], sizes = [8, 32], strides = [1, 1]} : vector<8x96xf32> to vector<8x32xf32>
    %204 = arith.mulf %195, %203 : vector<8x32xf32>
    %205 = arith.addf %202, %204 : vector<8x32xf32>
    %206 = math.tanh %205 : vector<8x32xf32>
    %207 = arith.subf %174, %206 : vector<8x32xf32>
    %208 = arith.mulf %201, %207 : vector<8x32xf32>
    %209 = arith.addf %206, %208 : vector<8x32xf32>
    %210 = vector.broadcast %182 : i32 to vector<8x1xi32>
    %211 = arith.cmpi sgt, %17, %210 : vector<8x1xi32>
    %212 = vector.shape_cast %211 : vector<8x1xi1> to vector<8x1xi1>
    %213 = vector.broadcast %212 : vector<8x1xi1> to vector<8x32xi1>
    %214 = arith.select %213, %209, %174 : vector<8x32xi1>, vector<8x32xf32>
    %215 = arith.truncf %214 : vector<8x32xf32> to vector<8x32xbf16>
    %c0_68 = arith.constant 0 : index
    %216 = arith.index_cast %182 : i32 to index
    %c0_69 = arith.constant 0 : index
    %c0_70 = arith.constant 0 : index
    %217 = vector.load %arg8[%c0_68, %216, %c0_69, %c0_70] : memref<1x8x8x32xbf16, #tpu.memory_space<vmem>>, vector<1x1x8x32xbf16>
    %218 = vector.shape_cast %217 : vector<1x1x8x32xbf16> to vector<8x32xbf16>
    %219 = vector.shape_cast %215 : vector<8x32xbf16> to vector<1x1x8x32xbf16>
    tpu.vector_store %arg8[%c0_68, %216, %c0_69, %c0_70], %219 {strides = array<i32>} : memref<1x8x8x32xbf16, #tpu.memory_space<vmem>>, vector<1x1x8x32xbf16>,
    %c5_i32 = arith.constant 5 : i32
    %c1_i32_71 = arith.constant 1 : i32
    %220 = arith.cmpi eq, %arg0, %c1_i32_71 : i32
    %c7_i32_72 = arith.constant 7 : i32
    %221 = arith.subi %c7_i32_72, %c5_i32 : i32
    %222 = arith.select %220, %221, %c5_i32 : i32
    %223 = arith.truncf %214 : vector<8x32xf32> to vector<8x32xbf16>
    %cst_73 = arith.constant dense<0.000000e+00> : vector<8x96xf32>
    %224 = tpu.matmul %223, %12, %cst_73 {dimension_numbers = #tpu.dot_dimension_numbers<[1], [0], [0], [1], [0, 0, 1, 1], [], []>} : vector<8x32xbf16>, vector<32x96xbf16>, vector<8x96xf32> -> vector<8x96xf32>
    %225 = arith.addf %224, %16 : vector<8x96xf32>
    %226 = arith.index_cast %222 : i32 to index
    %c0_74 = arith.constant 0 : index
    %c0_75 = arith.constant 0 : index
    %227 = vector.load %arg10[%226, %c0_74, %c0_75] : memref<8x8x96xf32, #tpu.memory_space<vmem>>, vector<1x8x96xf32>
    %228 = vector.shape_cast %227 : vector<1x8x96xf32> to vector<8x96xf32>
    %229 = arith.addf %228, %225 : vector<8x96xf32>
    %230 = vector.extract_strided_slice %229 {offsets = [0, 0], sizes = [8, 32], strides = [1, 1]} : vector<8x96xf32> to vector<8x32xf32>
    %231 = arith.negf %230 : vector<8x32xf32>
    %232 = math.exp %231 : vector<8x32xf32>
    %cst_76 = arith.constant 1.000000e+00 : f32
    %233 = vector.broadcast %cst_76 : f32 to vector<8x32xf32>
    %234 = arith.addf %233, %232 : vector<8x32xf32>
    %235 = arith.divf %233, %234 : vector<8x32xf32>
    %236 = vector.extract_strided_slice %229 {offsets = [0, 32], sizes = [8, 32], strides = [1, 1]} : vector<8x96xf32> to vector<8x32xf32>
    %237 = arith.negf %236 : vector<8x32xf32>
    %238 = math.exp %237 : vector<8x32xf32>
    %cst_77 = arith.constant 1.000000e+00 : f32
    %239 = vector.broadcast %cst_77 : f32 to vector<8x32xf32>
    %240 = arith.addf %239, %238 : vector<8x32xf32>
    %241 = arith.divf %239, %240 : vector<8x32xf32>
    %242 = vector.extract_strided_slice %228 {offsets = [0, 64], sizes = [8, 32], strides = [1, 1]} : vector<8x96xf32> to vector<8x32xf32>
    %243 = vector.extract_strided_slice %225 {offsets = [0, 64], sizes = [8, 32], strides = [1, 1]} : vector<8x96xf32> to vector<8x32xf32>
    %244 = arith.mulf %235, %243 : vector<8x32xf32>
    %245 = arith.addf %242, %244 : vector<8x32xf32>
    %246 = math.tanh %245 : vector<8x32xf32>
    %247 = arith.subf %214, %246 : vector<8x32xf32>
    %248 = arith.mulf %241, %247 : vector<8x32xf32>
    %249 = arith.addf %246, %248 : vector<8x32xf32>
    %250 = vector.broadcast %222 : i32 to vector<8x1xi32>
    %251 = arith.cmpi sgt, %17, %250 : vector<8x1xi32>
    %252 = vector.shape_cast %251 : vector<8x1xi1> to vector<8x1xi1>
    %253 = vector.broadcast %252 : vector<8x1xi1> to vector<8x32xi1>
    %254 = arith.select %253, %249, %214 : vector<8x32xi1>, vector<8x32xf32>
    %255 = arith.truncf %254 : vector<8x32xf32> to vector<8x32xbf16>
    %c0_78 = arith.constant 0 : index
    %256 = arith.index_cast %222 : i32 to index
    %c0_79 = arith.constant 0 : index
    %c0_80 = arith.constant 0 : index
    %257 = vector.load %arg8[%c0_78, %256, %c0_79, %c0_80] : memref<1x8x8x32xbf16, #tpu.memory_space<vmem>>, vector<1x1x8x32xbf16>
    %258 = vector.shape_cast %257 : vector<1x1x8x32xbf16> to vector<8x32xbf16>
    %259 = vector.shape_cast %255 : vector<8x32xbf16> to vector<1x1x8x32xbf16>
    tpu.vector_store %arg8[%c0_78, %256, %c0_79, %c0_80], %259 {strides = array<i32>} : memref<1x8x8x32xbf16, #tpu.memory_space<vmem>>, vector<1x1x8x32xbf16>,
    %c6_i32 = arith.constant 6 : i32
    %c1_i32_81 = arith.constant 1 : i32
    %260 = arith.cmpi eq, %arg0, %c1_i32_81 : i32
    %c7_i32_82 = arith.constant 7 : i32
    %261 = arith.subi %c7_i32_82, %c6_i32 : i32
    %262 = arith.select %260, %261, %c6_i32 : i32
    %263 = arith.truncf %254 : vector<8x32xf32> to vector<8x32xbf16>
    %cst_83 = arith.constant dense<0.000000e+00> : vector<8x96xf32>
    %264 = tpu.matmul %263, %12, %cst_83 {dimension_numbers = #tpu.dot_dimension_numbers<[1], [0], [0], [1], [0, 0, 1, 1], [], []>} : vector<8x32xbf16>, vector<32x96xbf16>, vector<8x96xf32> -> vector<8x96xf32>
    %265 = arith.addf %264, %16 : vector<8x96xf32>
    %266 = arith.index_cast %262 : i32 to index
    %c0_84 = arith.constant 0 : index
    %c0_85 = arith.constant 0 : index
    %267 = vector.load %arg10[%266, %c0_84, %c0_85] : memref<8x8x96xf32, #tpu.memory_space<vmem>>, vector<1x8x96xf32>
    %268 = vector.shape_cast %267 : vector<1x8x96xf32> to vector<8x96xf32>
    %269 = arith.addf %268, %265 : vector<8x96xf32>
    %270 = vector.extract_strided_slice %269 {offsets = [0, 0], sizes = [8, 32], strides = [1, 1]} : vector<8x96xf32> to vector<8x32xf32>
    %271 = arith.negf %270 : vector<8x32xf32>
    %272 = math.exp %271 : vector<8x32xf32>
    %cst_86 = arith.constant 1.000000e+00 : f32
    %273 = vector.broadcast %cst_86 : f32 to vector<8x32xf32>
    %274 = arith.addf %273, %272 : vector<8x32xf32>
    %275 = arith.divf %273, %274 : vector<8x32xf32>
    %276 = vector.extract_strided_slice %269 {offsets = [0, 32], sizes = [8, 32], strides = [1, 1]} : vector<8x96xf32> to vector<8x32xf32>
    %277 = arith.negf %276 : vector<8x32xf32>
    %278 = math.exp %277 : vector<8x32xf32>
    %cst_87 = arith.constant 1.000000e+00 : f32
    %279 = vector.broadcast %cst_87 : f32 to vector<8x32xf32>
    %280 = arith.addf %279, %278 : vector<8x32xf32>
    %281 = arith.divf %279, %280 : vector<8x32xf32>
    %282 = vector.extract_strided_slice %268 {offsets = [0, 64], sizes = [8, 32], strides = [1, 1]} : vector<8x96xf32> to vector<8x32xf32>
    %283 = vector.extract_strided_slice %265 {offsets = [0, 64], sizes = [8, 32], strides = [1, 1]} : vector<8x96xf32> to vector<8x32xf32>
    %284 = arith.mulf %275, %283 : vector<8x32xf32>
    %285 = arith.addf %282, %284 : vector<8x32xf32>
    %286 = math.tanh %285 : vector<8x32xf32>
    %287 = arith.subf %254, %286 : vector<8x32xf32>
    %288 = arith.mulf %281, %287 : vector<8x32xf32>
    %289 = arith.addf %286, %288 : vector<8x32xf32>
    %290 = vector.broadcast %262 : i32 to vector<8x1xi32>
    %291 = arith.cmpi sgt, %17, %290 : vector<8x1xi32>
    %292 = vector.shape_cast %291 : vector<8x1xi1> to vector<8x1xi1>
    %293 = vector.broadcast %292 : vector<8x1xi1> to vector<8x32xi1>
    %294 = arith.select %293, %289, %254 : vector<8x32xi1>, vector<8x32xf32>
    %295 = arith.truncf %294 : vector<8x32xf32> to vector<8x32xbf16>
    %c0_88 = arith.constant 0 : index
    %296 = arith.index_cast %262 : i32 to index
    %c0_89 = arith.constant 0 : index
    %c0_90 = arith.constant 0 : index
    %297 = vector.load %arg8[%c0_88, %296, %c0_89, %c0_90] : memref<1x8x8x32xbf16, #tpu.memory_space<vmem>>, vector<1x1x8x32xbf16>
    %298 = vector.shape_cast %297 : vector<1x1x8x32xbf16> to vector<8x32xbf16>
    %299 = vector.shape_cast %295 : vector<8x32xbf16> to vector<1x1x8x32xbf16>
    tpu.vector_store %arg8[%c0_88, %296, %c0_89, %c0_90], %299 {strides = array<i32>} : memref<1x8x8x32xbf16, #tpu.memory_space<vmem>>, vector<1x1x8x32xbf16>,
    %c7_i32_91 = arith.constant 7 : i32
    %c1_i32_92 = arith.constant 1 : i32
    %300 = arith.cmpi eq, %arg0, %c1_i32_92 : i32
    %c7_i32_93 = arith.constant 7 : i32
    %301 = arith.subi %c7_i32_93, %c7_i32_91 : i32
    %302 = arith.select %300, %301, %c7_i32_91 : i32
    %303 = arith.truncf %294 : vector<8x32xf32> to vector<8x32xbf16>
    %cst_94 = arith.constant dense<0.000000e+00> : vector<8x96xf32>
    %304 = tpu.matmul %303, %12, %cst_94 {dimension_numbers = #tpu.dot_dimension_numbers<[1], [0], [0], [1], [0, 0, 1, 1], [], []>} : vector<8x32xbf16>, vector<32x96xbf16>, vector<8x96xf32> -> vector<8x96xf32>
    %305 = arith.addf %304, %16 : vector<8x96xf32>
    %306 = arith.index_cast %302 : i32 to index
    %c0_95 = arith.constant 0 : index
    %c0_96 = arith.constant 0 : index
    %307 = vector.load %arg10[%306, %c0_95, %c0_96] : memref<8x8x96xf32, #tpu.memory_space<vmem>>, vector<1x8x96xf32>
    %308 = vector.shape_cast %307 : vector<1x8x96xf32> to vector<8x96xf32>
    %309 = arith.addf %308, %305 : vector<8x96xf32>
    %310 = vector.extract_strided_slice %309 {offsets = [0, 0], sizes = [8, 32], strides = [1, 1]} : vector<8x96xf32> to vector<8x32xf32>
    %311 = arith.negf %310 : vector<8x32xf32>
    %312 = math.exp %311 : vector<8x32xf32>
    %cst_97 = arith.constant 1.000000e+00 : f32
    %313 = vector.broadcast %cst_97 : f32 to vector<8x32xf32>
    %314 = arith.addf %313, %312 : vector<8x32xf32>
    %315 = arith.divf %313, %314 : vector<8x32xf32>
    %316 = vector.extract_strided_slice %309 {offsets = [0, 32], sizes = [8, 32], strides = [1, 1]} : vector<8x96xf32> to vector<8x32xf32>
    %317 = arith.negf %316 : vector<8x32xf32>
    %318 = math.exp %317 : vector<8x32xf32>
    %cst_98 = arith.constant 1.000000e+00 : f32
    %319 = vector.broadcast %cst_98 : f32 to vector<8x32xf32>
    %320 = arith.addf %319, %318 : vector<8x32xf32>
    %321 = arith.divf %319, %320 : vector<8x32xf32>
    %322 = vector.extract_strided_slice %308 {offsets = [0, 64], sizes = [8, 32], strides = [1, 1]} : vector<8x96xf32> to vector<8x32xf32>
    %323 = vector.extract_strided_slice %305 {offsets = [0, 64], sizes = [8, 32], strides = [1, 1]} : vector<8x96xf32> to vector<8x32xf32>
    %324 = arith.mulf %315, %323 : vector<8x32xf32>
    %325 = arith.addf %322, %324 : vector<8x32xf32>
    %326 = math.tanh %325 : vector<8x32xf32>
    %327 = arith.subf %294, %326 : vector<8x32xf32>
    %328 = arith.mulf %321, %327 : vector<8x32xf32>
    %329 = arith.addf %326, %328 : vector<8x32xf32>
    %330 = vector.broadcast %302 : i32 to vector<8x1xi32>
    %331 = arith.cmpi sgt, %17, %330 : vector<8x1xi32>
    %332 = vector.shape_cast %331 : vector<8x1xi1> to vector<8x1xi1>
    %333 = vector.broadcast %332 : vector<8x1xi1> to vector<8x32xi1>
    %334 = arith.select %333, %329, %294 : vector<8x32xi1>, vector<8x32xf32>
    %335 = arith.truncf %334 : vector<8x32xf32> to vector<8x32xbf16>
    %c0_99 = arith.constant 0 : index
    %336 = arith.index_cast %302 : i32 to index
    %c0_100 = arith.constant 0 : index
    %c0_101 = arith.constant 0 : index
    %337 = vector.load %arg8[%c0_99, %336, %c0_100, %c0_101] : memref<1x8x8x32xbf16, #tpu.memory_space<vmem>>, vector<1x1x8x32xbf16>
    %338 = vector.shape_cast %337 : vector<1x1x8x32xbf16> to vector<8x32xbf16>
    %339 = vector.shape_cast %335 : vector<8x32xbf16> to vector<1x1x8x32xbf16>
    tpu.vector_store %arg8[%c0_99, %336, %c0_100, %c0_101], %339 {strides = array<i32>} : memref<1x8x8x32xbf16, #tpu.memory_space<vmem>>, vector<1x1x8x32xbf16>,
    %c8_i32 = arith.constant 8 : i32
    %c0_102 = arith.constant 0 : index
    %c0_103 = arith.constant 0 : index
    %c0_104 = arith.constant 0 : index
    %340 = vector.load %arg9[%c0_102, %c0_103, %c0_104] : memref<1x8x32xf32, #tpu.memory_space<vmem>>, vector<1x8x32xf32>
    %341 = vector.shape_cast %340 : vector<1x8x32xf32> to vector<8x32xf32>
    %342 = vector.shape_cast %334 : vector<8x32xf32> to vector<1x8x32xf32>
    tpu.vector_store %arg9[%c0_102, %c0_103, %c0_104], %342 {strides = array<i32>} : memref<1x8x32xf32, #tpu.memory_space<vmem>>, vector<1x8x32xf32>,
    return
  }
  func.func @transform_0(%arg0: i32) -> (i32, i32) {
    %c0_i32 = arith.constant 0 : i32
    %c0_i32_0 = arith.constant 0 : i32
    %c0_i32_1 = arith.constant 0 : i32
    return %c0_i32, %c0_i32_0 : i32, i32
  }
  func.func @transform_1(%arg0: i32) -> (i32, i32, i32) {
    %c0_i32 = arith.constant 0 : i32
    %c0_i32_0 = arith.constant 0 : i32
    %c0_i32_1 = arith.constant 0 : i32
    %c0_i32_2 = arith.constant 0 : i32
    return %c0_i32, %c0_i32_0, %c0_i32_1 : i32, i32, i32
  }
  func.func @transform_2(%arg0: i32) -> (i32, i32, i32) {
    %c0_i32 = arith.constant 0 : i32
    %c0_i32_0 = arith.constant 0 : i32
    %c0_i32_1 = arith.constant 0 : i32
    return %arg0, %c0_i32, %c0_i32_0 : i32, i32, i32
  }
  func.func @transform_3(%arg0: i32) -> (i32, i32, i32) {
    %c0_i32 = arith.constant 0 : i32
    %c0_i32_0 = arith.constant 0 : i32
    %c0_i32_1 = arith.constant 0 : i32
    return %arg0, %c0_i32, %c0_i32_0 : i32, i32, i32
  }
  func.func @transform_4(%arg0: i32) -> (i32, i32, i32) {
    %c0_i32 = arith.constant 0 : i32
    %c0_i32_0 = arith.constant 0 : i32
    %c0_i32_1 = arith.constant 0 : i32
    return %arg0, %c0_i32, %c0_i32_0 : i32, i32, i32
  }
  func.func @transform_5(%arg0: i32) -> (i32, i32, i32) {
    %c0_i32 = arith.constant 0 : i32
    %c0_i32_0 = arith.constant 0 : i32
    %c0_i32_1 = arith.constant 0 : i32
    return %arg0, %c0_i32, %c0_i32_0 : i32, i32, i32
  }
  func.func @transform_6(%arg0: i32) -> (i32, i32, i32) {
    %c0_i32 = arith.constant 0 : i32
    %c0_i32_0 = arith.constant 0 : i32
    %c0_i32_1 = arith.constant 0 : i32
    return %arg0, %c0_i32, %c0_i32_0 : i32, i32, i32
  }
  func.func @transform_7(%arg0: i32) -> (i32, i32, i32, i32) {
    %c0_i32 = arith.constant 0 : i32
    %c0_i32_0 = arith.constant 0 : i32
    %c0_i32_1 = arith.constant 0 : i32
    %c0_i32_2 = arith.constant 0 : i32
    return %arg0, %c0_i32, %c0_i32_0, %c0_i32_1 : i32, i32, i32, i32
  }
  func.func @transform_8(%arg0: i32) -> (i32, i32, i32) {
    %c0_i32 = arith.constant 0 : i32
    %c0_i32_0 = arith.constant 0 : i32
    %c0_i32_1 = arith.constant 0 : i32
    return %arg0, %c0_i32, %c0_i32_0 : i32, i32, i32
  }
}

</mosaic_0001>

<bundles_post_ra>
// kernel: gru_forward.3
= control target key start
LH: loop header
LB: loop body
LE: loop exit
PB: predicated region body
PF: predicated region fallthrough
CT: control target
= control target key end

     0   :  { %s2353_s0 = inlined_call_operand.vmem [shape: s32[8,1], index: 0, kind: input, shape index: {}]   ;;  %s2354_s1 = inlined_call_operand.vmem [shape: bf16[8,8,64], index: 1, kind: input, shape index: {}]   ;;  %s2355_s2 = inlined_call_operand.vmem [shape: bf16[2,64,96], index: 2, kind: input, shape index: {}]   ;;  %s2356_s3 = inlined_call_operand.vmem [shape: f32[2,1,96], index: 3, kind: input, shape index: {}]   ;;  %s2357_s4 = inlined_call_operand.vmem [shape: bf16[2,32,96], index: 4, kind: input, shape index: {}]   ;;  %s2358_s5 = inlined_call_operand.vmem [shape: f32[2,1,96], index: 5, kind: input, shape index: {}]   ;;  %s2359_s6 = inlined_call_operand.vmem [shape: f32[2,8,32], index: 6, kind: input, shape index: {}]   ;;  %s2360_s7 = inlined_call_operand.hbm [shape: bf16[2,8,8,32], index: 7, kind: output, shape index: {0}]   ;;  %s2361_s8 = inlined_call_operand.vmem [shape: f32[2,8,32], index: 8, kind: output, shape index: {1}]  }
   0x1   :  { %2368 = sst [smem:[#allocation6_spill]] %s2353_s0 }
   0x2   :  { %2369 = sst [smem:[#allocation7_spill]] %s2354_s1 }
   0x3   :  { %2370 = sst [smem:[#allocation8_spill]] %s2355_s2 }
   0x4   :  { %2371 = sst [smem:[#allocation9_spill]] %s2356_s3 }
   0x5   :  { %2372 = sst [smem:[#allocation10_spill]] %s2357_s4 }
   0x6   :  { %14 = vsyncpa [#allocation4], 0 }
   0x7   :  { %16 = vsyncpa [#allocation4 + $0x1], 0  ;;  %s1939_s27 = smov 0   ;;  %s1941_s28 = smov 0  }
   0x8   :  { %s1943_s29 = smov 0   ;;  %s1945_s30 = smov 0  }
   0x9 LB: > { %s1960_s9 = sadd.s32 4294967295, %s1884_s30   ;;  %s1524_s10 = sadd.s32 4294967294, %s1884_s30   ;;  %s1884_s30 = sphi %s1945_s30, %s2388_s30   ;;  %s1880_s29 = sphi %s1943_s29, %s2387_s29   ;;  %s1876_s28 = sphi %s1941_s28, %s2386_s28   ;;  %s1872_s27 = sphi %s1939_s27, %s2385_s27  }
   0xa   : > { %s1964_s11 = sadd.s32 1, %s1884_s30   ;;  %s201_s12 = sadd.s32 1, %s1880_s29 }
   0xb   : > { %s198_s13 = ssub.s32 %s1884_s30, %s1964_s11  ;;  %p211_p0 = scmp.ne.s32.totalorder %s1880_s29, %s1876_s28 }
   0xc   : > { %p199_p1 = scmp.eq.s32.totalorder %s198_s13, 0  ;;  %p212_p2 = scmp.eq.s32.totalorder %s1960_s9, 1 }
   0xd   : > { %p217_p3 = scmp.ne.s32.totalorder %s1876_s28, %s1872_s27  ;;  %p218_p4 = scmp.eq.s32.totalorder %s1524_s10, 1 }
   0xe   : > { %s1975_s14 = scalar_select %p199_p1, %s1880_s29, %s201_s12  }
   0xf   : > { %p1979_p5 = por %p212_p2, %p211_p0  ;;  %p1983_p6 = por %p218_p4, %p217_p3 }
  0x10   : > { %p1527_p7 = scmp.ge.s32.totalorder %s1884_s30, 1  ;;  %p303_p8 = scmp.lt.s32.totalorder %s1884_s30, 3 }
  0x12   : > { %p304_p9 = pnand %p1527_p7, %p303_p8 }
  0x13   : > { %p356_p10 = scmp.lt.s32.totalorder (!%p304_p9), %s1960_s9, 1  ;;  %s2375_s1 = sld [smem:[#allocation7_spill]] (!%p304_p9) }
  0x14   : > { %307 = sbr.rel (%p304_p9) target bundleno = 6544 (0x1990), region = 48  ;;  %s2376_s2 = sld [smem:[#allocation8_spill]] (!%p304_p9) }
  0x15   : > { %s2377_s4 = sld [smem:[#allocation10_spill]] (!%p304_p9)  ;;  %s2365_s17 = smov (!%p304_p9), 64  }
  0x16   : > { %s2378_s3 = sld [smem:[#allocation9_spill]] (!%p304_p9) }
  0x17   : > { %s2379_s0 = sld [smem:[#allocation6_spill]] (!%p304_p9) }
  0x19   : > { %v1886_v0 = vmov 0.0   ;;  %vm1887_vm0 = vmmov 0   ;;  %v1772_v1 = vld [vmem:[%s2375_s1] sm:$0xff]   ;;  %vm448_vm1 = vcmask 523264   ;;  %s1997_s19 = scalar_select %p356_p10, %s1960_s9, 1  ;;  %vm563_vm2 = vcmask 261120  }
  0x1a   : > { %1655 = vmatprep.subr.bf16.mxu1 %v1886_v0  ;;  %1659 = vmatprep.mubr.msk.bf16.mxu1 %vm1887_vm0, %v1886_v0  ;;  %v1773_v10 = vld [vmem:[%s2375_s1 + $0x8] sm:$0xff]   ;;  %v1774_v11 = vld [vmem:[%s2375_s1 + $0x10] sm:$0xff]   ;;  %v1775_v12 = vld [vmem:[%s2375_s1 + $0x18] sm:$0xff]   ;;  %vm526_vm3 = vcmask 785408   ;;  %s2074_s22 = scalar_select %p212_p2, 7, 0 }
  0x1b   : > { %1647 = vmatprep.mubr.msk.bf16.mxu0 %vm448_vm1, %v1772_v1  ;;  %s1596_s20 = sshll.u32 %s1997_s19, 5  ;;  %s1597_s21 = sshll.u32 %s1997_s19, 4  ;;  %v1889_v48 = vmov 0  }
  0x1c   : > { %s360_s24 = scalar_lea.vmem %s2376_s2, %s1596_s20  ;;  %s368_s10 = scalar_lea.vmem %s2377_s4, %s1597_s21  ;;  %v643_v47 = vstv %s2074_s22  ;;  %1765 = vset.pattern.permute.xlu0 %v1889_v48 }
  0x1d   : > { %v1766_v2 = vld [vmem:[%s360_s24 + $0x18] sm:$0xff]   ;;  %s2362_s12 = sshll.u32 %s1997_s19, 3  ;;  %v2009_v3 = vld [vmem:[%s368_s10 + $0x8] sm:$0xff]   ;;  %v1768_v4 = vld [vmem:[%s360_s24 + $0x10] sm:$0xff]   ;;  %s371_s13 = scalar_lea.vmem %s2358_s5, %s1997_s19 }
  0x1e   : > { %s375_s18 = scalar_lea.vmem %s2359_s6, %s2362_s12  ;;  %1639 = vmatprep.subr.bf16.mxu0 %v1766_v2  ;;  %1656 = vmatpush3.bf16.msra.mxu1 %v2009_v3  ;;  %v2017_v5 = vld [vmem:[%s368_s10] sm:$0xff]   ;;  %v1770_v7 = vld [vmem:[%s360_s24 + $0x8] sm:$0xff]   ;;  %s363_s21 = scalar_lea.vmem %s2378_s3, %s1997_s19 }
  0x1f   : > { %1640 = vmatpush3.bf16.msra.mxu0 %v1766_v2  ;;  %1657 = vmatprep.subr.bf16.mxu1 %v1886_v0  ;;  %v2020_v6 = vld [vmem:[%s375_s18] sm:$0xff]  ;;  %s1552_s23 = sshll.u32 %s2074_s22, 3  ;;  %s2363_s10 = smov 32  }
  0x20   : > { %1641 = vmatprep.subr.bf16.mxu0 %v1768_v4  ;;  %v550_v8 = vpack.c.bf16 %v2020_v6, %v2020_v6  ;;  %v1771_v9 = vld [vmem:[%s360_s24] sm:$0xff]   ;;  %s608_s24 = scalar_lea.vmem [#allocation2], %s1552_s23  ;;  %s1892_s3 = smov [#allocation3]  }
  0x21   : > { %v2056_v13 = vld [vmem:[%s371_s13] ss:$0 sm:$0xff]  ;;  %s2108_s13 = scalar_select %p212_p2, 6, 1 }
  0x22   : > { %1658 = vmatpush3.bf16.msra.mxu1 %v2017_v5  ;;  %v1535_v20 = vld [vmem:[%s363_s21] ss:$0 sm:$0xff]  ;;  %s2364_s21 = smov 96  }
  0x23   : > { %1642 = vmatpush3.bf16.msra.mxu0 %v1768_v4  ;;  %1663 = vmatprep.subr.bf16.mxu1 %v1886_v0  ;;  %v2081_v46 = vld [vmem:[%s2379_s0] sm:$0xff]  ;;  %s1557_s18 = sshll.u32 %s2108_s13, 3 }
  0x24   : > { %1643 = vmatprep.subr.bf16.mxu0 %v1770_v7  ;;  %vm644_vm4 = vcmp.gt.s32.totalorder %v2081_v46, %v643_v47  ;;  %s713_s20 = scalar_lea.vmem [#allocation2], %s1557_s18 }
  0x25   : > { %1660 = vmatmul.mubr.msk.bf16.vlgmr.msra.gmra.mxu1 %vm563_vm2, %v550_v8  ;;  %v645_v49 = vsel %vm644_vm4, 1, %v1889_v48  ;;  %s2132_s23 = scalar_select %p212_p2, 5, 2  ;;  %vm664_vm4 = vcmask 257024  }
  0x26   : > { %1664 = vmatpush3.bf16.msra.mxu1 %v2009_v3  ;;  %1667 = vmatprep.mubr.msk.bf16.mxu1 %vm1887_vm0, %v1886_v0  ;;  %s2156_s26 = scalar_select %p212_p2, 4, 3 }
  0x27   : > { %1644 = vmatpush3.bf16.msra.mxu0 %v1770_v7  ;;  %1665 = vmatprep.subr.bf16.mxu1 %v1886_v0  ;;  %s1565_s2 = sshll.u32 %s2132_s23, 2 }
  0x28   : > { %1645 = vmatprep.subr.bf16.mxu0 %v1771_v9  ;;  %s1567_s18 = sshll.u32 %s2156_s26, 3 }
  0x2a   : > { %1666 = vmatpush3.bf16.msra.mxu1 %v2017_v5 }
  0x2b   : > { %1646 = vmatpush3.bf16.msra.mxu0 %v1771_v9  ;;  %1671 = vmatprep.subr.bf16.mxu1 %v1886_v0 }
  0x2c   : > { %1679 = vmatprep.subr.bf16.mxu0 %v1886_v0 }
  0x2e   : > { %1648 = vmatmul.mubr.msk.bf16.vlgmr.msra.gmra.mxu0 %vm448_vm1, %v1773_v10 }
  0x2f   : > { %1651 = vmatprep.mubr.msk.bf16.mxu0 %vm448_vm1, %v1774_v11  ;;  %1680 = vmatpush3.bf16.msra.mxu0 %v2009_v3  ;;  %v744_v11 = vstv %s2108_s13 }
  0x30   : > { %1681 = vmatprep.subr.bf16.mxu0 %v1886_v0  ;;  %vm745_vm6 = vcmp.gt.s32.totalorder %v2081_v46, %v744_v11 }
  0x33   : > { %1682 = vmatpush3.bf16.msra.mxu0 %v2017_v5 }
  0x34   : > { %1695 = vmatprep.subr.bf16.mxu0 %v1886_v0 }
  0x36   : > { %1652 = vmatmul.mubr.msk.bf16.gmra.mxu0 %vm448_vm1, %v1775_v12 }
  0x37   : > { %1683 = vmatprep.mubr.msk.bf16.mxu0 %vm1887_vm0, %v1886_v0 }
  0xe5   : > { %v601_v14 = vpop.f32.mrf.mxu1 }
  0xe6   : > { %v602_v15 = vadd.f32 %v2056_v13, %v601_v14 }
  0xe7   : > { %v1661_v16 = vpop.f32.mrf.mxu1 }
  0xe8   : > { %618 = vrot.lane.b32.xlu0 %v602_v15, %s2365_s17  ;;  %v746_v16 = vsel %vm745_vm6, 1, %v1889_v48 }
  0xe9   : > { %v604_v17 = vpop.f32.mrf.mxu1 }
  0xeb   : > { %v1662_v18 = vpop.f32.mrf.mxu1 }
  0xee   : > { %v1649_v19 = vpop.f32.mrf.mxu0 }
  0xef   : > { %v504_v21 = vadd.f32 %v1649_v19, %v1535_v20 }
  0xf0   : > { %v495_v22 = vpop.f32.mrf.mxu0 }
  0xf1   : > { %529 = vst.msk [vmem:[#allocation2 + $0x10] sm:$0xff] %vm526_vm3, %v504_v21  ;;  %v496_v23 = vadd.f32 %v1535_v20, %v495_v22 }
  0xf2   : > { %v1650_v24 = vpop.f32.mrf.mxu0 }
  0xf3   : > { %527 = vst.msk [vmem:[#allocation2] sm:$0xff] %vm526_vm3, %v496_v23  ;;  %v507_v25 = vadd.f32 %v1650_v24, %v1535_v20 }
  0xf4   : > { %v498_v26 = vpop.f32.mrf.mxu0 }
  0xf5   : > { %530 = vst.msk [vmem:[#allocation2 + $0x18] sm:$0xff] %vm526_vm3, %v507_v25  ;;  %v499_v27 = vadd.f32 %v1535_v20, %v498_v26 }
  0xf6   : > { %v1653_v28 = vpop.f32.mrf.mxu0 }
  0xf7   : > { %528 = vst.msk [vmem:[#allocation2 + $0x8] sm:$0xff] %vm526_vm3, %v499_v27  ;;  %v520_v29 = vadd.f32 %v1653_v28, %v1535_v20 }
  0xf8   : > { %v511_v30 = vpop.f32.mrf.mxu0 }
  0xf9   : > { %533 = vst.msk [vmem:[#allocation2 + $0x30] sm:$0xff] %vm526_vm3, %v520_v29  ;;  %v512_v31 = vadd.f32 %v1535_v20, %v511_v30 }
  0xfa   : > { %v1654_v32 = vpop.f32.mrf.mxu0 }
  0xfb   : > { %531 = vst.msk [vmem:[#allocation2 + $0x20] sm:$0xff] %vm526_vm3, %v512_v31  ;;  %v523_v33 = vadd.f32 %v1654_v32, %v1535_v20 }
  0xfc   : > { %v514_v34 = vpop.f32.mrf.mxu0 }
  0xfd   : > { %534 = vst.msk [vmem:[#allocation2 + $0x38] sm:$0xff] %vm526_vm3, %v523_v33  ;;  %v515_v35 = vadd.f32 %v1535_v20, %v514_v34 }
  0xff   : > { %532 = vst.msk [vmem:[#allocation2 + $0x28] sm:$0xff] %vm526_vm3, %v515_v35 }
 0x106   : > { %v609_v36 = vld [vmem:[%s608_s24] sm:$0xff]  ;;  %s1562_s24 = sshll.u32 %s2132_s23, 3 }
 0x107   : > { %v610_v37 = vadd.f32 %v609_v36, %v602_v15  ;;  %s809_s25 = scalar_lea.vmem [#allocation2], %s1562_s24 }
 0x108   : > { %v810_v34 = vld [vmem:[%s809_s25] sm:$0xff]  ;;  %s2179_s24 = scalar_select %p212_p2, 3, 4 }
 0x109   : > { %v1553_v38 = vmul.f32 -1.442695, %v610_v37 }
 0x10a   : > { %s1572_s25 = sshll.u32 %s2179_s24, 3 }
 0x10b   : > { %1776 = vpow2.f32 %v1553_v38 }
 0x118   : > { %v1777_v39 = vpop.eup %1776 }
 0x119   : > { %v614_v40 = vadd.f32 1.0, %v1777_v39  ;;  %v840_v39 = vstv %s2132_s23  ;;  %s2382_s23 = smov 64  }
 0x11a   : > { %vm841_vm8 = vcmp.gt.s32.totalorder %v2081_v46, %v840_v39 }
 0x11b   : > { %1778 = vrcp.f32 %v614_v40 }
 0x128   : > { %v1779_v41 = vpop.eup %1778 }
 0x15a   : > { %v619_v42 = vpop.permute.xlu0 %618 }
 0x15b   : > { %v621_v43 = vmul.f32 %v1779_v41, %v619_v42 }
 0x15d   : > { %623 = vrot.lane.b32.xlu0 %v621_v43, %s2365_s17  ;;  %v842_v43 = vsel %vm841_vm8, 1, %v1889_v48 }
 0x161   : > { %647 = vperm.xlu0 %1765, %v645_v49  }
 0x1cf   : > { %v624_v44 = vpop.permute.xlu0 %623 }
 0x1d0   : > { %v626_v45 = vadd.f32 %v624_v44, %v609_v36 }
 0x1d2   : > { %1780 = vtanh.f32 %v626_v45 }
 0x1dc   : > { %v648_v55 = vpop.permute.xlu0 %647 }
 0x1dd   : > { %vm649_vm5 = vcmp.eq.s32.totalorder %v648_v55, 1 }
 0x1df   : > { %v1781_v50 = vpop.eup %1780 }
 0x1e0   : > { %629 = vrot.lane.b32.xlu1 %v1781_v50, %s2365_s17 }
 0x252   : > { %v630_v51 = vpop.permute.xlu1 %629 }
 0x253   : > { %v632_v52 = vsub.f32 %v2020_v6, %v630_v51 }
 0x255   : > { %634 = vrot.lane.b32.xlu1 %v632_v52, %s2363_s10 }
 0x2c7   : > { %v635_v53 = vpop.permute.xlu1 %634 }
 0x2c8   : > { %v637_v54 = vmul.f32 %v1779_v41, %v635_v53 }
 0x2ca   : > { %639 = vrot.lane.b32.xlu1 %v637_v54, %s2363_s10 }
 0x2ce   : > { %651 = vrot.lane.b32.xlu1 %v2020_v6, %s2365_s17  ;;  %v714_v6 = vld [vmem:[%s713_s20] sm:$0xff]  ;;  %s905_s20 = scalar_lea.vmem [#allocation2], %s1567_s18  ;;  %s1001_s18 = scalar_lea.vmem [#allocation2], %s1572_s25 }
 0x33c   : > { %v640_v56 = vpop.permute.xlu1 %639 }
 0x33d   : > { %v642_v57 = vadd.f32 %v1781_v50, %v640_v56 }
 0x340   : > { %v652_v58 = vpop.permute.xlu1 %651 }
 0x341   : > { %v654_v59 = vsel %vm649_vm5, %v642_v57, %v652_v58 }
 0x342   : > { %v2093_v60 = vpack.c.bf16 %v654_v59, %v654_v59 }
 0x344   : > { %667 = vrot.lane.b32.xlu0 %v2093_v60, %s2365_s17 }
 0x3b6   : > { %v668_v61 = vpop.permute.xlu0 %667 }
 0x3b7   : > { %1668 = vmatmul.mubr.msk.bf16.vlgmr.msra.gmra.mxu1 %vm563_vm2, %v668_v61 }
 0x3b8   : > { %1672 = vmatpush3.bf16.msra.mxu1 %v2009_v3  ;;  %1675 = vmatprep.mubr.msk.bf16.mxu1 %vm1887_vm0, %v1886_v0 }
 0x3b9   : > { %1673 = vmatprep.subr.bf16.mxu1 %v1886_v0 }
 0x3bc   : > { %1674 = vmatpush3.bf16.msra.mxu1 %v2017_v5 }
 0x3bd   : > { %1687 = vmatprep.subr.bf16.mxu1 %v1886_v0 }
 0x477   : > { %v706_v62 = vpop.f32.mrf.mxu1 }
 0x478   : > { %v707_v63 = vadd.f32 %v2056_v13, %v706_v62 }
 0x479   : > { %v1669_v1 = vpop.f32.mrf.mxu1 }
 0x47a   : > { %723 = vrot.lane.b32.xlu1 %v707_v63, %s2365_s17  ;;  %v715_v7 = vadd.f32 %v714_v6, %v707_v63  ;;  %v906_v1 = vld [vmem:[%s905_s20] sm:$0xff]  ;;  %s2202_s20 = scalar_select %p212_p2, 2, 5 }
 0x47b   : > { %v709_v2 = vpop.f32.mrf.mxu1 }
 0x47c   : > { %v1558_v8 = vmul.f32 -1.442695, %v715_v7  ;;  %s1577_s25 = sshll.u32 %s2202_s20, 3 }
 0x47d   : > { %v1670_v4 = vpop.f32.mrf.mxu1 }
 0x47e   : > { %1782 = vpow2.f32 %v1558_v8  ;;  %v936_v8 = vstv %s2156_s26 }
 0x47f   : > { %vm937_vm10 = vcmp.gt.s32.totalorder %v2081_v46, %v936_v8 }
 0x48b   : > { %v1783_v9 = vpop.eup %1782 }
 0x48c   : > { %v719_v10 = vadd.f32 1.0, %v1783_v9 }
 0x48e   : > { %1784 = vrcp.f32 %v719_v10 }
 0x49b   : > { %v1785_v12 = vpop.eup %1784 }
 0x4ec   : > { %v724_v14 = vpop.permute.xlu1 %723 }
 0x4ed   : > { %v726_v15 = vmul.f32 %v1785_v12, %v724_v14 }
 0x4ef   : > { %728 = vrot.lane.b32.xlu0 %v726_v15, %s2365_s17 }
 0x4f3   : > { %748 = vperm.xlu0 %1765, %v746_v16  }
 0x561   : > { %v729_v17 = vpop.permute.xlu0 %728 }
 0x562   : > { %v731_v18 = vadd.f32 %v729_v17, %v714_v6 }
 0x564   : > { %1786 = vtanh.f32 %v731_v18 }
 0x56e   : > { %v749_v23 = vpop.permute.xlu0 %748 }
 0x56f   : > { %vm750_vm7 = vcmp.eq.s32.totalorder %v749_v23, 1 }
 0x571   : > { %v1787_v19 = vpop.eup %1786 }
 0x572   : > { %v733_v20 = vsub.f32 %v654_v59, %v1787_v19 }
 0x574   : > { %735 = vrot.lane.b32.xlu1 %v733_v20, %s2364_s21 }
 0x5e6   : > { %v736_v21 = vpop.permute.xlu1 %735 }
 0x5e7   : > { %v738_v22 = vmul.f32 %v1785_v12, %v736_v21  ;;  %v938_v12 = vsel %vm937_vm10, 1, %v1889_v48 }
 0x5e9   : > { %740 = vrot.lane.b32.xlu1 %v738_v22, %s2363_s10 }
 0x65b   : > { %v741_v24 = vpop.permute.xlu1 %740 }
 0x65c   : > { %v743_v25 = vadd.f32 %v1787_v19, %v741_v24 }
 0x65e   : > { %v751_v26 = vsel %vm750_vm7, %v743_v25, %v654_v59 }
 0x65f   : > { %v2117_v27 = vpack.c.bf16 %v751_v26, %v751_v26 }
 0x661   : > { %763 = vrot.lane.b32.xlu0 %v2117_v27, %s2365_s17 }
 0x6d3   : > { %v764_v28 = vpop.permute.xlu0 %763 }
 0x6d4   : > { %1676 = vmatmul.mubr.msk.bf16.vlgmr.msra.gmra.mxu1 %vm563_vm2, %v764_v28 }
 0x6d5   : > { %1688 = vmatpush3.bf16.msra.mxu1 %v2009_v3  ;;  %1691 = vmatprep.mubr.msk.bf16.mxu1 %vm1887_vm0, %v1886_v0 }
 0x6d6   : > { %1689 = vmatprep.subr.bf16.mxu1 %v1886_v0 }
 0x6d9   : > { %1690 = vmatpush3.bf16.msra.mxu1 %v2017_v5 }
 0x6da   : > { %1703 = vmatprep.subr.bf16.mxu1 %v1886_v0 }
 0x794   : > { %v802_v29 = vpop.f32.mrf.mxu1 }
 0x795   : > { %v803_v30 = vadd.f32 %v2056_v13, %v802_v29 }
 0x796   : > { %v1677_v31 = vpop.f32.mrf.mxu1 }
 0x797   : > { %819 = vrot.lane.b32.xlu1 %v803_v30, %s2365_s17  ;;  %v811_v35 = vadd.f32 %v810_v34, %v803_v30 }
 0x798   : > { %v805_v32 = vpop.f32.mrf.mxu1 }
 0x799   : > { %v1563_v36 = vmul.f32 -1.442695, %v811_v35  ;;  %v1002_v32 = vld [vmem:[%s1001_s18] sm:$0xff]  ;;  %s1097_s18 = scalar_lea.vmem [#allocation2], %s1577_s25 }
 0x79a   : > { %v1678_v33 = vpop.f32.mrf.mxu1  ;;  %s2220_s25 = scalar_select %p212_p2, 1, 6 }
 0x79b   : > { %1788 = vpow2.f32 %v1563_v36 }
 0x7a8   : > { %v1789_v37 = vpop.eup %1788 }
 0x7a9   : > { %v815_v38 = vadd.f32 1.0, %v1789_v37  ;;  %v1032_v37 = vstv %s2179_s24 }
 0x7aa   : > { %vm1033_vm12 = vcmp.gt.s32.totalorder %v2081_v46, %v1032_v37 }
 0x7ab   : > { %1790 = vrcp.f32 %v815_v38 }
 0x7b8   : > { %v1791_v40 = vpop.eup %1790 }
 0x809   : > { %v820_v41 = vpop.permute.xlu1 %819 }
 0x80a   : > { %v822_v42 = vmul.f32 %v1791_v40, %v820_v41  ;;  %v1034_v41 = vsel %vm1033_vm12, 1, %v1889_v48 }
 0x80c   : > { %824 = vrot.lane.b32.xlu0 %v822_v42, %s2365_s17 }
 0x810   : > { %844 = vperm.xlu0 %1765, %v842_v43  }
 0x87e   : > { %v825_v44 = vpop.permute.xlu0 %824 }
 0x87f   : > { %v827_v45 = vadd.f32 %v825_v44, %v810_v34 }
 0x881   : > { %1792 = vtanh.f32 %v827_v45 }
 0x88b   : > { %v845_v52 = vpop.permute.xlu0 %844 }
 0x88c   : > { %vm846_vm9 = vcmp.eq.s32.totalorder %v845_v52, 1 }
 0x88e   : > { %v1793_v47 = vpop.eup %1792 }
 0x88f   : > { %v829_v49 = vsub.f32 %v751_v26, %v1793_v47 }
 0x891   : > { %831 = vrot.lane.b32.xlu1 %v829_v49, %s2364_s21 }
 0x903   : > { %v832_v50 = vpop.permute.xlu1 %831 }
 0x904   : > { %v834_v51 = vmul.f32 %v1791_v40, %v832_v50 }
 0x906   : > { %836 = vrot.lane.b32.xlu1 %v834_v51, %s2363_s10 }
 0x978   : > { %v837_v53 = vpop.permute.xlu1 %836 }
 0x979   : > { %v839_v54 = vadd.f32 %v1793_v47, %v837_v53 }
 0x97b   : > { %v847_v55 = vsel %vm846_vm9, %v839_v54, %v751_v26 }
 0x97c   : > { %v2141_v56 = vpack.c.bf16 %v847_v55, %v847_v55 }
 0x97e   : > { %859 = vrot.lane.b32.xlu0 %v2141_v56, %s2365_s17 }
 0x9f0   : > { %v860_v57 = vpop.permute.xlu0 %859 }
 0x9f1   : > { %1684 = vmatmul.mubr.msk.bf16.vlgmr.msra.gmra.mxu0 %vm563_vm2, %v860_v57 }
 0x9f2   : > { %1696 = vmatpush3.bf16.msra.mxu0 %v2009_v3  ;;  %1699 = vmatprep.mubr.msk.bf16.mxu0 %vm1887_vm0, %v1886_v0 }
 0x9f3   : > { %1697 = vmatprep.subr.bf16.mxu0 %v1886_v0 }
 0x9f6   : > { %1698 = vmatpush3.bf16.msra.mxu0 %v2017_v5 }
 0x9f7   : > { %1711 = vmatprep.subr.bf16.mxu0 %v1886_v0 }
 0xab1   : > { %v898_v58 = vpop.f32.mrf.mxu0 }
 0xab2   : > { %v899_v59 = vadd.f32 %v2056_v13, %v898_v58 }
 0xab3   : > { %v1685_v61 = vpop.f32.mrf.mxu0 }
 0xab4   : > { %915 = vrot.lane.b32.xlu1 %v899_v59, %s2365_s17  ;;  %v907_v2 = vadd.f32 %v906_v1, %v899_v59 }
 0xab5   : > { %v901_v62 = vpop.f32.mrf.mxu0 }
 0xab6   : > { %v1568_v4 = vmul.f32 -1.442695, %v907_v2  ;;  %v1128_v2 = vstv %s2202_s20 }
 0xab7   : > { %v1686_v63 = vpop.f32.mrf.mxu0  ;;  %vm1129_vm14 = vcmp.gt.s32.totalorder %v2081_v46, %v1128_v2 }
 0xab8   : > { %1794 = vpow2.f32 %v1568_v4  ;;  %v1130_v8 = vsel %vm1129_vm14, 1, %v1889_v48 }
 0xac5   : > { %v1795_v6 = vpop.eup %1794 }
 0xac6   : > { %v911_v7 = vadd.f32 1.0, %v1795_v6 }
 0xac8   : > { %1796 = vrcp.f32 %v911_v7 }
 0xad5   : > { %v1797_v9 = vpop.eup %1796 }
 0xb26   : > { %v916_v10 = vpop.permute.xlu1 %915 }
 0xb27   : > { %v918_v11 = vmul.f32 %v1797_v9, %v916_v10 }
 0xb29   : > { %920 = vrot.lane.b32.xlu0 %v918_v11, %s2365_s17 }
 0xb2d   : > { %940 = vperm.xlu0 %1765, %v938_v12  }
 0xb9b   : > { %v921_v14 = vpop.permute.xlu0 %920 }
 0xb9c   : > { %v923_v15 = vadd.f32 %v921_v14, %v906_v1 }
 0xb9e   : > { %1798 = vtanh.f32 %v923_v15 }
 0xba8   : > { %v941_v20 = vpop.permute.xlu0 %940 }
 0xba9   : > { %vm942_vm11 = vcmp.eq.s32.totalorder %v941_v20, 1 }
 0xbab   : > { %v1799_v16 = vpop.eup %1798 }
 0xbac   : > { %v925_v17 = vsub.f32 %v847_v55, %v1799_v16 }
 0xbae   : > { %927 = vrot.lane.b32.xlu1 %v925_v17, %s2364_s21 }
 0xc20   : > { %v928_v18 = vpop.permute.xlu1 %927 }
 0xc21   : > { %v930_v19 = vmul.f32 %v1797_v9, %v928_v18 }
 0xc23   : > { %932 = vrot.lane.b32.xlu1 %v930_v19, %s2363_s10 }
 0xc95   : > { %v933_v21 = vpop.permute.xlu1 %932 }
 0xc96   : > { %v935_v22 = vadd.f32 %v1799_v16, %v933_v21 }
 0xc98   : > { %v943_v23 = vsel %vm942_vm11, %v935_v22, %v847_v55 }
 0xc99   : > { %v2165_v24 = vpack.c.bf16 %v943_v23, %v943_v23 }
 0xc9b   : > { %955 = vrot.lane.b32.xlu0 %v2165_v24, %s2365_s17 }
 0xd0d   : > { %v956_v25 = vpop.permute.xlu0 %955 }
 0xd0e   : > { %1692 = vmatmul.mubr.msk.bf16.vlgmr.msra.gmra.mxu1 %vm563_vm2, %v956_v25 }
 0xd0f   : > { %1704 = vmatpush3.bf16.msra.mxu1 %v2009_v3  ;;  %1707 = vmatprep.mubr.msk.bf16.mxu1 %vm1887_vm0, %v1886_v0 }
 0xd10   : > { %1705 = vmatprep.subr.bf16.mxu1 %v1886_v0 }
 0xd13   : > { %1706 = vmatpush3.bf16.msra.mxu1 %v2017_v5 }
 0xdce   : > { %v994_v26 = vpop.f32.mrf.mxu1 }
 0xdcf   : > { %v995_v28 = vadd.f32 %v2056_v13, %v994_v26 }
 0xdd0   : > { %v1693_v29 = vpop.f32.mrf.mxu1 }
 0xdd1   : > { %1011 = vrot.lane.b32.xlu1 %v995_v28, %s2365_s17  ;;  %v1003_v33 = vadd.f32 %v1002_v32, %v995_v28 }
 0xdd2   : > { %v997_v30 = vpop.f32.mrf.mxu1 }
 0xdd3   : > { %v1573_v34 = vmul.f32 -1.442695, %v1003_v33 }
 0xdd4   : > { %v1694_v31 = vpop.f32.mrf.mxu1 }
 0xdd5   : > { %1800 = vpow2.f32 %v1573_v34  ;;  %v1224_v34 = vstv %s2220_s25 }
 0xde2   : > { %v1801_v35 = vpop.eup %1800 }
 0xde3   : > { %v1007_v36 = vadd.f32 1.0, %v1801_v35 }
 0xde5   : > { %1802 = vrcp.f32 %v1007_v36 }
 0xdf2   : > { %v1803_v38 = vpop.eup %1802 }
 0xe43   : > { %v1012_v39 = vpop.permute.xlu1 %1011 }
 0xe44   : > { %v1014_v40 = vmul.f32 %v1803_v38, %v1012_v39 }
 0xe46   : > { %1016 = vrot.lane.b32.xlu0 %v1014_v40, %s2365_s17 }
 0xe4a   : > { %1036 = vperm.xlu0 %1765, %v1034_v41  }
 0xeb8   : > { %v1017_v42 = vpop.permute.xlu0 %1016 }
 0xeb9   : > { %v1019_v43 = vadd.f32 %v1017_v42, %v1002_v32 }
 0xebb   : > { %1804 = vtanh.f32 %v1019_v43 }
 0xec5   : > { %v1037_v50 = vpop.permute.xlu0 %1036 }
 0xec6   : > { %vm1038_vm13 = vcmp.eq.s32.totalorder %v1037_v50, 1 }
 0xec8   : > { %v1805_v44 = vpop.eup %1804 }
 0xec9   : > { %v1021_v45 = vsub.f32 %v943_v23, %v1805_v44 }
 0xecb   : > { %1023 = vrot.lane.b32.xlu1 %v1021_v45, %s2364_s21 }
 0xf3d   : > { %v1024_v47 = vpop.permute.xlu1 %1023 }
 0xf3e   : > { %v1026_v49 = vmul.f32 %v1803_v38, %v1024_v47 }
 0xf40   : > { %1028 = vrot.lane.b32.xlu1 %v1026_v49, %s2363_s10 }
 0xfb2   : > { %v1029_v51 = vpop.permute.xlu1 %1028 }
 0xfb3   : > { %v1031_v52 = vadd.f32 %v1805_v44, %v1029_v51 }
 0xfb5   : > { %v1039_v53 = vsel %vm1038_vm13, %v1031_v52, %v943_v23 }
 0xfb6   : > { %v2188_v54 = vpack.c.bf16 %v1039_v53, %v1039_v53 }
 0xfb8   : > { %1051 = vrot.lane.b32.xlu0 %v2188_v54, %s2365_s17 }
0x102a   : > { %v1052_v55 = vpop.permute.xlu0 %1051 }
0x102b   : > { %1700 = vmatmul.mubr.msk.bf16.vlgmr.msra.gmra.mxu0 %vm563_vm2, %v1052_v55 }
0x102c   : > { %1712 = vmatpush3.bf16.msra.mxu0 %v2009_v3  ;;  %1715 = vmatprep.mubr.msk.bf16.mxu0 %vm1887_vm0, %v1886_v0  ;;  %v1098_v3 = vld [vmem:[%s1097_s18] sm:$0xff]  ;;  %s1582_s18 = sshll.u32 %s2220_s25, 3  ;;  %vm1225_vm0 = vcmp.gt.s32.totalorder %v2081_v46, %v1224_v34 }
0x102d   : > { %1713 = vmatprep.subr.bf16.mxu0 %v1886_v0  ;;  %s1193_s12 = scalar_lea.vmem [#allocation2], %s1582_s18  ;;  %v1226_v38 = vsel %vm1225_vm0, 1, %v1889_v48 }
0x102e   : > { %v1194_v29 = vld [vmem:[%s1193_s12] sm:$0xff]  ;;  %s2239_s12 = scalar_select %p212_p2, 0, 7 }
0x1030   : > { %1714 = vmatpush3.bf16.msra.mxu0 %v2017_v5  ;;  %s1587_s18 = sshll.u32 %s2239_s12, 3 }
0x10eb   : > { %v1090_v57 = vpop.f32.mrf.mxu0 }
0x10ec   : > { %v1091_v58 = vadd.f32 %v2056_v13, %v1090_v57 }
0x10ed   : > { %v1701_v59 = vpop.f32.mrf.mxu0 }
0x10ee   : > { %1107 = vrot.lane.b32.xlu1 %v1091_v58, %s2365_s17  ;;  %v1099_v63 = vadd.f32 %v1098_v3, %v1091_v58 }
0x10ef   : > { %v1093_v61 = vpop.f32.mrf.mxu0 }
0x10f0   : > { %v1578_v0 = vmul.f32 -1.442695, %v1099_v63 }
0x10f1   : > { %v1702_v62 = vpop.f32.mrf.mxu0 }
0x10f2   : > { %1806 = vpow2.f32 %v1578_v0 }
0x10ff   : > { %v1807_v5 = vpop.eup %1806 }
0x1100   : > { %v1103_v1 = vadd.f32 1.0, %v1807_v5 }
0x1102   : > { %1808 = vrcp.f32 %v1103_v1 }
0x110f   : > { %v1809_v4 = vpop.eup %1808 }
0x1160   : > { %v1108_v6 = vpop.permute.xlu1 %1107 }
0x1161   : > { %v1110_v7 = vmul.f32 %v1809_v4, %v1108_v6 }
0x1163   : > { %1112 = vrot.lane.b32.xlu0 %v1110_v7, %s2365_s17 }
0x1167   : > { %1132 = vperm.xlu0 %1765, %v1130_v8  }
0x11d5   : > { %v1113_v9 = vpop.permute.xlu0 %1112 }
0x11d6   : > { %v1115_v10 = vadd.f32 %v1113_v9, %v1098_v3 }
0x11d8   : > { %1810 = vtanh.f32 %v1115_v10 }
0x11e2   : > { %v1133_v16 = vpop.permute.xlu0 %1132 }
0x11e3   : > { %vm1134_vm15 = vcmp.eq.s32.totalorder %v1133_v16, 1 }
0x11e5   : > { %v1811_v11 = vpop.eup %1810 }
0x11e6   : > { %v1117_v12 = vsub.f32 %v1039_v53, %v1811_v11 }
0x11e8   : > { %1119 = vrot.lane.b32.xlu1 %v1117_v12, %s2364_s21 }
0x125a   : > { %v1120_v14 = vpop.permute.xlu1 %1119 }
0x125b   : > { %v1122_v15 = vmul.f32 %v1809_v4, %v1120_v14 }
0x125d   : > { %1124 = vrot.lane.b32.xlu1 %v1122_v15, %s2363_s10 }
0x12cf   : > { %v1125_v17 = vpop.permute.xlu1 %1124 }
0x12d0   : > { %v1127_v18 = vadd.f32 %v1811_v11, %v1125_v17 }
0x12d2   : > { %v1135_v19 = vsel %vm1134_vm15, %v1127_v18, %v1039_v53 }
0x12d3   : > { %v2211_v20 = vpack.c.bf16 %v1135_v19, %v1135_v19 }
0x12d5   : > { %1147 = vrot.lane.b32.xlu0 %v2211_v20, %s2365_s17 }
0x1347   : > { %v1148_v21 = vpop.permute.xlu0 %1147 }
0x1348   : > { %1708 = vmatmul.mubr.msk.bf16.vlgmr.msra.gmra.mxu1 %vm563_vm2, %v1148_v21 }
0x1408   : > { %v1186_v22 = vpop.f32.mrf.mxu1 }
0x1409   : > { %v1187_v23 = vadd.f32 %v2056_v13, %v1186_v22 }
0x140a   : > { %v1709_v25 = vpop.f32.mrf.mxu1 }
0x140b   : > { %1203 = vrot.lane.b32.xlu1 %v1187_v23, %s2365_s17  ;;  %v1195_v30 = vadd.f32 %v1194_v29, %v1187_v23 }
0x140c   : > { %v1189_v26 = vpop.f32.mrf.mxu1 }
0x140d   : > { %v1583_v31 = vmul.f32 -1.442695, %v1195_v30 }
0x140e   : > { %v1710_v28 = vpop.f32.mrf.mxu1 }
0x140f   : > { %1812 = vpow2.f32 %v1583_v31 }
0x141c   : > { %v1813_v32 = vpop.eup %1812 }
0x141d   : > { %v1199_v33 = vadd.f32 1.0, %v1813_v32 }
0x141f   : > { %1814 = vrcp.f32 %v1199_v33 }
0x142c   : > { %v1815_v35 = vpop.eup %1814 }
0x147d   : > { %v1204_v36 = vpop.permute.xlu1 %1203 }
0x147e   : > { %v1206_v37 = vmul.f32 %v1815_v35, %v1204_v36 }
0x1480   : > { %1208 = vrot.lane.b32.xlu0 %v1206_v37, %s2365_s17 }
0x1484   : > { %1228 = vperm.xlu0 %1765, %v1226_v38  }
0x14f2   : > { %v1209_v39 = vpop.permute.xlu0 %1208 }
0x14f3   : > { %v1211_v40 = vadd.f32 %v1209_v39, %v1194_v29 }
0x14f5   : > { %1816 = vtanh.f32 %v1211_v40 }
0x14ff   : > { %v1229_v45 = vpop.permute.xlu0 %1228 }
0x1500   : > { %vm1230_vm1 = vcmp.eq.s32.totalorder %v1229_v45, 1 }
0x1502   : > { %v1817_v41 = vpop.eup %1816 }
0x1503   : > { %v1213_v42 = vsub.f32 %v1135_v19, %v1817_v41 }
0x1505   : > { %1215 = vrot.lane.b32.xlu1 %v1213_v42, %s2364_s21  ;;  %s1555_s21 = sshll.u32 %s2074_s22, 2 }
0x1577   : > { %v1216_v43 = vpop.permute.xlu1 %1215 }
0x1578   : > { %v1218_v44 = vmul.f32 %v1815_v35, %v1216_v43 }
0x157a   : > { %1220 = vrot.lane.b32.xlu1 %v1218_v44, %s2363_s10  ;;  %s1289_s10 = scalar_lea.vmem [#allocation2], %s1587_s18 }
0x157b   : > { %v1290_v61 = vld [vmem:[%s1289_s10] sm:$0xff]  ;;  %s2367_s10 = sand.u32 1, %s1876_s28  }
0x157c   : > { %s1528_s18 = sshll.u32 %s2367_s10, 5 }
0x157d   : > { %s2257_s0 = scalar_lea.vmem [#allocation3], %s1528_s18 }
0x157e   : > { %s663_s1 = scalar_lea.vmem %s2257_s0, %s1555_s21 [#allocation3]  ;;  %s856_s22 = scalar_lea.vmem %s2257_s0, %s1565_s2 [#allocation3] }
0x157f   : > { %s2381_s21 = smov 32   ;;  %s1585_s2 = sshll.u32 %s2220_s25, 2 }
0x1580   : > { %s1240_s18 = scalar_lea.vmem %s2257_s0, %s1585_s2 [#allocation3]  ;;  %s1606_s2 = sshll.u32 %s1960_s9, 9 }
0x1581   : > { %s2303_s4 = scalar_lea.hbm %s2360_s7, %s1606_s2  ;;  %s2384_s9 = sand.u32 1, %s1876_s28  }
0x15ec   : > { %v1221_v47 = vpop.permute.xlu1 %1220 }
0x15ed   : > { %v1223_v49 = vadd.f32 %v1817_v41, %v1221_v47 }
0x15ef   : > { %v2229_v50 = vsel %vm1230_vm1, %v1223_v49, %v1135_v19 }
0x15f0   : > { %v1232_v51 = vpack.c.bf16 %v2229_v50, %v2229_v50 }
0x15f2   : > { %1243 = vrot.lane.b32.xlu0 %v1232_v51, %s2365_s17 }
0x1664   : > { %v1244_v52 = vpop.permute.xlu0 %1243 }
0x1665   : > { %1716 = vmatmul.mubr.msk.bf16.vlgmr.msra.gmra.mxu0 %vm563_vm2, %v1244_v52 }
0x1725   : > { %v1282_v53 = vpop.f32.mrf.mxu0 }
0x1726   : > { %v1283_v55 = vadd.f32 %v2056_v13, %v1282_v53  ;;  %v1320_v13 = vstv %s2239_s12 }
0x1727   : > { %v1717_v57 = vpop.f32.mrf.mxu0  ;;  %vm1321_vm3 = vcmp.gt.s32.totalorder %v2081_v46, %v1320_v13 }
0x1728   : > { %1299 = vrot.lane.b32.xlu1 %v1283_v55, %s2365_s17  ;;  %v1291_v62 = vadd.f32 %v1290_v61, %v1283_v55  ;;  %v1322_v4 = vsel %vm1321_vm3, 1, %v1889_v48 }
0x1729   : > { %v1285_v58 = vpop.f32.mrf.mxu0 }
0x172a   : > { %v1588_v3 = vmul.f32 -1.442695, %v1291_v62 }
0x172b   : > { %v1718_v59 = vpop.f32.mrf.mxu0 }
0x172c   : > { %1818 = vpow2.f32 %v1588_v3 }
0x1739   : > { %v1819_v63 = vpop.eup %1818 }
0x173a   : > { %v1295_v0 = vadd.f32 1.0, %v1819_v63 }
0x173c   : > { %1820 = vrcp.f32 %v1295_v0 }
0x1749   : > { %v1821_v5 = vpop.eup %1820 }
0x179a   : > { %v1300_v1 = vpop.permute.xlu1 %1299 }
0x179b   : > { %v1302_v2 = vmul.f32 %v1821_v5, %v1300_v1 }
0x179d   : > { %1304 = vrot.lane.b32.xlu0 %v1302_v2, %s2365_s17 }
0x17a1   : > { %1324 = vperm.xlu0 %1765, %v1322_v4  }
0x17a5   : > { %659 = vrot.lane.b32.xlu0 %v2093_v60, %s2365_s17 }
0x17a9   : > { %852 = vrot.lane.b32.xlu0 %v2141_v56, %s2365_s17 }
0x17ad   : > { %1044 = vrot.lane.b32.xlu0 %v2188_v54, %s2365_s17 }
0x17b1   : > { %1236 = vrot.lane.b32.xlu0 %v1232_v51, %s2365_s17  ;;  %s2380_s17 = smov 96  }
0x180f   : > { %v1305_v6 = vpop.permute.xlu0 %1304 }
0x1810   : > { %v1307_v7 = vadd.f32 %v1305_v6, %v1290_v61 }
0x1812   : > { %1822 = vtanh.f32 %v1307_v7 }
0x181c   : > { %v1325_v46 = vpop.permute.xlu0 %1324 }
0x181d   : > { %vm1326_vm5 = vcmp.eq.s32.totalorder %v1325_v46, 1 }
0x181f   : > { %v1823_v48 = vpop.eup %1822 }
0x1820   : > { %v660_v60 = vpop.permute.xlu0 %659  ;;  %v1309_v56 = vsub.f32 %v2229_v50, %v1823_v48 }
0x1821   : > { %665 = vst.msk [vmem:[%s663_s1] sm:$0xf] %vm664_vm4, %v660_v60  ;;  %s1560_s1 = sshll.u32 %s2108_s13, 2  ;;  %s1575_s13 = sshll.u32 %s2179_s24, 2 }
0x1822   : > { %1311 = vrot.lane.b32.xlu1 %v1309_v56, %s2380_s17  ;;  %s760_s17 = scalar_lea.vmem %s2257_s0, %s1560_s1 [#allocation3]  ;;  %s1590_s1 = sshll.u32 %s2239_s12, 2 }
0x1823   : > { %s1828_s12 = sshll.u32 %s1892_s3, 4  ;;  %s1829_s12 = int_to_ptr.vmem [resolvable:$false] %s1828_s12 }
0x1824   : > { %v853_v54 = vpop.permute.xlu0 %852  ;;  %s1830_s10 = scalar_lea.vmem %s1829_s12, 1024 }
0x1825   : > { %857 = vst.msk [vmem:[%s856_s22] sm:$0xf] %vm664_vm4, %v853_v54  ;;  %s1570_s22 = sshll.u32 %s2156_s26, 2  ;;  %s1580_s26 = sshll.u32 %s2202_s20, 2 }
0x1826   : > { %s952_s25 = scalar_lea.vmem %s2257_s0, %s1570_s22 [#allocation3]  ;;  %s1144_s24 = scalar_lea.vmem %s2257_s0, %s1580_s26 [#allocation3] }
0x1827   : > { %s1336_s20 = scalar_lea.vmem %s2257_s0, %s1590_s1 [#allocation3] }
0x1828   : > { %v1045_v10 = vpop.permute.xlu0 %1044 }
0x182c   : > { %v1237_v15 = vpop.permute.xlu0 %1236 }
0x1894   : > { %v1312_v8 = vpop.permute.xlu1 %1311 }
0x1895   : > { %v1314_v9 = vmul.f32 %v1821_v5, %v1312_v8 }
0x1897   : > { %1316 = vrot.lane.b32.xlu1 %v1314_v9, %s2381_s21  ;;  %s1048_s21 = scalar_lea.vmem %s2257_s0, %s1575_s13 [#allocation3]  ;;  %s1361_s13 = sshll.u32 %s2257_s0, 4  ;;  %s2306_s13 = int_to_ptr.vmem [resolvable:$true] %s1361_s13 }
0x1898   : > { %s1824_s0 = scalar_lea.vmem %s2306_s13, 512  ;;  %p1831_p0 = scmp.lt.s32.totalorder %s2306_s13, %s1829_s12 }
0x1899   : > { %p1825_p11 = scmp.ne.s32.totalorder %s2306_s13, %s1824_s0  ;;  %p1832_p1 = scmp.lt.s32.totalorder %s1830_s10, %s1824_s0 }
0x189b   : > { %756 = vrot.lane.b32.xlu1 %v2117_v27, %s2382_s23  ;;  %p1826_p12 = pnand %p1825_p11, %p1979_p5  ;;  %p1833_p2 = por %p1832_p1, %p1831_p0 }
0x189d   : > { %p1827_p13 = pneg %p1826_p12 }
0x189f   : > { %948 = vrot.lane.b32.xlu1 %v2165_v24, %s2382_s23  ;;  %p1834_p3 = pnand %p1833_p2, %p1827_p13 }
0x18a3   : > { %1140 = vrot.lane.b32.xlu1 %v2211_v20, %s2382_s23 }
0x1909   : > { %v1317_v11 = vpop.permute.xlu1 %1316 }
0x190a   : > { %v1319_v12 = vadd.f32 %v1823_v48, %v1317_v11 }
0x190c   : > { %v1327_v27 = vsel %vm1326_vm5, %v1319_v12, %v2229_v50 }
0x190d   : > { %v757_v14 = vpop.permute.xlu1 %756  ;;  %1339 = vrot.lane.b32.xlu0 %v1327_v27, %s2382_s23  ;;  %v1605_v24 = vpack.c.bf16 %v1327_v27, %v1327_v27 }
0x190e   : > { %761 = vst.msk [vmem:[%s760_s17] sm:$0xf] %vm664_vm4, %v757_v14  ;;  %s2383_s17 = sshll.u32 %s1997_s19, 3  ;;  %s2311_s19 = scalar_lea.sflag [#allocation4], %s2384_s9 }
0x190f   : > { %1241 = vst.msk [vmem:[%s1240_s18] sm:$0xf] %vm664_vm4, %v1237_v15  ;;  %1332 = vrot.lane.b32.xlu1 %v1605_v24, %s2382_s23  ;;  %s379_s22 = scalar_lea.vmem %s2361_s8, %s2383_s17 }
0x1911   : > { %v949_v16 = vpop.permute.xlu1 %948 }
0x1912   : > { %953 = vst.msk [vmem:[%s952_s25] sm:$0xf] %vm664_vm4, %v949_v16 }
0x1913   : > { %1049 = vst.msk [vmem:[%s1048_s21] sm:$0xf] %vm664_vm4, %v1045_v10 }
0x1915   : > { %v1141_v17 = vpop.permute.xlu1 %1140 }
0x1916   : > { %1145 = vst.msk [vmem:[%s1144_s24] sm:$0xf] %vm664_vm4, %v1141_v17 }
0x197f   : > { %v1340_v18 = vpop.permute.xlu0 %1339 }
0x1980   : > { %1342 = vst.msk [vmem:[%s379_s22] sm:$0xff] %vm563_vm2, %v1340_v18 }
0x1981   : > { %v1333_v19 = vpop.permute.xlu1 %1332 }
0x1982   : > { %1337 = vst.msk [vmem:[%s1336_s20] sm:$0xf] %vm664_vm4, %v1333_v19 }
0x1983   : > { %1837 = shalt.err (!%p1834_p3)
}
0x1984   : > { %s1838_s21 = scalar_lea.hbm %s2303_s4, 512  ;;  %s1842_s1 = scalar_lea.hbm %s2360_s7, 1024 }
0x1985   : > { %p1839_p4 = scmp.ne.s32.totalorder %s2303_s4, %s1838_s21  ;;  %p1843_p9 = scmp.lt.s32.totalorder %s2303_s4, %s2360_s7 }
0x1986   : > { %p1844_p10 = scmp.lt.s32.totalorder %s1842_s1, %s1838_s21 }
0x1987   : > { %p1840_p7 = pnand %p1839_p4, %p1979_p5 }
0x1988   : > { %p1845_p11 = por %p1844_p10, %p1843_p9 }
0x1989   : > { %p1841_p8 = pneg %p1840_p7 }
0x198b   : > { %p1846_p12 = pnand %p1845_p11, %p1841_p8 }
0x198d   : > { %1849 = shalt.err (!%p1846_p12)
}
0x198e   : > { %s1893_s18 = smov 4  }
0x198f   : > { %1719 = dma.vmem_to_hbm [thread:$0]  (%p1979_p5), %s2306_s13, 512, %s2303_s4, %s2311_s19, %s2382_s23, %s2382_s23, %s1893_s18  }
0x1990 PF: > { %p1725_p13 = scmp.ge.s32.totalorder %s1884_s30, 2  ;;  %s1379_s22 = sand.u32 1, %s1872_s27  }
0x1991   : > { %s1380_s20 = scalar_lea.sflag [#allocation4], %s1379_s22 }
0x1992   : > { %p1722_p0 = pnand %p1725_p13, %p1983_p6 }
0x1994   : > { %p1723_p1 = pneg %p1722_p0 }
0x1996   : > { %1867 = dma.done.wait (%p1723_p1), %s1380_s20, 512  }
0x1997   : > { %1869 = vsyncadd (%p1723_p1), %s1380_s20, 4294966784  ;;  %p19_p2 = scmp.ge.s32.totalorder %s1964_s11, 4   ;;  %s2385_s27 = smov %s1876_s28 }
0x1998   : > { %s2386_s28 = smov %s1880_s29  ;;  %s2387_s29 = smov %s1975_s14 }
0x1999   : > { %s2388_s30 = smov %s1964_s11  ;;  %21 = sbr.rel (!%p19_p2) target bundleno = 9 (0x9), region = 123 }
0x199e   :  { %1392 = vsyncpa [#allocation4], 1 }
0x199f   :  { %1394 = vsyncpa [#allocation4 + $0x1], 1 }

// kernel: gru_forward.2
= control target key start
LH: loop header
LB: loop body
LE: loop exit
PB: predicated region body
PF: predicated region fallthrough
CT: control target
= control target key end

     0   :  { %s1792_s27 = smov 0   ;;  %s2118_s0 = inlined_call_operand.vmem [shape: s32[8,1], index: 0, kind: input, shape index: {}]   ;;  %s2119_s1 = inlined_call_operand.vmem [shape: bf16[8,8,16], index: 1, kind: input, shape index: {}]   ;;  %s2120_s2 = inlined_call_operand.vmem [shape: bf16[2,16,96], index: 2, kind: input, shape index: {}]   ;;  %s2121_s3 = inlined_call_operand.vmem [shape: f32[2,1,96], index: 3, kind: input, shape index: {}]   ;;  %s2122_s4 = inlined_call_operand.vmem [shape: bf16[2,32,96], index: 4, kind: input, shape index: {}]   ;;  %s2123_s5 = inlined_call_operand.vmem [shape: f32[2,1,96], index: 5, kind: input, shape index: {}]   ;;  %s2124_s6 = inlined_call_operand.vmem [shape: f32[2,8,32], index: 6, kind: input, shape index: {}]   ;;  %s2125_s7 = inlined_call_operand.vmem [shape: bf16[2,8,8,32], index: 7, kind: output, shape index: {0}]   ;;  %s2126_s8 = inlined_call_operand.vmem [shape: f32[2,8,32], index: 8, kind: output, shape index: {1}]  }
   0x1 LB: > { %s1798_s28 = sadd.s32 4294967295, %s1739_s27   ;;  %p1485_p0 = scmp.ge.s32.totalorder %s1739_s27, 1  ;;  %s1739_s27 = sphi %s1792_s27, %s19_s27  }
   0x2   : > { %p300_p1 = scmp.lt.s32.totalorder %s1739_s27, 3 }
   0x4   : > { %p301_p2 = pnand %p1485_p0, %p300_p1 }
   0x5   : > { %p353_p3 = scmp.lt.s32.totalorder (!%p301_p2), %s1798_s28, 1  ;;  %s1743_s15 = smov (!%p301_p2), 64  }
   0x6   : > { %304 = sbr.rel (%p301_p2) target bundleno = 6517 (0x1975), region = 48  ;;  %p526_p4 = scmp.eq.s32.totalorder (!%p301_p2), %s1798_s28, 1 }
   0x7   : > { %s1745_s21 = smov (!%p301_p2), 32   ;;  %s1746_s25 = smov (!%p301_p2), 96  }
   0xb   : > { %v1741_v0 = vmov 0.0   ;;  %v1680_v1 = vld [vmem:[%s2119_s1] sm:$0xff]   ;;  %vm426_vm0 = vcmask 130048   ;;  %s1808_s9 = scalar_select %p353_p3, %s1798_s28, 1  ;;  %vm1742_vm1 = vmmov 0   ;;  %v1681_v3 = vld [vmem:[%s2119_s1 + $0x8] sm:$0xff]  }
   0xc   : > { %1599 = vmatprep.subr.bf16.mxu1 %v1741_v0  ;;  %1591 = vmatprep.mubr.msk.bf16.mxu0 %vm426_vm0, %v1680_v1  ;;  %v1683_v5 = vld [vmem:[%s2119_s1 + $0x10] sm:$0xff]   ;;  %vm541_vm2 = vcmask 261120   ;;  %v1684_v9 = vld [vmem:[%s2119_s1 + $0x18] sm:$0xff]   ;;  %vm504_vm3 = vcmask 785408   ;;  %s1889_s16 = scalar_select %p526_p4, 7, 0 }
   0xd   : > { %1603 = vmatprep.mubr.msk.bf16.mxu1 %vm1742_vm1, %v1741_v0  ;;  %s1814_s10 = sshll.u32 %s1808_s9, 3  ;;  %s1550_s11 = sshll.u32 %s1808_s9, 4  ;;  %v1896_v43 = vld [vmem:[%s2118_s0] sm:$0xff]  ;;  %v1744_v45 = vmov 0  }
   0xe   : > { %s357_s14 = scalar_lea.vmem %s2120_s2, %s1814_s10  ;;  %s365_s17 = scalar_lea.vmem %s2122_s4, %s1550_s11  ;;  %v621_v44 = vstv %s1889_s16  ;;  %1677 = vset.pattern.permute.xlu0 %v1744_v45 }
   0xf   : > { %v1678_v2 = vld [vmem:[%s357_s14] sm:$0xff]   ;;  %s372_s20 = scalar_lea.vmem %s2124_s6, %s1814_s10  ;;  %v1831_v4 = vld [vmem:[%s365_s17 + $0x8] sm:$0xff]   ;;  %s360_s11 = scalar_lea.vmem %s2121_s3, %s1808_s9  ;;  %vm622_vm4 = vcmp.gt.s32.totalorder %v1896_v43, %v621_v44 }
  0x10   : > { %1589 = vmatprep.subr.bf16.mxu0 %v1678_v2  ;;  %v1836_v6 = vld [vmem:[%s372_s20] sm:$0xff]  ;;  %1600 = vmatpush3.bf16.msra.mxu1 %v1831_v4  ;;  %s368_s14 = scalar_lea.vmem %s2123_s5, %s1808_s9  ;;  %v623_v46 = vsel %vm622_vm4, 1, %v1744_v45  ;;  %s1551_s28 = sshll.u32 %s1808_s9, 5  ;;  %vm642_vm4 = vcmask 257024  }
  0x11   : > { %1590 = vmatpush3.bf16.msra.mxu0 %v1678_v2  ;;  %v1839_v7 = vld [vmem:[%s365_s17] sm:$0xff]   ;;  %1601 = vmatprep.subr.bf16.mxu1 %v1741_v0  ;;  %v528_v8 = vpack.c.bf16 %v1836_v6, %v1836_v6  ;;  %s1508_s17 = sshll.u32 %s1889_s16, 3 }
  0x12   : > { %1615 = vmatprep.subr.bf16.mxu0 %v1741_v0  ;;  %v1494_v11 = vld [vmem:[%s360_s11] ss:$0 sm:$0xff]  ;;  %s586_s18 = scalar_lea.vmem [#allocation2], %s1508_s17 }
  0x13   : > { %v1875_v15 = vld [vmem:[%s368_s14] ss:$0 sm:$0xff]  ;;  %s1923_s22 = scalar_select %p526_p4, 6, 1 }
  0x14   : > { %1592 = vmatmul.mubr.msk.bf16.vlgmr.msra.gmra.mxu0 %vm426_vm0, %v1681_v3  ;;  %1602 = vmatpush3.bf16.msra.mxu1 %v1839_v7  ;;  %s1947_s26 = scalar_select %p526_p4, 5, 2 }
  0x15   : > { %1595 = vmatprep.mubr.msk.bf16.mxu0 %vm426_vm0, %v1683_v5  ;;  %1616 = vmatpush3.bf16.msra.mxu0 %v1831_v4  ;;  %s1513_s23 = sshll.u32 %s1923_s22, 3  ;;  %s1516_s9 = sshll.u32 %s1923_s22, 2 }
  0x16   : > { %1617 = vmatprep.subr.bf16.mxu0 %v1741_v0  ;;  %1607 = vmatprep.subr.bf16.mxu1 %v1741_v0  ;;  %s691_s24 = scalar_lea.vmem [#allocation2], %s1513_s23  ;;  %s1518_s29 = sshll.u32 %s1947_s26, 3 }
  0x17   : > { %1604 = vmatmul.mubr.msk.bf16.vlgmr.msra.gmra.mxu1 %vm541_vm2, %v528_v8  ;;  %v722_v8 = vstv %s1923_s22  ;;  %s787_s30 = scalar_lea.vmem [#allocation2], %s1518_s29 }
  0x18   : > { %1608 = vmatpush3.bf16.msra.mxu1 %v1831_v4  ;;  %1611 = vmatprep.mubr.msk.bf16.mxu1 %vm1742_vm1, %v1741_v0  ;;  %vm723_vm6 = vcmp.gt.s32.totalorder %v1896_v43, %v722_v8  ;;  %s1971_s11 = scalar_select %p526_p4, 4, 3 }
  0x19   : > { %1618 = vmatpush3.bf16.msra.mxu0 %v1839_v7  ;;  %1609 = vmatprep.subr.bf16.mxu1 %v1741_v0  ;;  %s1994_s14 = scalar_select %p526_p4, 3, 4 }
  0x1a   : > { %1631 = vmatprep.subr.bf16.mxu0 %v1741_v0  ;;  %s1523_s12 = sshll.u32 %s1971_s11, 3 }
  0x1b   : > { %s883_s13 = scalar_lea.vmem [#allocation2], %s1523_s12  ;;  %s1528_s17 = sshll.u32 %s1994_s14, 3 }
  0x1c   : > { %1596 = vmatmul.mubr.msk.bf16.gmra.mxu0 %vm426_vm0, %v1684_v9  ;;  %1610 = vmatpush3.bf16.msra.mxu1 %v1839_v7  ;;  %s2017_s19 = scalar_select %p526_p4, 2, 5 }
  0x1d   : > { %1619 = vmatprep.mubr.msk.bf16.mxu0 %vm1742_vm1, %v1741_v0  ;;  %1623 = vmatprep.subr.bf16.mxu1 %v1741_v0  ;;  %s2054_s12 = scalar_select %p526_p4, 0, 7 }
  0x1e   : > { %s1533_s20 = sshll.u32 %s2017_s19, 3 }
  0x1f   : > { %s1075_s23 = scalar_lea.vmem [#allocation2], %s1533_s20  ;;  %s1546_s20 = sshll.u32 %s2054_s12, 2 }
  0xd4   : > { %v1593_v10 = vpop.f32.mrf.mxu0 }
  0xd5   : > { %v482_v12 = vadd.f32 %v1593_v10, %v1494_v11 }
  0xd6   : > { %v473_v13 = vpop.f32.mrf.mxu0 }
  0xd7   : > { %507 = vst.msk [vmem:[#allocation2 + $0x10] sm:$0xff] %vm504_vm3, %v482_v12  ;;  %v474_v14 = vadd.f32 %v1494_v11, %v473_v13  ;;  %v579_v17 = vpop.f32.mrf.mxu1  ;;  %v724_v12 = vsel %vm723_vm6, 1, %v1744_v45 }
  0xd8   : > { %v1594_v16 = vpop.f32.mrf.mxu0  ;;  %v580_v19 = vadd.f32 %v1875_v15, %v579_v17 }
  0xd9   : > { %505 = vst.msk [vmem:[#allocation2] sm:$0xff] %vm504_vm3, %v474_v14  ;;  %v485_v18 = vadd.f32 %v1594_v16, %v1494_v11  ;;  %v1605_v21 = vpop.f32.mrf.mxu1 }
  0xda   : > { %v476_v20 = vpop.f32.mrf.mxu0  ;;  %596 = vrot.lane.b32.xlu0 %v580_v19, %s1743_s15 }
  0xdb   : > { %508 = vst.msk [vmem:[#allocation2 + $0x18] sm:$0xff] %vm504_vm3, %v485_v18  ;;  %v477_v22 = vadd.f32 %v1494_v11, %v476_v20  ;;  %v582_v24 = vpop.f32.mrf.mxu1 }
  0xdc   : > { %v1597_v23 = vpop.f32.mrf.mxu0 }
  0xdd   : > { %506 = vst.msk [vmem:[#allocation2 + $0x8] sm:$0xff] %vm504_vm3, %v477_v22  ;;  %v498_v25 = vadd.f32 %v1597_v23, %v1494_v11  ;;  %v1606_v27 = vpop.f32.mrf.mxu1 }
  0xde   : > { %v489_v26 = vpop.f32.mrf.mxu0 }
  0xdf   : > { %511 = vst.msk [vmem:[#allocation2 + $0x30] sm:$0xff] %vm504_vm3, %v498_v25  ;;  %v490_v28 = vadd.f32 %v1494_v11, %v489_v26 }
  0xe0   : > { %v1598_v29 = vpop.f32.mrf.mxu0 }
  0xe1   : > { %509 = vst.msk [vmem:[#allocation2 + $0x20] sm:$0xff] %vm504_vm3, %v490_v28  ;;  %v501_v30 = vadd.f32 %v1598_v29, %v1494_v11 }
  0xe2   : > { %v492_v31 = vpop.f32.mrf.mxu0 }
  0xe3   : > { %512 = vst.msk [vmem:[#allocation2 + $0x38] sm:$0xff] %vm504_vm3, %v501_v30  ;;  %v493_v32 = vadd.f32 %v1494_v11, %v492_v31 }
  0xe5   : > { %510 = vst.msk [vmem:[#allocation2 + $0x28] sm:$0xff] %vm504_vm3, %v493_v32 }
  0xec   : > { %v587_v33 = vld [vmem:[%s586_s18] sm:$0xff]  ;;  %s979_s18 = scalar_lea.vmem [#allocation2], %s1528_s17 }
  0xed   : > { %v588_v34 = vadd.f32 %v587_v33, %v580_v19  ;;  %v692_v1 = vld [vmem:[%s691_s24] sm:$0xff]  ;;  %s2035_s24 = scalar_select %p526_p4, 1, 6 }
  0xee   : > { %v788_v31 = vld [vmem:[%s787_s30] sm:$0xff] }
  0xef   : > { %v1509_v35 = vmul.f32 -1.442695, %v588_v34  ;;  %s1538_s29 = sshll.u32 %s2035_s24, 3 }
  0xf0   : > { %s1171_s30 = scalar_lea.vmem [#allocation2], %s1538_s29  ;;  %s1511_s29 = sshll.u32 %s1889_s16, 2 }
  0xf1   : > { %1685 = vpow2.f32 %v1509_v35  ;;  %s1521_s16 = sshll.u32 %s1947_s26, 2 }
  0xfe   : > { %v1686_v36 = vpop.eup %1685 }
  0xff   : > { %v592_v37 = vadd.f32 1.0, %v1686_v36  ;;  %v818_v36 = vstv %s1947_s26 }
 0x100   : > { %vm819_vm8 = vcmp.gt.s32.totalorder %v1896_v43, %v818_v36 }
 0x101   : > { %1687 = vrcp.f32 %v592_v37 }
 0x10e   : > { %v1688_v38 = vpop.eup %1687 }
 0x14c   : > { %v597_v39 = vpop.permute.xlu0 %596 }
 0x14d   : > { %v599_v40 = vmul.f32 %v1688_v38, %v597_v39 }
 0x14f   : > { %601 = vrot.lane.b32.xlu0 %v599_v40, %s1743_s15  ;;  %v820_v40 = vsel %vm819_vm8, 1, %v1744_v45 }
 0x153   : > { %625 = vperm.xlu0 %1677, %v623_v46  }
 0x1c1   : > { %v602_v41 = vpop.permute.xlu0 %601 }
 0x1c2   : > { %v604_v42 = vadd.f32 %v602_v41, %v587_v33 }
 0x1c4   : > { %1689 = vtanh.f32 %v604_v42 }
 0x1ce   : > { %v626_v52 = vpop.permute.xlu0 %625 }
 0x1cf   : > { %vm627_vm5 = vcmp.eq.s32.totalorder %v626_v52, 1 }
 0x1d1   : > { %v1690_v47 = vpop.eup %1689 }
 0x1d2   : > { %607 = vrot.lane.b32.xlu1 %v1690_v47, %s1743_s15 }
 0x244   : > { %v608_v48 = vpop.permute.xlu1 %607 }
 0x245   : > { %v610_v49 = vsub.f32 %v1836_v6, %v608_v48 }
 0x247   : > { %612 = vrot.lane.b32.xlu1 %v610_v49, %s1745_s21 }
 0x2b9   : > { %v613_v50 = vpop.permute.xlu1 %612 }
 0x2ba   : > { %v615_v51 = vmul.f32 %v1688_v38, %v613_v50 }
 0x2bc   : > { %617 = vrot.lane.b32.xlu1 %v615_v51, %s1745_s21 }
 0x2c0   : > { %629 = vrot.lane.b32.xlu1 %v1836_v6, %s1743_s15 }
 0x32e   : > { %v618_v53 = vpop.permute.xlu1 %617 }
 0x32f   : > { %v620_v54 = vadd.f32 %v1690_v47, %v618_v53 }
 0x332   : > { %v630_v55 = vpop.permute.xlu1 %629 }
 0x333   : > { %v632_v56 = vsel %vm627_vm5, %v620_v54, %v630_v55 }
 0x334   : > { %v1908_v57 = vpack.c.bf16 %v632_v56, %v632_v56 }
 0x336   : > { %645 = vrot.lane.b32.xlu0 %v1908_v57, %s1743_s15 }
 0x3a8   : > { %v646_v58 = vpop.permute.xlu0 %645 }
 0x3a9   : > { %1612 = vmatmul.mubr.msk.bf16.vlgmr.msra.gmra.mxu1 %vm541_vm2, %v646_v58 }
 0x3aa   : > { %1624 = vmatpush3.bf16.msra.mxu1 %v1831_v4  ;;  %1627 = vmatprep.mubr.msk.bf16.mxu1 %vm1742_vm1, %v1741_v0 }
 0x3ab   : > { %1625 = vmatprep.subr.bf16.mxu1 %v1741_v0 }
 0x3ae   : > { %1626 = vmatpush3.bf16.msra.mxu1 %v1839_v7 }
 0x3af   : > { %1639 = vmatprep.subr.bf16.mxu1 %v1741_v0 }
 0x469   : > { %v684_v59 = vpop.f32.mrf.mxu1 }
 0x46a   : > { %v685_v60 = vadd.f32 %v1875_v15, %v684_v59 }
 0x46b   : > { %v1613_v61 = vpop.f32.mrf.mxu1 }
 0x46c   : > { %701 = vrot.lane.b32.xlu1 %v685_v60, %s1743_s15  ;;  %v693_v2 = vadd.f32 %v692_v1, %v685_v60  ;;  %v884_v61 = vld [vmem:[%s883_s13] sm:$0xff]  ;;  %s1543_s13 = sshll.u32 %s2054_s12, 3 }
 0x46d   : > { %v687_v62 = vpop.f32.mrf.mxu1  ;;  %s1267_s17 = scalar_lea.vmem [#allocation2], %s1543_s13  ;;  %s1526_s13 = sshll.u32 %s1971_s11, 2 }
 0x46e   : > { %v1514_v3 = vmul.f32 -1.442695, %v693_v2 }
 0x46f   : > { %v1614_v63 = vpop.f32.mrf.mxu1 }
 0x470   : > { %1691 = vpow2.f32 %v1514_v3  ;;  %v914_v3 = vstv %s1971_s11  ;;  %s1536_s11 = sshll.u32 %s2017_s19, 2 }
 0x471   : > { %vm915_vm10 = vcmp.gt.s32.totalorder %v1896_v43, %v914_v3 }
 0x47d   : > { %v1692_v5 = vpop.eup %1691 }
 0x47e   : > { %v697_v6 = vadd.f32 1.0, %v1692_v5 }
 0x480   : > { %1693 = vrcp.f32 %v697_v6 }
 0x48d   : > { %v1694_v9 = vpop.eup %1693 }
 0x4de   : > { %v702_v10 = vpop.permute.xlu1 %701 }
 0x4df   : > { %v704_v11 = vmul.f32 %v1694_v9, %v702_v10 }
 0x4e1   : > { %706 = vrot.lane.b32.xlu0 %v704_v11, %s1743_s15 }
 0x4e5   : > { %726 = vperm.xlu0 %1677, %v724_v12  }
 0x553   : > { %v707_v13 = vpop.permute.xlu0 %706 }
 0x554   : > { %v709_v14 = vadd.f32 %v707_v13, %v692_v1 }
 0x556   : > { %1695 = vtanh.f32 %v709_v14 }
 0x560   : > { %v727_v20 = vpop.permute.xlu0 %726 }
 0x561   : > { %vm728_vm7 = vcmp.eq.s32.totalorder %v727_v20, 1 }
 0x563   : > { %v1696_v16 = vpop.eup %1695 }
 0x564   : > { %v711_v17 = vsub.f32 %v632_v56, %v1696_v16 }
 0x566   : > { %713 = vrot.lane.b32.xlu1 %v711_v17, %s1746_s25 }
 0x5d8   : > { %v714_v18 = vpop.permute.xlu1 %713 }
 0x5d9   : > { %v716_v19 = vmul.f32 %v1694_v9, %v714_v18  ;;  %v916_v9 = vsel %vm915_vm10, 1, %v1744_v45 }
 0x5db   : > { %718 = vrot.lane.b32.xlu1 %v716_v19, %s1745_s21 }
 0x64d   : > { %v719_v21 = vpop.permute.xlu1 %718 }
 0x64e   : > { %v721_v22 = vadd.f32 %v1696_v16, %v719_v21 }
 0x650   : > { %v729_v23 = vsel %vm728_vm7, %v721_v22, %v632_v56 }
 0x651   : > { %v1932_v24 = vpack.c.bf16 %v729_v23, %v729_v23 }
 0x653   : > { %741 = vrot.lane.b32.xlu0 %v1932_v24, %s1743_s15 }
 0x6c5   : > { %v742_v25 = vpop.permute.xlu0 %741 }
 0x6c6   : > { %1620 = vmatmul.mubr.msk.bf16.vlgmr.msra.gmra.mxu0 %vm541_vm2, %v742_v25 }
 0x6c7   : > { %1632 = vmatpush3.bf16.msra.mxu0 %v1831_v4  ;;  %1635 = vmatprep.mubr.msk.bf16.mxu0 %vm1742_vm1, %v1741_v0 }
 0x6c8   : > { %1633 = vmatprep.subr.bf16.mxu0 %v1741_v0 }
 0x6cb   : > { %1634 = vmatpush3.bf16.msra.mxu0 %v1839_v7 }
 0x6cc   : > { %1647 = vmatprep.subr.bf16.mxu0 %v1741_v0 }
 0x786   : > { %v780_v26 = vpop.f32.mrf.mxu0 }
 0x787   : > { %v781_v27 = vadd.f32 %v1875_v15, %v780_v26 }
 0x788   : > { %v1621_v28 = vpop.f32.mrf.mxu0 }
 0x789   : > { %797 = vrot.lane.b32.xlu1 %v781_v27, %s1743_s15  ;;  %v789_v32 = vadd.f32 %v788_v31, %v781_v27 }
 0x78a   : > { %v783_v29 = vpop.f32.mrf.mxu0 }
 0x78b   : > { %v1519_v33 = vmul.f32 -1.442695, %v789_v32  ;;  %v980_v29 = vld [vmem:[%s979_s18] sm:$0xff] }
 0x78c   : > { %v1622_v30 = vpop.f32.mrf.mxu0 }
 0x78d   : > { %1697 = vpow2.f32 %v1519_v33 }
 0x79a   : > { %v1698_v34 = vpop.eup %1697 }
 0x79b   : > { %v793_v35 = vadd.f32 1.0, %v1698_v34  ;;  %v1010_v34 = vstv %s1994_s14 }
 0x79c   : > { %vm1011_vm12 = vcmp.gt.s32.totalorder %v1896_v43, %v1010_v34 }
 0x79d   : > { %1699 = vrcp.f32 %v793_v35 }
 0x7aa   : > { %v1700_v37 = vpop.eup %1699 }
 0x7fb   : > { %v798_v38 = vpop.permute.xlu1 %797 }
 0x7fc   : > { %v800_v39 = vmul.f32 %v1700_v37, %v798_v38  ;;  %v1012_v38 = vsel %vm1011_vm12, 1, %v1744_v45 }
 0x7fe   : > { %802 = vrot.lane.b32.xlu0 %v800_v39, %s1743_s15 }
 0x802   : > { %822 = vperm.xlu0 %1677, %v820_v40  }
 0x870   : > { %v803_v41 = vpop.permute.xlu0 %802 }
 0x871   : > { %v805_v42 = vadd.f32 %v803_v41, %v788_v31 }
 0x873   : > { %1701 = vtanh.f32 %v805_v42 }
 0x87d   : > { %v823_v49 = vpop.permute.xlu0 %822 }
 0x87e   : > { %vm824_vm9 = vcmp.eq.s32.totalorder %v823_v49, 1 }
 0x880   : > { %v1702_v44 = vpop.eup %1701 }
 0x881   : > { %v807_v46 = vsub.f32 %v729_v23, %v1702_v44 }
 0x883   : > { %809 = vrot.lane.b32.xlu1 %v807_v46, %s1746_s25 }
 0x8f5   : > { %v810_v47 = vpop.permute.xlu1 %809 }
 0x8f6   : > { %v812_v48 = vmul.f32 %v1700_v37, %v810_v47 }
 0x8f8   : > { %814 = vrot.lane.b32.xlu1 %v812_v48, %s1745_s21 }
 0x96a   : > { %v815_v50 = vpop.permute.xlu1 %814 }
 0x96b   : > { %v817_v51 = vadd.f32 %v1702_v44, %v815_v50 }
 0x96d   : > { %v825_v52 = vsel %vm824_vm9, %v817_v51, %v729_v23 }
 0x96e   : > { %v1956_v53 = vpack.c.bf16 %v825_v52, %v825_v52 }
 0x970   : > { %837 = vrot.lane.b32.xlu0 %v1956_v53, %s1743_s15 }
 0x9e2   : > { %v838_v54 = vpop.permute.xlu0 %837 }
 0x9e3   : > { %1628 = vmatmul.mubr.msk.bf16.vlgmr.msra.gmra.mxu1 %vm541_vm2, %v838_v54 }
 0x9e4   : > { %1640 = vmatpush3.bf16.msra.mxu1 %v1831_v4  ;;  %1643 = vmatprep.mubr.msk.bf16.mxu1 %vm1742_vm1, %v1741_v0 }
 0x9e5   : > { %1641 = vmatprep.subr.bf16.mxu1 %v1741_v0 }
 0x9e8   : > { %1642 = vmatpush3.bf16.msra.mxu1 %v1839_v7 }
 0x9e9   : > { %1655 = vmatprep.subr.bf16.mxu1 %v1741_v0 }
 0xaa3   : > { %v876_v55 = vpop.f32.mrf.mxu1 }
 0xaa4   : > { %v877_v56 = vadd.f32 %v1875_v15, %v876_v55 }
 0xaa5   : > { %v1629_v58 = vpop.f32.mrf.mxu1 }
 0xaa6   : > { %893 = vrot.lane.b32.xlu1 %v877_v56, %s1743_s15  ;;  %v885_v62 = vadd.f32 %v884_v61, %v877_v56 }
 0xaa7   : > { %v879_v59 = vpop.f32.mrf.mxu1 }
 0xaa8   : > { %v1524_v63 = vmul.f32 -1.442695, %v885_v62  ;;  %v1106_v62 = vstv %s2017_s19  ;;  %s381_s19 = scalar_lea.vmem %s2126_s8, %s1814_s10 }
 0xaa9   : > { %v1630_v60 = vpop.f32.mrf.mxu1  ;;  %vm1107_vm14 = vcmp.gt.s32.totalorder %v1896_v43, %v1106_v62 }
 0xaaa   : > { %1703 = vpow2.f32 %v1524_v63  ;;  %v1108_v3 = vsel %vm1107_vm14, 1, %v1744_v45 }
 0xab7   : > { %v1704_v1 = vpop.eup %1703 }
 0xab8   : > { %v889_v2 = vadd.f32 1.0, %v1704_v1 }
 0xaba   : > { %1705 = vrcp.f32 %v889_v2 }
 0xac7   : > { %v1706_v5 = vpop.eup %1705 }
 0xb18   : > { %v894_v6 = vpop.permute.xlu1 %893 }
 0xb19   : > { %v896_v8 = vmul.f32 %v1706_v5, %v894_v6 }
 0xb1b   : > { %898 = vrot.lane.b32.xlu0 %v896_v8, %s1743_s15 }
 0xb1f   : > { %918 = vperm.xlu0 %1677, %v916_v9  }
 0xb8d   : > { %v899_v10 = vpop.permute.xlu0 %898 }
 0xb8e   : > { %v901_v11 = vadd.f32 %v899_v10, %v884_v61 }
 0xb90   : > { %1707 = vtanh.f32 %v901_v11 }
 0xb9a   : > { %v919_v17 = vpop.permute.xlu0 %918 }
 0xb9b   : > { %vm920_vm11 = vcmp.eq.s32.totalorder %v919_v17, 1 }
 0xb9d   : > { %v1708_v12 = vpop.eup %1707 }
 0xb9e   : > { %v903_v13 = vsub.f32 %v825_v52, %v1708_v12 }
 0xba0   : > { %905 = vrot.lane.b32.xlu1 %v903_v13, %s1746_s25 }
 0xc12   : > { %v906_v14 = vpop.permute.xlu1 %905 }
 0xc13   : > { %v908_v16 = vmul.f32 %v1706_v5, %v906_v14 }
 0xc15   : > { %910 = vrot.lane.b32.xlu1 %v908_v16, %s1745_s21 }
 0xc87   : > { %v911_v18 = vpop.permute.xlu1 %910 }
 0xc88   : > { %v913_v19 = vadd.f32 %v1708_v12, %v911_v18 }
 0xc8a   : > { %v921_v20 = vsel %vm920_vm11, %v913_v19, %v825_v52 }
 0xc8b   : > { %v1980_v21 = vpack.c.bf16 %v921_v20, %v921_v20 }
 0xc8d   : > { %933 = vrot.lane.b32.xlu0 %v1980_v21, %s1743_s15 }
 0xcff   : > { %v934_v22 = vpop.permute.xlu0 %933 }
 0xd00   : > { %1636 = vmatmul.mubr.msk.bf16.vlgmr.msra.gmra.mxu0 %vm541_vm2, %v934_v22 }
 0xd01   : > { %1648 = vmatpush3.bf16.msra.mxu0 %v1831_v4  ;;  %1651 = vmatprep.mubr.msk.bf16.mxu0 %vm1742_vm1, %v1741_v0 }
 0xd02   : > { %1649 = vmatprep.subr.bf16.mxu0 %v1741_v0 }
 0xd05   : > { %1650 = vmatpush3.bf16.msra.mxu0 %v1839_v7 }
 0xdc0   : > { %v972_v23 = vpop.f32.mrf.mxu0 }
 0xdc1   : > { %v973_v25 = vadd.f32 %v1875_v15, %v972_v23 }
 0xdc2   : > { %v1637_v26 = vpop.f32.mrf.mxu0 }
 0xdc3   : > { %989 = vrot.lane.b32.xlu1 %v973_v25, %s1743_s15  ;;  %v981_v30 = vadd.f32 %v980_v29, %v973_v25  ;;  %v1172_v26 = vld [vmem:[%s1171_s30] sm:$0xff] }
 0xdc4   : > { %v975_v27 = vpop.f32.mrf.mxu0 }
 0xdc5   : > { %v1529_v31 = vmul.f32 -1.442695, %v981_v30 }
 0xdc6   : > { %v1638_v28 = vpop.f32.mrf.mxu0 }
 0xdc7   : > { %1709 = vpow2.f32 %v1529_v31  ;;  %v1202_v31 = vstv %s2035_s24 }
 0xdc8   : > { %vm1203_vm0 = vcmp.gt.s32.totalorder %v1896_v43, %v1202_v31 }
 0xdd4   : > { %v1710_v32 = vpop.eup %1709 }
 0xdd5   : > { %v985_v33 = vadd.f32 1.0, %v1710_v32 }
 0xdd7   : > { %1711 = vrcp.f32 %v985_v33 }
 0xde4   : > { %v1712_v35 = vpop.eup %1711 }
 0xe35   : > { %v990_v36 = vpop.permute.xlu1 %989 }
 0xe36   : > { %v992_v37 = vmul.f32 %v1712_v35, %v990_v36 }
 0xe38   : > { %994 = vrot.lane.b32.xlu0 %v992_v37, %s1743_s15 }
 0xe3c   : > { %1014 = vperm.xlu0 %1677, %v1012_v38  }
 0xeaa   : > { %v995_v39 = vpop.permute.xlu0 %994 }
 0xeab   : > { %v997_v40 = vadd.f32 %v995_v39, %v980_v29 }
 0xead   : > { %1713 = vtanh.f32 %v997_v40 }
 0xeb7   : > { %v1015_v47 = vpop.permute.xlu0 %1014 }
 0xeb8   : > { %vm1016_vm13 = vcmp.eq.s32.totalorder %v1015_v47, 1 }
 0xeba   : > { %v1714_v41 = vpop.eup %1713 }
 0xebb   : > { %v999_v42 = vsub.f32 %v921_v20, %v1714_v41 }
 0xebd   : > { %1001 = vrot.lane.b32.xlu1 %v999_v42, %s1746_s25 }
 0xf2f   : > { %v1002_v44 = vpop.permute.xlu1 %1001 }
 0xf30   : > { %v1004_v46 = vmul.f32 %v1712_v35, %v1002_v44  ;;  %v1204_v35 = vsel %vm1203_vm0, 1, %v1744_v45 }
 0xf32   : > { %1006 = vrot.lane.b32.xlu1 %v1004_v46, %s1745_s21 }
 0xfa4   : > { %v1007_v48 = vpop.permute.xlu1 %1006 }
 0xfa5   : > { %v1009_v49 = vadd.f32 %v1714_v41, %v1007_v48 }
 0xfa7   : > { %v1017_v50 = vsel %vm1016_vm13, %v1009_v49, %v921_v20 }
 0xfa8   : > { %v2003_v51 = vpack.c.bf16 %v1017_v50, %v1017_v50 }
 0xfaa   : > { %1029 = vrot.lane.b32.xlu0 %v2003_v51, %s1743_s15 }
0x101c   : > { %v1030_v52 = vpop.permute.xlu0 %1029 }
0x101d   : > { %1644 = vmatmul.mubr.msk.bf16.vlgmr.msra.gmra.mxu1 %vm541_vm2, %v1030_v52 }
0x101e   : > { %1656 = vmatpush3.bf16.msra.mxu1 %v1831_v4  ;;  %1659 = vmatprep.mubr.msk.bf16.mxu1 %vm1742_vm1, %v1741_v0  ;;  %v1076_v4 = vld [vmem:[%s1075_s23] sm:$0xff]  ;;  %s2072_s23 = scalar_lea.vmem %s2125_s7, %s1551_s28  ;;  %s1541_s28 = sshll.u32 %s2035_s24, 2 }
0x101f   : > { %1657 = vmatprep.subr.bf16.mxu1 %v1741_v0  ;;  %s641_s30 = scalar_lea.vmem %s2072_s23, %s1511_s29  ;;  %s930_s22 = scalar_lea.vmem %s2072_s23, %s1526_s13 }
0x1020   : > { %s1218_s18 = scalar_lea.vmem %s2072_s23, %s1541_s28 }
0x1022   : > { %1658 = vmatpush3.bf16.msra.mxu1 %v1839_v7 }
0x10dd   : > { %v1068_v54 = vpop.f32.mrf.mxu1 }
0x10de   : > { %v1069_v55 = vadd.f32 %v1875_v15, %v1068_v54 }
0x10df   : > { %v1645_v56 = vpop.f32.mrf.mxu1 }
0x10e0   : > { %1085 = vrot.lane.b32.xlu1 %v1069_v55, %s1743_s15  ;;  %v1077_v60 = vadd.f32 %v1076_v4, %v1069_v55 }
0x10e1   : > { %v1071_v58 = vpop.f32.mrf.mxu1 }
0x10e2   : > { %v1534_v0 = vmul.f32 -1.442695, %v1077_v60  ;;  %v1268_v58 = vld [vmem:[%s1267_s17] sm:$0xff]  ;;  %s1531_s17 = sshll.u32 %s1994_s14, 2  ;;  %s1122_s14 = scalar_lea.vmem %s2072_s23, %s1536_s11 }
0x10e3   : > { %v1646_v59 = vpop.f32.mrf.mxu1  ;;  %s1026_s26 = scalar_lea.vmem %s2072_s23, %s1531_s17 }
0x10e4   : > { %1715 = vpow2.f32 %v1534_v0 }
0x10f1   : > { %v1716_v7 = vpop.eup %1715 }
0x10f2   : > { %v1081_v61 = vadd.f32 1.0, %v1716_v7 }
0x10f4   : > { %1717 = vrcp.f32 %v1081_v61 }
0x1101   : > { %v1718_v63 = vpop.eup %1717 }
0x1152   : > { %v1086_v1 = vpop.permute.xlu1 %1085 }
0x1153   : > { %v1088_v2 = vmul.f32 %v1718_v63, %v1086_v1 }
0x1155   : > { %1090 = vrot.lane.b32.xlu0 %v1088_v2, %s1743_s15 }
0x1159   : > { %1110 = vperm.xlu0 %1677, %v1108_v3  }
0x11c7   : > { %v1091_v5 = vpop.permute.xlu0 %1090 }
0x11c8   : > { %v1093_v6 = vadd.f32 %v1091_v5, %v1076_v4 }
0x11ca   : > { %1719 = vtanh.f32 %v1093_v6 }
0x11d4   : > { %v1111_v12 = vpop.permute.xlu0 %1110 }
0x11d5   : > { %vm1112_vm15 = vcmp.eq.s32.totalorder %v1111_v12, 1 }
0x11d7   : > { %v1720_v8 = vpop.eup %1719 }
0x11d8   : > { %v1095_v9 = vsub.f32 %v1017_v50, %v1720_v8 }
0x11da   : > { %1097 = vrot.lane.b32.xlu1 %v1095_v9, %s1746_s25 }
0x124c   : > { %v1098_v10 = vpop.permute.xlu1 %1097 }
0x124d   : > { %v1100_v11 = vmul.f32 %v1718_v63, %v1098_v10 }
0x124f   : > { %1102 = vrot.lane.b32.xlu1 %v1100_v11, %s1745_s21 }
0x12c1   : > { %v1103_v13 = vpop.permute.xlu1 %1102 }
0x12c2   : > { %v1105_v14 = vadd.f32 %v1720_v8, %v1103_v13 }
0x12c4   : > { %v1113_v16 = vsel %vm1112_vm15, %v1105_v14, %v1017_v50 }
0x12c5   : > { %v2026_v17 = vpack.c.bf16 %v1113_v16, %v1113_v16 }
0x12c7   : > { %1125 = vrot.lane.b32.xlu0 %v2026_v17, %s1743_s15 }
0x1339   : > { %v1126_v18 = vpop.permute.xlu0 %1125 }
0x133a   : > { %1652 = vmatmul.mubr.msk.bf16.vlgmr.msra.gmra.mxu0 %vm541_vm2, %v1126_v18 }
0x13fa   : > { %v1164_v19 = vpop.f32.mrf.mxu0 }
0x13fb   : > { %v1165_v20 = vadd.f32 %v1875_v15, %v1164_v19 }
0x13fc   : > { %v1653_v22 = vpop.f32.mrf.mxu0 }
0x13fd   : > { %1181 = vrot.lane.b32.xlu1 %v1165_v20, %s1743_s15  ;;  %v1173_v27 = vadd.f32 %v1172_v26, %v1165_v20 }
0x13fe   : > { %v1167_v23 = vpop.f32.mrf.mxu0 }
0x13ff   : > { %v1539_v28 = vmul.f32 -1.442695, %v1173_v27 }
0x1400   : > { %v1654_v25 = vpop.f32.mrf.mxu0 }
0x1401   : > { %1721 = vpow2.f32 %v1539_v28 }
0x140e   : > { %v1722_v29 = vpop.eup %1721 }
0x140f   : > { %v1177_v30 = vadd.f32 1.0, %v1722_v29 }
0x1411   : > { %1723 = vrcp.f32 %v1177_v30 }
0x141e   : > { %v1724_v32 = vpop.eup %1723 }
0x146f   : > { %v1182_v33 = vpop.permute.xlu1 %1181 }
0x1470   : > { %v1184_v34 = vmul.f32 %v1724_v32, %v1182_v33 }
0x1472   : > { %1186 = vrot.lane.b32.xlu0 %v1184_v34, %s1743_s15 }
0x1476   : > { %1206 = vperm.xlu0 %1677, %v1204_v35  }
0x14e4   : > { %v1187_v36 = vpop.permute.xlu0 %1186 }
0x14e5   : > { %v1189_v37 = vadd.f32 %v1187_v36, %v1172_v26 }
0x14e7   : > { %1725 = vtanh.f32 %v1189_v37 }
0x14f1   : > { %v1207_v42 = vpop.permute.xlu0 %1206 }
0x14f2   : > { %vm1208_vm1 = vcmp.eq.s32.totalorder %v1207_v42, 1 }
0x14f4   : > { %v1726_v38 = vpop.eup %1725 }
0x14f5   : > { %v1191_v39 = vsub.f32 %v1113_v16, %v1726_v38 }
0x14f7   : > { %1193 = vrot.lane.b32.xlu1 %v1191_v39, %s1746_s25 }
0x1569   : > { %v1194_v40 = vpop.permute.xlu1 %1193 }
0x156a   : > { %v1196_v41 = vmul.f32 %v1724_v32, %v1194_v40 }
0x156c   : > { %1198 = vrot.lane.b32.xlu1 %v1196_v41, %s1745_s21 }
0x15de   : > { %v1199_v44 = vpop.permute.xlu1 %1198 }
0x15df   : > { %v1201_v46 = vadd.f32 %v1726_v38, %v1199_v44 }
0x15e1   : > { %v2044_v47 = vsel %vm1208_vm1, %v1201_v46, %v1113_v16 }
0x15e2   : > { %v1210_v48 = vpack.c.bf16 %v2044_v47, %v2044_v47 }
0x15e4   : > { %1221 = vrot.lane.b32.xlu0 %v1210_v48, %s1743_s15 }
0x1656   : > { %v1222_v49 = vpop.permute.xlu0 %1221 }
0x1657   : > { %1660 = vmatmul.mubr.msk.bf16.vlgmr.msra.gmra.mxu1 %vm541_vm2, %v1222_v49 }
0x1717   : > { %v1260_v50 = vpop.f32.mrf.mxu1 }
0x1718   : > { %v1261_v52 = vadd.f32 %v1875_v15, %v1260_v50  ;;  %v1298_v15 = vstv %s2054_s12 }
0x1719   : > { %v1661_v54 = vpop.f32.mrf.mxu1  ;;  %vm1299_vm3 = vcmp.gt.s32.totalorder %v1896_v43, %v1298_v15 }
0x171a   : > { %1277 = vrot.lane.b32.xlu1 %v1261_v52, %s1743_s15  ;;  %v1269_v59 = vadd.f32 %v1268_v58, %v1261_v52  ;;  %v1300_v63 = vsel %vm1299_vm3, 1, %v1744_v45 }
0x171b   : > { %v1263_v55 = vpop.f32.mrf.mxu1 }
0x171c   : > { %v1544_v4 = vmul.f32 -1.442695, %v1269_v59 }
0x171d   : > { %v1662_v56 = vpop.f32.mrf.mxu1 }
0x171e   : > { %1727 = vpow2.f32 %v1544_v4 }
0x172b   : > { %v1728_v60 = vpop.eup %1727 }
0x172c   : > { %v1273_v0 = vadd.f32 1.0, %v1728_v60 }
0x172e   : > { %1729 = vrcp.f32 %v1273_v0 }
0x173b   : > { %v1730_v7 = vpop.eup %1729 }
0x178c   : > { %v1278_v61 = vpop.permute.xlu1 %1277 }
0x178d   : > { %v1280_v62 = vmul.f32 %v1730_v7, %v1278_v61 }
0x178f   : > { %1282 = vrot.lane.b32.xlu0 %v1280_v62, %s1743_s15 }
0x1793   : > { %1302 = vperm.xlu0 %1677, %v1300_v63  }
0x1797   : > { %637 = vrot.lane.b32.xlu0 %v1908_v57, %s1743_s15 }
0x179b   : > { %830 = vrot.lane.b32.xlu0 %v1956_v53, %s1743_s15 }
0x179f   : > { %1022 = vrot.lane.b32.xlu0 %v2003_v51, %s1743_s15 }
0x17a3   : > { %1214 = vrot.lane.b32.xlu0 %v1210_v48, %s1743_s15 }
0x1801   : > { %v1283_v1 = vpop.permute.xlu0 %1282 }
0x1802   : > { %v1285_v2 = vadd.f32 %v1283_v1, %v1268_v58 }
0x1804   : > { %1731 = vtanh.f32 %v1285_v2 }
0x180e   : > { %v1303_v43 = vpop.permute.xlu0 %1302 }
0x180f   : > { %vm1304_vm5 = vcmp.eq.s32.totalorder %v1303_v43, 1 }
0x1811   : > { %v1732_v45 = vpop.eup %1731 }
0x1812   : > { %v638_v57 = vpop.permute.xlu0 %637  ;;  %v1287_v53 = vsub.f32 %v2044_v47, %v1732_v45 }
0x1813   : > { %643 = vst.msk [vmem:[%s641_s30] sm:$0xf] %vm642_vm4, %v638_v57  ;;  %s1314_s30 = scalar_lea.vmem %s2072_s23, %s1546_s20 }
0x1814   : > { %1289 = vrot.lane.b32.xlu1 %v1287_v53, %s1746_s25  ;;  %s834_s25 = scalar_lea.vmem %s2072_s23, %s1521_s16 }
0x1816   : > { %v831_v6 = vpop.permute.xlu0 %830 }
0x181a   : > { %v1023_v10 = vpop.permute.xlu0 %1022 }
0x181e   : > { %v1215_v13 = vpop.permute.xlu0 %1214 }
0x1886   : > { %v1290_v51 = vpop.permute.xlu1 %1289 }
0x1887   : > { %v1292_v3 = vmul.f32 %v1730_v7, %v1290_v51 }
0x1889   : > { %1294 = vrot.lane.b32.xlu1 %v1292_v3, %s1745_s21  ;;  %s738_s21 = scalar_lea.vmem %s2072_s23, %s1516_s9 }
0x188d   : > { %734 = vrot.lane.b32.xlu1 %v1932_v24, %s1743_s15 }
0x1891   : > { %926 = vrot.lane.b32.xlu1 %v1980_v21, %s1743_s15 }
0x1895   : > { %1118 = vrot.lane.b32.xlu1 %v2026_v17, %s1743_s15 }
0x18fb   : > { %v1295_v5 = vpop.permute.xlu1 %1294 }
0x18fc   : > { %v1297_v8 = vadd.f32 %v1732_v45, %v1295_v5 }
0x18fe   : > { %v1305_v24 = vsel %vm1304_vm5, %v1297_v8, %v2044_v47 }
0x18ff   : > { %v735_v21 = vpop.permute.xlu1 %734  ;;  %1317 = vrot.lane.b32.xlu0 %v1305_v24, %s1743_s15  ;;  %v1559_v9 = vpack.c.bf16 %v1305_v24, %v1305_v24 }
0x1900   : > { %739 = vst.msk [vmem:[%s738_s21] sm:$0xf] %vm642_vm4, %v735_v21 }
0x1901   : > { %835 = vst.msk [vmem:[%s834_s25] sm:$0xf] %vm642_vm4, %v831_v6  ;;  %1310 = vrot.lane.b32.xlu1 %v1559_v9, %s1743_s15 }
0x1903   : > { %v927_v11 = vpop.permute.xlu1 %926 }
0x1904   : > { %931 = vst.msk [vmem:[%s930_s22] sm:$0xf] %vm642_vm4, %v927_v11 }
0x1905   : > { %1027 = vst.msk [vmem:[%s1026_s26] sm:$0xf] %vm642_vm4, %v1023_v10 }
0x1907   : > { %v1119_v12 = vpop.permute.xlu1 %1118 }
0x1908   : > { %1123 = vst.msk [vmem:[%s1122_s14] sm:$0xf] %vm642_vm4, %v1119_v12 }
0x1909   : > { %1219 = vst.msk [vmem:[%s1218_s18] sm:$0xf] %vm642_vm4, %v1215_v13 }
0x1971   : > { %v1318_v14 = vpop.permute.xlu0 %1317 }
0x1972   : > { %1320 = vst.msk [vmem:[%s381_s19] sm:$0xff] %vm541_vm2, %v1318_v14 }
0x1973   : > { %v1311_v16 = vpop.permute.xlu1 %1310 }
0x1974   : > { %1315 = vst.msk [vmem:[%s1314_s30] sm:$0xf] %vm642_vm4, %v1311_v16 }
0x1975 PF: > { %s19_s27 = sadd.s32 1, %s1739_s27  }
0x1976   : > { %p16_p5 = scmp.ge.s32.totalorder %s19_s27, 4  }
0x1978   :  { %18 = sbr.rel (!%p16_p5) target bundleno = 1 (0x1), region = 118 }

</bundles_post_ra>
